<compile_context>
chip_gen: v6e
topology: v6e:2x2x1
jax: 0.10.0
libtpu: 0.0.40
codegen_flags: <defaults>
</compile_context>

<pallas_src>
import functools

import jax
import jax.numpy as jnp
from jax.experimental import pallas as pl
from jax.experimental.pallas import tpu as pltpu

EPS = 1e-5  # PyTorch BatchNorm1d default eps


def _round_up(x, m):
    return ((x + m - 1) // m) * m


def _lfa_kernel(TN, k, m, n_valid,
                geo_ref, x1nb_ref,
                wgeo_ref, g1_ref, be1_ref,
                wll_ref, wrl_ref, wlr_ref, wrr_ref, bal_ref, bar_ref,
                g2l_ref, g2r_ref, be2l_ref, be2r_ref,
                wot_ref, wob_ref, bo_ref,
                o_ref,
                st1_ref, st2l_ref, st2r_ref):
    p = pl.program_id(0)          # pass index 0..2 (sequential)
    t = pl.program_id(1)          # tile index over query points
    Pm = k * m                    # packed lane width (neighbor-major, j*m + c)
    cnt_nb = float(n_valid * k)   # BN1 / BN2 sample count (N*k rows)

    # Validity mask for the zero-padded tail tile (kept out of BN moments).
    valid = jnp.clip(n_valid - t * TN, 0, TN)
    row = jax.lax.broadcasted_iota(jnp.int32, (TN, 1), 0)
    mask = (row < valid).astype(jnp.float32)                # [TN, 1]

    # Circular roll-trees over the k-groups (lanes {j*m + c, j=0..k-1}); after
    # log2(k) steps every lane holds the group sum/max, already "tiled" so it
    # can be used directly against the lane-tiled BN params.  Requires k to be
    # a power of two (asserted in the wrapper); all rolls are <=128 lanes.
    def gsum(x):
        s = Pm // 2
        while s >= m:
            x = x + pltpu.roll(x, shift=s, axis=x.ndim - 1)
            s //= 2
        return x

    def gmax(x):
        s = Pm // 2
        while s >= m:
            x = jnp.maximum(x, pltpu.roll(x, shift=s, axis=x.ndim - 1))
            s //= 2
        return x

    def bn_fold(st_ref, g_ref, b_ref, count):
        # Training-mode BN folded to a per-channel FMA (biased variance).
        stats = gsum(st_ref[...]) * (1.0 / count)           # [2, Pm] tiled
        mu = stats[0:1, :]
        var = stats[1:2, :] - mu * mu
        a = g_ref[...] * jax.lax.rsqrt(var + EPS)
        c = b_ref[...] - mu * a
        return a, c

    def posmlp_pre():
        # Whole posmlp Linear (posenc concat + algebraic fold + bias) as one
        # MXU dot in the packed layout: h[n, j*m + c] = posenc[n, j, :] @ W_pos[:, c] + b.
        return jnp.dot(geo_ref[...].astype(jnp.float32), wgeo_ref[...],
                       preferred_element_type=jnp.float32)  # [TN, Pm]

    def fxyz_ffeat():
        a1, c1 = bn_fold(st1_ref, g1_ref, be1_ref, cnt_nb)
        fxyz = jnp.maximum(posmlp_pre() * a1 + c1, 0.0)     # [TN, Pm]
        ffeat = x1nb_ref[...].astype(jnp.float32)           # [TN, Pm]
        return fxyz, ffeat

    def scores_pre(fxyz, ffeat):
        # attmlp Linear over stack=[fxyz, ffeat]: block-diagonal (per-neighbor)
        # weights, split into the two output halves (channels 0..m-1 / m..2m-1).
        sl = (jnp.dot(fxyz, wll_ref[...], preferred_element_type=jnp.float32)
              + jnp.dot(ffeat, wrl_ref[...], preferred_element_type=jnp.float32)
              + bal_ref[...])
        sr = (jnp.dot(fxyz, wlr_ref[...], preferred_element_type=jnp.float32)
              + jnp.dot(ffeat, wrr_ref[...], preferred_element_type=jnp.float32)
              + bar_ref[...])
        return sl, sr                                       # each [TN, Pm]

    # ---- pass 0: BN1 moments of the posmlp pre-activation --------------------
    @pl.when((p == 0) & (t == 0))
    def _():
        st1_ref[...] = jnp.zeros_like(st1_ref)

    @pl.when(p == 0)
    def _():
        h = posmlp_pre() * mask
        st1_ref[0:1, :] += jnp.sum(h, axis=0, keepdims=True)
        st1_ref[1:2, :] += jnp.sum(h * h, axis=0, keepdims=True)

    # ---- pass 1: BN2 moments of the attmlp pre-activation --------------------
    @pl.when((p == 1) & (t == 0))
    def _():
        st2l_ref[...] = jnp.zeros_like(st2l_ref)
        st2r_ref[...] = jnp.zeros_like(st2r_ref)

    @pl.when(p == 1)
    def _():
        fxyz, ffeat = fxyz_ffeat()
        sl, sr = scores_pre(fxyz, ffeat)
        sl = sl * mask
        sr = sr * mask
        st2l_ref[0:1, :] += jnp.sum(sl, axis=0, keepdims=True)
        st2l_ref[1:2, :] += jnp.sum(sl * sl, axis=0, keepdims=True)
        st2r_ref[0:1, :] += jnp.sum(sr, axis=0, keepdims=True)
        st2r_ref[1:2, :] += jnp.sum(sr * sr, axis=0, keepdims=True)

    # ---- pass 2: BN2 fold + softmax over k + attention pooling + mlpout ------
    # Writes the pre-BN3 activation; BN3/ReLU/skip/LeakyReLU run in XLA.
    @pl.when(p == 2)
    def _():
        fxyz, ffeat = fxyz_ffeat()
        sl, sr = scores_pre(fxyz, ffeat)
        a2l, c2l = bn_fold(st2l_ref, g2l_ref, be2l_ref, cnt_nb)
        a2r, c2r = bn_fold(st2r_ref, g2r_ref, be2r_ref, cnt_nb)
        sbl = jnp.maximum(sl * a2l + c2l, 0.0)
        sbr = jnp.maximum(sr * a2r + c2r, 0.0)
        # Softmax over the k neighbors per channel (torch Softmax(dim=1)):
        # per-group max/sum via roll-trees, exact division for parity.
        el = jnp.exp(sbl - gmax(sbl))
        er = jnp.exp(sbr - gmax(sbr))
        attl = el / gsum(el)
        attr = er / gsum(er)
        # (stack * att).sum(k) @ W_out folded into two dots with row-tiled W_out.
        o = (jnp.dot(fxyz * attl, wot_ref[...], preferred_element_type=jnp.float32)
             + jnp.dot(ffeat * attr, wob_ref[...], preferred_element_type=jnp.float32)
             + bo_ref[...])
        o_ref[...] = o


def init_params(key, inc, outc):
    mid = outc // 4
    ks = jax.random.split(key, 8)

    def lin(kk, fi, fo):
        return (jax.random.normal(kk, (fi, fo), jnp.float32) /
                jnp.sqrt(jnp.float32(fi)))

    def bias(kk, c):
        return 0.1 * jax.random.normal(kk, (1, c), jnp.float32)

    return dict(
        w_in=lin(ks[0], inc, mid),                # nn.Linear(inc, mid, bias=False)
        w_skip=lin(ks[1], inc, outc),             # nn.Linear(inc, outc, bias=False)
        w_pos=lin(ks[2], 10, mid),
        b_pos=bias(ks[3], mid),
        g1=jnp.ones((1, mid), jnp.float32),
        be1=jnp.zeros((1, mid), jnp.float32),
        w_att=lin(ks[4], 2 * mid, 2 * mid),
        b_att=bias(ks[5], 2 * mid),
        g2=jnp.ones((1, 2 * mid), jnp.float32),
        be2=jnp.zeros((1, 2 * mid), jnp.float32),
        w_out=lin(ks[6], 2 * mid, outc),
        b_out=bias(ks[7], outc),
        g3=jnp.ones((1, outc), jnp.float32),
        be3=jnp.zeros((1, outc), jnp.float32),
    )


def lfa_forward(params, F, C, k=16, tile_n=512, neighbor_dtype=jnp.float32):
    """Mirrors LFA.forward(x) with idx=None: returns (out, idx, dist)."""
    N, inc = F.shape
    m = params["w_in"].shape[1]
    outc = params["w_skip"].shape[1]
    assert k >= 2 and (k & (k - 1)) == 0, "k must be a power of two (roll-tree)"
    Pm = k * m

    pos = C[:, :3].astype(jnp.float32)                      # x.C[:, :3].float()

    # knn(x): pointops_cuda.knnquery_cuda has no Pallas equivalent -> XLA glue.
    d2 = jnp.sum((pos[:, None, :] - pos[None, :, :]) ** 2, axis=-1)
    idx = jnp.argsort(d2, axis=1)[:, :k].astype(jnp.int32)            # [N, k]
    dist = jnp.take_along_axis(d2, idx, axis=1).astype(jnp.float32)   # [N, k]
    # TODO(synk): pointops knnquery distance convention (sqrt vs squared) varies; squared kept.

    F32 = F.astype(jnp.float32)
    # in_lin BEFORE the gather (identical to PyTorch: ffeats = x1[idx]).
    x1 = jnp.dot(F32, params["w_in"])                       # [N, m]
    x1_nb = x1[idx].reshape(N, Pm)                          # lane-dense [N, k*m]
    pos_nb = pos[idx]                                       # [N, k, 3]

    # Packed geometry stream: per neighbor (dist, xn.xyz), then xq.xyz, then 1.
    # dist rides along for free (stream pads to 128 lanes anyway).
    geo_nb = jnp.concatenate([dist[:, :, None], pos_nb], axis=2).reshape(N, 4 * k)
    geo = jnp.concatenate([geo_nb, pos, jnp.ones((N, 1), jnp.float32)], axis=1)
    GW = _round_up(4 * k + 4, 8)
    geo = jnp.pad(geo, ((0, 0), (0, GW - (4 * k + 4))))     # [N, GW]

    # posenc = [dist, xq-xn, xq, xn] @ W_pos + b folded into one block matrix
    # so the whole posmlp Linear is a single MXU dot in the packed layout.
    w_pos, b_pos = params["w_pos"], params["b_pos"]
    w0 = w_pos[0:1]
    w_nb = w_pos[7:10] - w_pos[1:4]
    w_xyz = w_pos[1:4] + w_pos[4:7]
    eye_k = jnp.eye(k, dtype=jnp.float32)
    w_blk = jnp.concatenate([w0, w_nb], axis=0)             # [4, m] per-neighbor
    wgeo = jnp.concatenate([
        jnp.kron(eye_k, w_blk),                             # [4k, k*m] block-diag
        jnp.tile(jnp.concatenate([w_xyz, b_pos], axis=0), (1, k)),  # xq + bias rows
        jnp.zeros((GW - (4 * k + 4), Pm), jnp.float32),     # GW padding rows
    ], axis=0)                                              # [GW, k*m]

    def tile_lanes(v):                                      # [1, C] -> [1, k*C]
        return jnp.tile(v, (1, k))

    w_att, b_att = params["w_att"], params["b_att"]
    wll = jnp.kron(eye_k, w_att[0:m, 0:m])                  # fxyz  -> scores[:, :m]
    wrl = jnp.kron(eye_k, w_att[m:2 * m, 0:m])              # ffeat -> scores[:, :m]
    wlr = jnp.kron(eye_k, w_att[0:m, m:2 * m])              # fxyz  -> scores[:, m:]
    wrr = jnp.kron(eye_k, w_att[m:2 * m, m:2 * m])          # ffeat -> scores[:, m:]
    bal, bar = tile_lanes(b_att[:, 0:m]), tile_lanes(b_att[:, m:2 * m])
    g1t, be1t = tile_lanes(params["g1"]), tile_lanes(params["be1"])
    g2l, g2r = tile_lanes(params["g2"][:, 0:m]), tile_lanes(params["g2"][:, m:2 * m])
    be2l, be2r = tile_lanes(params["be2"][:, 0:m]), tile_lanes(params["be2"][:, m:2 * m])

    w_out = params["w_out"]
    wot = jnp.tile(w_out[0:m, :], (k, 1))                   # [k*m, outc]
    wob = jnp.tile(w_out[m:2 * m, :], (k, 1))               # [k*m, outc]

    # Tile the query points; pad to a multiple of the tile (padding is masked
    # out of the BN moments and sliced off the output).
    TN = min(_round_up(max(tile_n, 8), 8), _round_up(N, 8))
    T = pl.cdiv(N, TN)
    n_pad = T * TN - N

    def padrows(a):
        return a if n_pad == 0 else jnp.pad(a, ((0, n_pad), (0, 0)))

    # TODO(synk): set neighbor_dtype=jnp.bfloat16 on v6e/v7x to halve the heavy
    #             HBM read streams (kernel upcasts to f32); f32 kept for parity.
    geo_p = padrows(geo).astype(neighbor_dtype)
    x1nb_p = padrows(x1_nb).astype(neighbor_dtype)

    stream2 = lambda p, t: (t, 0)
    const2 = lambda p, t: (0, 0)
    # x1[idx] is unused in pass 0 and the output is only written in pass 2:
    # pin their block indices elsewhere so the DMA / writeback is skipped.
    x1map = lambda p, t: (jnp.where(p == 0, 0, t), 0)
    outmap = lambda p, t: (jnp.where(p == 2, t, 0), 0)

    in_specs = [
        pl.BlockSpec((TN, GW), stream2),               # packed geometry stream
        pl.BlockSpec((TN, Pm), x1map),                 # packed gathered in_lin feats
        pl.BlockSpec((GW, Pm), const2),                # folded posmlp weight
        pl.BlockSpec((1, Pm), const2),                 # gamma1 (lane-tiled)
        pl.BlockSpec((1, Pm), const2),                 # beta1
        pl.BlockSpec((Pm, Pm), const2),                # attmlp block weights
        pl.BlockSpec((Pm, Pm), const2),
        pl.BlockSpec((Pm, Pm), const2),
        pl.BlockSpec((Pm, Pm), const2),
        pl.BlockSpec((1, Pm), const2),                 # b_att left / right
        pl.BlockSpec((1, Pm), const2),
        pl.BlockSpec((1, Pm), const2),                 # gamma2 left / right
        pl.BlockSpec((1, Pm), const2),
        pl.BlockSpec((1, Pm), const2),                 # beta2 left / right
        pl.BlockSpec((1, Pm), const2),
        pl.BlockSpec((Pm, outc), const2),              # mlpout weights (row-tiled)
        pl.BlockSpec((Pm, outc), const2),
        pl.BlockSpec((1, outc), const2),               # b_out
    ]

    o_pre = pl.pallas_call(
        functools.partial(_lfa_kernel, TN, k, m, N),
        out_shape=jax.ShapeDtypeStruct((T * TN, outc), jnp.float32),
        grid=(3, T),
        in_specs=in_specs,
        out_specs=pl.BlockSpec((TN, outc), outmap),
        scratch_shapes=[pltpu.VMEM((2, Pm), jnp.float32),   # BN1 sum / sumsq
                        pltpu.VMEM((2, Pm), jnp.float32),   # BN2 left sum / sumsq
                        pltpu.VMEM((2, Pm), jnp.float32)],  # BN2 right sum / sumsq
        compiler_params=pltpu.CompilerParams(
            # Both axes 'arbitrary': BN moments are carried sequentially in
            # VMEM scratch across tiles and passes (v7x per-core partials: TODO).
            dimension_semantics=("arbitrary", "arbitrary"),
            # 48 MiB leaves headroom under v7x's 64 MiB physical VMEM; v5e/v6e
            # (128 MiB) have plenty of slack for the packed tiles.
            vmem_limit_bytes=48 * 1024 * 1024),
    )(geo_p, x1nb_p, wgeo, g1t, be1t, wll, wrl, wlr, wrr, bal, bar,
      g2l, g2r, be2l, be2r, wot, wob, params["b_out"])

    # BN3 (training mode, biased var) + ReLU + skip + LeakyReLU(0.1): tiny
    # [N, outc] epilogue fused by XLA (replaces the former full pass-3 recompute).
    o = o_pre[:N]
    mu3 = jnp.mean(o, axis=0, keepdims=True)
    var3 = jnp.mean(o * o, axis=0, keepdims=True) - mu3 * mu3
    a3 = params["g3"] * jax.lax.rsqrt(var3 + EPS)
    x1out = jnp.maximum((o - mu3) * a3 + params["be3"], 0.0)
    y = jnp.dot(F32, params["w_skip"]) + x1out
    out = jnp.where(y >= 0.0, y, 0.1 * y)
    return out, idx, dist


def _lfa_reference(params, F, C, k=16):
    """Dense, unfused pure-JAX forward mirroring the PyTorch module (for checks)."""
    pos = C[:, :3].astype(jnp.float32)
    d2 = jnp.sum((pos[:, None, :] - pos[None, :, :]) ** 2, axis=-1)
    idx = jnp.argsort(d2, axis=1)[:, :k]
    dist = jnp.take_along_axis(d2, idx, axis=1)
    F32 = F.astype(jnp.float32)
    x1 = F32 @ params["w_in"]

    def bn(x, g, b, axes):
        mu = jnp.mean(x, axis=axes, keepdims=True)
        var = jnp.mean(x * x, axis=axes, keepdims=True) - mu * mu
        return (x - mu) * (g * jax.lax.rsqrt(var + EPS)) + b

    xq = jnp.tile(pos[:, None, :], (1, k, 1))
    xn = pos[idx]
    posenc = jnp.concatenate([dist[:, :, None], xq - xn, xq, xn], axis=2)
    fxyz = jnp.maximum(bn(posenc @ params["w_pos"] + params["b_pos"],
                          params["g1"], params["be1"], (0, 1)), 0.0)
    ffeat = x1[idx]
    stack = jnp.concatenate([fxyz, ffeat], axis=2)
    s = jnp.maximum(bn(stack @ params["w_att"] + params["b_att"],
                       params["g2"], params["be2"], (0, 1)), 0.0)
    att = jax.nn.softmax(s, axis=1)
    pooled = jnp.sum(stack * att, axis=1)
    o = jnp.maximum(bn(pooled @ params["w_out"] + params["b_out"],
                       params["g3"], params["be3"], (0,)), 0.0)
    y = F32 @ params["w_skip"] + o
    return jnp.where(y >= 0.0, y, 0.1 * y)


if __name__ == "__main__":
    key = jax.random.PRNGKey(0)
    kF, kC, kP = jax.random.split(key, 3)

    N, inc, outc, k = 72, 16, 32, 16
    F = jax.random.normal(kF, (N, inc), jnp.float32)              # x.F
    coords = jax.random.randint(kC, (N, 3), 0, 32)                # voxel coords
    batch_col = jnp.zeros((N, 1), jnp.int32)                      # single batch
    C = jnp.concatenate([coords, batch_col], axis=1)              # x.C: [N, 4]

    params = init_params(kP, inc, outc)
    # tile_n=32 -> 3 tiles with a masked padded tail, exercising the grid path,
    # the pinned pass-aware index maps and the BN tail masking.
    out, idx, dist = lfa_forward(params, F, C, k=k, tile_n=32)
    jax.block_until_ready(out)
    assert out.shape == (N, outc)
    assert bool(jnp.all(jnp.isfinite(out)))

    ref = _lfa_reference(params, F, C, k=k)
    assert bool(jnp.allclose(out, ref, rtol=2e-3, atol=2e-3)), (
        float(jnp.max(jnp.abs(out - ref))))
    print("KERNEL_OK")
</pallas_src>

<mosaic_0001>
module attributes {stable_mosaic.version = 11 : i64} {
  func.func @_lfa_kernel(%arg0: i32, %arg1: i32, %arg2: memref<32x72xf32, #tpu.memory_space<vmem>>, %arg3: memref<32x128xf32, #tpu.memory_space<vmem>>, %arg4: memref<72x128xf32, #tpu.memory_space<vmem>>, %arg5: memref<1x128xf32, #tpu.memory_space<vmem>>, %arg6: memref<1x128xf32, #tpu.memory_space<vmem>>, %arg7: memref<128x128xf32, #tpu.memory_space<vmem>>, %arg8: memref<128x128xf32, #tpu.memory_space<vmem>>, %arg9: memref<128x128xf32, #tpu.memory_space<vmem>>, %arg10: memref<128x128xf32, #tpu.memory_space<vmem>>, %arg11: memref<1x128xf32, #tpu.memory_space<vmem>>, %arg12: memref<1x128xf32, #tpu.memory_space<vmem>>, %arg13: memref<1x128xf32, #tpu.memory_space<vmem>>, %arg14: memref<1x128xf32, #tpu.memory_space<vmem>>, %arg15: memref<1x128xf32, #tpu.memory_space<vmem>>, %arg16: memref<1x128xf32, #tpu.memory_space<vmem>>, %arg17: memref<128x32xf32, #tpu.memory_space<vmem>>, %arg18: memref<128x32xf32, #tpu.memory_space<vmem>>, %arg19: memref<1x32xf32, #tpu.memory_space<vmem>>, %arg20: memref<32x32xf32, #tpu.memory_space<vmem>>, %arg21: memref<2x128xf32, #tpu.memory_space<vmem>>, %arg22: memref<2x128xf32, #tpu.memory_space<vmem>>, %arg23: memref<2x128xf32, #tpu.memory_space<vmem>>) attributes {dimension_semantics = [#tpu.dimension_semantics<arbitrary>, #tpu.dimension_semantics<arbitrary>], iteration_bounds = array<i64: 3, 3>, scalar_prefetch = 0 : i64, scratch_operands = 3 : i64, tpu.core_type = #tpu.core_type<tc>, window_params = [{transform_indices = @transform_0, window_bounds = array<i64: 32, 72>}, {transform_indices = @transform_1, window_bounds = array<i64: 32, 128>}, {pipeline_mode = #tpu.pipeline_mode<synchronous>, transform_indices = @transform_2, window_bounds = array<i64: 72, 128>}, {pipeline_mode = #tpu.pipeline_mode<synchronous>, transform_indices = @transform_3, window_bounds = array<i64: 1, 128>}, {pipeline_mode = #tpu.pipeline_mode<synchronous>, transform_indices = @transform_4, window_bounds = array<i64: 1, 128>}, {pipeline_mode = #tpu.pipeline_mode<synchronous>, transform_indices = @transform_5, window_bounds = array<i64: 128, 128>}, {pipeline_mode = #tpu.pipeline_mode<synchronous>, transform_indices = @transform_6, window_bounds = array<i64: 128, 128>}, {pipeline_mode = #tpu.pipeline_mode<synchronous>, transform_indices = @transform_7, window_bounds = array<i64: 128, 128>}, {pipeline_mode = #tpu.pipeline_mode<synchronous>, transform_indices = @transform_8, window_bounds = array<i64: 128, 128>}, {pipeline_mode = #tpu.pipeline_mode<synchronous>, transform_indices = @transform_9, window_bounds = array<i64: 1, 128>}, {pipeline_mode = #tpu.pipeline_mode<synchronous>, transform_indices = @transform_10, window_bounds = array<i64: 1, 128>}, {pipeline_mode = #tpu.pipeline_mode<synchronous>, transform_indices = @transform_11, window_bounds = array<i64: 1, 128>}, {pipeline_mode = #tpu.pipeline_mode<synchronous>, transform_indices = @transform_12, window_bounds = array<i64: 1, 128>}, {pipeline_mode = #tpu.pipeline_mode<synchronous>, transform_indices = @transform_13, window_bounds = array<i64: 1, 128>}, {pipeline_mode = #tpu.pipeline_mode<synchronous>, transform_indices = @transform_14, window_bounds = array<i64: 1, 128>}, {pipeline_mode = #tpu.pipeline_mode<synchronous>, transform_indices = @transform_15, window_bounds = array<i64: 128, 32>}, {pipeline_mode = #tpu.pipeline_mode<synchronous>, transform_indices = @transform_16, window_bounds = array<i64: 128, 32>}, {pipeline_mode = #tpu.pipeline_mode<synchronous>, transform_indices = @transform_17, window_bounds = array<i64: 1, 32>}, {transform_indices = @transform_18, window_bounds = array<i64: 32, 32>}]} {
    %c32_i32 = arith.constant 32 : i32
    %0 = arith.muli %arg1, %c32_i32 : i32
    %c72_i32 = arith.constant 72 : i32
    %1 = arith.subi %c72_i32, %0 : i32
    %c0_i32 = arith.constant 0 : i32
    %c32_i32_0 = arith.constant 32 : i32
    %2 = arith.maxsi %c0_i32, %1 : i32
    %3 = arith.minsi %c32_i32_0, %2 : i32
    %4 = tpu.iota {dimensions = array<i32: 0>} : vector<32x1xi32>
    %5 = vector.broadcast %3 : i32 to vector<32x1xi32>
    %6 = arith.cmpi slt, %4, %5 : vector<32x1xi32>
    %7 = arith.extui %6 : vector<32x1xi1> to vector<32x1xi32>
    %8 = arith.sitofp %7 : vector<32x1xi32> to vector<32x1xf32>
    %c0_i32_1 = arith.constant 0 : i32
    %9 = arith.cmpi eq, %arg0, %c0_i32_1 : i32
    %c0_i32_2 = arith.constant 0 : i32
    %10 = arith.cmpi eq, %arg1, %c0_i32_2 : i32
    %11 = arith.andi %9, %10 : i1
    %12 = arith.extui %11 : i1 to i32
    %c0_i32_3 = arith.constant 0 : i32
    %13 = arith.cmpi ne, %12, %c0_i32_3 : i32
    scf.if %13 {
      %cst = arith.constant 0.000000e+00 : f32
      %28 = vector.broadcast %cst : f32 to vector<2x128xf32>
      %c0 = arith.constant 0 : index
      %c0_11 = arith.constant 0 : index
      %29 = vector.load %arg21[%c0, %c0_11] : memref<2x128xf32, #tpu.memory_space<vmem>>, vector<2x128xf32>
      tpu.vector_store %arg21[%c0, %c0_11], %28 {strides = array<i32>} : memref<2x128xf32, #tpu.memory_space<vmem>>, vector<2x128xf32>,
    } else {
    }
    %c0_i32_4 = arith.constant 0 : i32
    %14 = arith.cmpi eq, %arg0, %c0_i32_4 : i32
    %15 = arith.extui %14 : i1 to i32
    %c0_i32_5 = arith.constant 0 : i32
    %16 = arith.cmpi ne, %15, %c0_i32_5 : i32
    scf.if %16 {
      %c0 = arith.constant 0 : index
      %c0_11 = arith.constant 0 : index
      %28 = vector.load %arg2[%c0, %c0_11] : memref<32x72xf32, #tpu.memory_space<vmem>>, vector<32x72xf32>
      %c0_12 = arith.constant 0 : index
      %c0_13 = arith.constant 0 : index
      %29 = vector.load %arg4[%c0_12, %c0_13] : memref<72x128xf32, #tpu.memory_space<vmem>>, vector<72x128xf32>
      %cst = arith.constant dense<0.000000e+00> : vector<32x128xf32>
      %30 = tpu.matmul %28, %29, %cst {dimension_numbers = #tpu.dot_dimension_numbers<[1], [0], [0], [1], [0, 0, 1, 1], [], []>} : vector<32x72xf32>, vector<72x128xf32>, vector<32x128xf32> -> vector<32x128xf32>
      %31 = vector.broadcast %8 : vector<32x1xf32> to vector<32x128xf32>
      %32 = arith.mulf %30, %31 : vector<32x128xf32>
      %c0_14 = arith.constant 0 : index
      %c0_15 = arith.constant 0 : index
      %33 = vector.load %arg21[%c0_14, %c0_15] : memref<2x128xf32, #tpu.memory_space<vmem>>, vector<1x128xf32>
      %cst_16 = arith.constant dense<0.000000e+00> : vector<128xf32>
      %34 = vector.multi_reduction <add>, %32, %cst_16 [0] : vector<32x128xf32> to vector<128xf32>
      %35 = vector.shape_cast %34 : vector<128xf32> to vector<1x128xf32>
      %36 = arith.addf %33, %35 : vector<1x128xf32>
      %c0_17 = arith.constant 0 : index
      %c0_18 = arith.constant 0 : index
      %37 = vector.load %arg21[%c0_17, %c0_18] : memref<2x128xf32, #tpu.memory_space<vmem>>, vector<1x128xf32>
      tpu.vector_store %arg21[%c0_17, %c0_18], %36 {strides = array<i32>} : memref<2x128xf32, #tpu.memory_space<vmem>>, vector<1x128xf32>,
      %c1 = arith.constant 1 : index
      %c0_19 = arith.constant 0 : index
      %38 = vector.load %arg21[%c1, %c0_19] : memref<2x128xf32, #tpu.memory_space<vmem>>, vector<1x128xf32>
      %39 = arith.mulf %32, %32 : vector<32x128xf32>
      %cst_20 = arith.constant dense<0.000000e+00> : vector<128xf32>
      %40 = vector.multi_reduction <add>, %39, %cst_20 [0] : vector<32x128xf32> to vector<128xf32>
      %41 = vector.shape_cast %40 : vector<128xf32> to vector<1x128xf32>
      %42 = arith.addf %38, %41 : vector<1x128xf32>
      %c1_21 = arith.constant 1 : index
      %c0_22 = arith.constant 0 : index
      %43 = vector.load %arg21[%c1_21, %c0_22] : memref<2x128xf32, #tpu.memory_space<vmem>>, vector<1x128xf32>
      tpu.vector_store %arg21[%c1_21, %c0_22], %42 {strides = array<i32>} : memref<2x128xf32, #tpu.memory_space<vmem>>, vector<1x128xf32>,
    } else {
    }
    %c1_i32 = arith.constant 1 : i32
    %17 = arith.cmpi eq, %arg0, %c1_i32 : i32
    %c0_i32_6 = arith.constant 0 : i32
    %18 = arith.cmpi eq, %arg1, %c0_i32_6 : i32
    %19 = arith.andi %17, %18 : i1
    %20 = arith.extui %19 : i1 to i32
    %c0_i32_7 = arith.constant 0 : i32
    %21 = arith.cmpi ne, %20, %c0_i32_7 : i32
    scf.if %21 {
      %cst = arith.constant 0.000000e+00 : f32
      %28 = vector.broadcast %cst : f32 to vector<2x128xf32>
      %c0 = arith.constant 0 : index
      %c0_11 = arith.constant 0 : index
      %29 = vector.load %arg22[%c0, %c0_11] : memref<2x128xf32, #tpu.memory_space<vmem>>, vector<2x128xf32>
      tpu.vector_store %arg22[%c0, %c0_11], %28 {strides = array<i32>} : memref<2x128xf32, #tpu.memory_space<vmem>>, vector<2x128xf32>,
      %cst_12 = arith.constant 0.000000e+00 : f32
      %30 = vector.broadcast %cst_12 : f32 to vector<2x128xf32>
      %c0_13 = arith.constant 0 : index
      %c0_14 = arith.constant 0 : index
      %31 = vector.load %arg23[%c0_13, %c0_14] : memref<2x128xf32, #tpu.memory_space<vmem>>, vector<2x128xf32>
      tpu.vector_store %arg23[%c0_13, %c0_14], %30 {strides = array<i32>} : memref<2x128xf32, #tpu.memory_space<vmem>>, vector<2x128xf32>,
    } else {
    }
    %c1_i32_8 = arith.constant 1 : i32
    %22 = arith.cmpi eq, %arg0, %c1_i32_8 : i32
    %23 = arith.extui %22 : i1 to i32
    %c0_i32_9 = arith.constant 0 : i32
    %24 = arith.cmpi ne, %23, %c0_i32_9 : i32
    scf.if %24 {
      %c0 = arith.constant 0 : index
      %c0_11 = arith.constant 0 : index
      %28 = vector.load %arg21[%c0, %c0_11] : memref<2x128xf32, #tpu.memory_space<vmem>>, vector<2x128xf32>
      %c64_i32 = arith.constant 64 : i32
      %29 = tpu.dynamic_rotate %28 by %c64_i32 dim 1 : vector<2x128xf32>, i32 -> vector<2x128xf32>
      %30 = arith.addf %28, %29 : vector<2x128xf32>
      %c32_i32_12 = arith.constant 32 : i32
      %31 = tpu.dynamic_rotate %30 by %c32_i32_12 dim 1 : vector<2x128xf32>, i32 -> vector<2x128xf32>
      %32 = arith.addf %30, %31 : vector<2x128xf32>
      %c16_i32 = arith.constant 16 : i32
      %33 = tpu.dynamic_rotate %32 by %c16_i32 dim 1 : vector<2x128xf32>, i32 -> vector<2x128xf32>
      %34 = arith.addf %32, %33 : vector<2x128xf32>
      %c8_i32 = arith.constant 8 : i32
      %35 = tpu.dynamic_rotate %34 by %c8_i32 dim 1 : vector<2x128xf32>, i32 -> vector<2x128xf32>
      %36 = arith.addf %34, %35 : vector<2x128xf32>
      %cst = arith.constant 8.68055562E-4 : f32
      %37 = vector.broadcast %cst : f32 to vector<2x128xf32>
      %38 = arith.mulf %36, %37 : vector<2x128xf32>
      %39 = vector.extract_strided_slice %38 {offsets = [0, 0], sizes = [1, 128], strides = [1, 1]} : vector<2x128xf32> to vector<1x128xf32>
      %40 = vector.extract_strided_slice %38 {offsets = [1, 0], sizes = [1, 128], strides = [1, 1]} : vector<2x128xf32> to vector<1x128xf32>
      %41 = arith.mulf %39, %39 : vector<1x128xf32>
      %42 = arith.subf %40, %41 : vector<1x128xf32>
      %c0_13 = arith.constant 0 : index
      %c0_14 = arith.constant 0 : index
      %43 = vector.load %arg5[%c0_13, %c0_14] : memref<1x128xf32, #tpu.memory_space<vmem>>, vector<1x128xf32>
      %cst_15 = arith.constant 9.99999974E-6 : f32
      %44 = vector.broadcast %cst_15 : f32 to vector<1x128xf32>
      %45 = arith.addf %42, %44 : vector<1x128xf32>
      %46 = math.rsqrt %45 : vector<1x128xf32>
      %47 = arith.mulf %43, %46 : vector<1x128xf32>
      %c0_16 = arith.constant 0 : index
      %c0_17 = arith.constant 0 : index
      %48 = vector.load %arg6[%c0_16, %c0_17] : memref<1x128xf32, #tpu.memory_space<vmem>>, vector<1x128xf32>
      %49 = arith.mulf %39, %47 : vector<1x128xf32>
      %50 = arith.subf %48, %49 : vector<1x128xf32>
      %c0_18 = arith.constant 0 : index
      %c0_19 = arith.constant 0 : index
      %51 = vector.load %arg2[%c0_18, %c0_19] : memref<32x72xf32, #tpu.memory_space<vmem>>, vector<32x72xf32>
      %c0_20 = arith.constant 0 : index
      %c0_21 = arith.constant 0 : index
      %52 = vector.load %arg4[%c0_20, %c0_21] : memref<72x128xf32, #tpu.memory_space<vmem>>, vector<72x128xf32>
      %cst_22 = arith.constant dense<0.000000e+00> : vector<32x128xf32>
      %53 = tpu.matmul %51, %52, %cst_22 {dimension_numbers = #tpu.dot_dimension_numbers<[1], [0], [0], [1], [0, 0, 1, 1], [], []>} : vector<32x72xf32>, vector<72x128xf32>, vector<32x128xf32> -> vector<32x128xf32>
      %54 = vector.broadcast %47 : vector<1x128xf32> to vector<32x128xf32>
      %55 = arith.mulf %53, %54 : vector<32x128xf32>
      %56 = vector.broadcast %50 : vector<1x128xf32> to vector<32x128xf32>
      %57 = arith.addf %55, %56 : vector<32x128xf32>
      %cst_23 = arith.constant 0.000000e+00 : f32
      %58 = vector.broadcast %cst_23 : f32 to vector<32x128xf32>
      %59 = arith.maximumf %57, %58 : vector<32x128xf32>
      %c0_24 = arith.constant 0 : index
      %c0_25 = arith.constant 0 : index
      %60 = vector.load %arg3[%c0_24, %c0_25] : memref<32x128xf32, #tpu.memory_space<vmem>>, vector<32x128xf32>
      %c0_26 = arith.constant 0 : index
      %c0_27 = arith.constant 0 : index
      %61 = vector.load %arg7[%c0_26, %c0_27] : memref<128x128xf32, #tpu.memory_space<vmem>>, vector<128x128xf32>
      %cst_28 = arith.constant dense<0.000000e+00> : vector<32x128xf32>
      %62 = tpu.matmul %59, %61, %cst_28 {dimension_numbers = #tpu.dot_dimension_numbers<[1], [0], [0], [1], [0, 0, 1, 1], [], []>} : vector<32x128xf32>, vector<128x128xf32>, vector<32x128xf32> -> vector<32x128xf32>
      %c0_29 = arith.constant 0 : index
      %c0_30 = arith.constant 0 : index
      %63 = vector.load %arg8[%c0_29, %c0_30] : memref<128x128xf32, #tpu.memory_space<vmem>>, vector<128x128xf32>
      %cst_31 = arith.constant dense<0.000000e+00> : vector<32x128xf32>
      %64 = tpu.matmul %60, %63, %cst_31 {dimension_numbers = #tpu.dot_dimension_numbers<[1], [0], [0], [1], [0, 0, 1, 1], [], []>} : vector<32x128xf32>, vector<128x128xf32>, vector<32x128xf32> -> vector<32x128xf32>
      %65 = arith.addf %62, %64 : vector<32x128xf32>
      %c0_32 = arith.constant 0 : index
      %c0_33 = arith.constant 0 : index
      %66 = vector.load %arg11[%c0_32, %c0_33] : memref<1x128xf32, #tpu.memory_space<vmem>>, vector<1x128xf32>
      %67 = vector.broadcast %66 : vector<1x128xf32> to vector<32x128xf32>
      %68 = arith.addf %65, %67 : vector<32x128xf32>
      %c0_34 = arith.constant 0 : index
      %c0_35 = arith.constant 0 : index
      %69 = vector.load %arg9[%c0_34, %c0_35] : memref<128x128xf32, #tpu.memory_space<vmem>>, vector<128x128xf32>
      %cst_36 = arith.constant dense<0.000000e+00> : vector<32x128xf32>
      %70 = tpu.matmul %59, %69, %cst_36 {dimension_numbers = #tpu.dot_dimension_numbers<[1], [0], [0], [1], [0, 0, 1, 1], [], []>} : vector<32x128xf32>, vector<128x128xf32>, vector<32x128xf32> -> vector<32x128xf32>
      %c0_37 = arith.constant 0 : index
      %c0_38 = arith.constant 0 : index
      %71 = vector.load %arg10[%c0_37, %c0_38] : memref<128x128xf32, #tpu.memory_space<vmem>>, vector<128x128xf32>
      %cst_39 = arith.constant dense<0.000000e+00> : vector<32x128xf32>
      %72 = tpu.matmul %60, %71, %cst_39 {dimension_numbers = #tpu.dot_dimension_numbers<[1], [0], [0], [1], [0, 0, 1, 1], [], []>} : vector<32x128xf32>, vector<128x128xf32>, vector<32x128xf32> -> vector<32x128xf32>
      %73 = arith.addf %70, %72 : vector<32x128xf32>
      %c0_40 = arith.constant 0 : index
      %c0_41 = arith.constant 0 : index
      %74 = vector.load %arg12[%c0_40, %c0_41] : memref<1x128xf32, #tpu.memory_space<vmem>>, vector<1x128xf32>
      %75 = vector.broadcast %74 : vector<1x128xf32> to vector<32x128xf32>
      %76 = arith.addf %73, %75 : vector<32x128xf32>
      %77 = vector.broadcast %8 : vector<32x1xf32> to vector<32x128xf32>
      %78 = arith.mulf %68, %77 : vector<32x128xf32>
      %79 = vector.broadcast %8 : vector<32x1xf32> to vector<32x128xf32>
      %80 = arith.mulf %76, %79 : vector<32x128xf32>
      %c0_42 = arith.constant 0 : index
      %c0_43 = arith.constant 0 : index
      %81 = vector.load %arg22[%c0_42, %c0_43] : memref<2x128xf32, #tpu.memory_space<vmem>>, vector<1x128xf32>
      %cst_44 = arith.constant dense<0.000000e+00> : vector<128xf32>
      %82 = vector.multi_reduction <add>, %78, %cst_44 [0] : vector<32x128xf32> to vector<128xf32>
      %83 = vector.shape_cast %82 : vector<128xf32> to vector<1x128xf32>
      %84 = arith.addf %81, %83 : vector<1x128xf32>
      %c0_45 = arith.constant 0 : index
      %c0_46 = arith.constant 0 : index
      %85 = vector.load %arg22[%c0_45, %c0_46] : memref<2x128xf32, #tpu.memory_space<vmem>>, vector<1x128xf32>
      tpu.vector_store %arg22[%c0_45, %c0_46], %84 {strides = array<i32>} : memref<2x128xf32, #tpu.memory_space<vmem>>, vector<1x128xf32>,
      %c1 = arith.constant 1 : index
      %c0_47 = arith.constant 0 : index
      %86 = vector.load %arg22[%c1, %c0_47] : memref<2x128xf32, #tpu.memory_space<vmem>>, vector<1x128xf32>
      %87 = arith.mulf %78, %78 : vector<32x128xf32>
      %cst_48 = arith.constant dense<0.000000e+00> : vector<128xf32>
      %88 = vector.multi_reduction <add>, %87, %cst_48 [0] : vector<32x128xf32> to vector<128xf32>
      %89 = vector.shape_cast %88 : vector<128xf32> to vector<1x128xf32>
      %90 = arith.addf %86, %89 : vector<1x128xf32>
      %c1_49 = arith.constant 1 : index
      %c0_50 = arith.constant 0 : index
      %91 = vector.load %arg22[%c1_49, %c0_50] : memref<2x128xf32, #tpu.memory_space<vmem>>, vector<1x128xf32>
      tpu.vector_store %arg22[%c1_49, %c0_50], %90 {strides = array<i32>} : memref<2x128xf32, #tpu.memory_space<vmem>>, vector<1x128xf32>,
      %c0_51 = arith.constant 0 : index
      %c0_52 = arith.constant 0 : index
      %92 = vector.load %arg23[%c0_51, %c0_52] : memref<2x128xf32, #tpu.memory_space<vmem>>, vector<1x128xf32>
      %cst_53 = arith.constant dense<0.000000e+00> : vector<128xf32>
      %93 = vector.multi_reduction <add>, %80, %cst_53 [0] : vector<32x128xf32> to vector<128xf32>
      %94 = vector.shape_cast %93 : vector<128xf32> to vector<1x128xf32>
      %95 = arith.addf %92, %94 : vector<1x128xf32>
      %c0_54 = arith.constant 0 : index
      %c0_55 = arith.constant 0 : index
      %96 = vector.load %arg23[%c0_54, %c0_55] : memref<2x128xf32, #tpu.memory_space<vmem>>, vector<1x128xf32>
      tpu.vector_store %arg23[%c0_54, %c0_55], %95 {strides = array<i32>} : memref<2x128xf32, #tpu.memory_space<vmem>>, vector<1x128xf32>,
      %c1_56 = arith.constant 1 : index
      %c0_57 = arith.constant 0 : index
      %97 = vector.load %arg23[%c1_56, %c0_57] : memref<2x128xf32, #tpu.memory_space<vmem>>, vector<1x128xf32>
      %98 = arith.mulf %80, %80 : vector<32x128xf32>
      %cst_58 = arith.constant dense<0.000000e+00> : vector<128xf32>
      %99 = vector.multi_reduction <add>, %98, %cst_58 [0] : vector<32x128xf32> to vector<128xf32>
      %100 = vector.shape_cast %99 : vector<128xf32> to vector<1x128xf32>
      %101 = arith.addf %97, %100 : vector<1x128xf32>
      %c1_59 = arith.constant 1 : index
      %c0_60 = arith.constant 0 : index
      %102 = vector.load %arg23[%c1_59, %c0_60] : memref<2x128xf32, #tpu.memory_space<vmem>>, vector<1x128xf32>
      tpu.vector_store %arg23[%c1_59, %c0_60], %101 {strides = array<i32>} : memref<2x128xf32, #tpu.memory_space<vmem>>, vector<1x128xf32>,
    } else {
    }
    %c2_i32 = arith.constant 2 : i32
    %25 = arith.cmpi eq, %arg0, %c2_i32 : i32
    %26 = arith.extui %25 : i1 to i32
    %c0_i32_10 = arith.constant 0 : i32
    %27 = arith.cmpi ne, %26, %c0_i32_10 : i32
    scf.if %27 {
      %c0 = arith.constant 0 : index
      %c0_11 = arith.constant 0 : index
      %28 = vector.load %arg21[%c0, %c0_11] : memref<2x128xf32, #tpu.memory_space<vmem>>, vector<2x128xf32>
      %c64_i32 = arith.constant 64 : i32
      %29 = tpu.dynamic_rotate %28 by %c64_i32 dim 1 : vector<2x128xf32>, i32 -> vector<2x128xf32>
      %30 = arith.addf %28, %29 : vector<2x128xf32>
      %c32_i32_12 = arith.constant 32 : i32
      %31 = tpu.dynamic_rotate %30 by %c32_i32_12 dim 1 : vector<2x128xf32>, i32 -> vector<2x128xf32>
      %32 = arith.addf %30, %31 : vector<2x128xf32>
      %c16_i32 = arith.constant 16 : i32
      %33 = tpu.dynamic_rotate %32 by %c16_i32 dim 1 : vector<2x128xf32>, i32 -> vector<2x128xf32>
      %34 = arith.addf %32, %33 : vector<2x128xf32>
      %c8_i32 = arith.constant 8 : i32
      %35 = tpu.dynamic_rotate %34 by %c8_i32 dim 1 : vector<2x128xf32>, i32 -> vector<2x128xf32>
      %36 = arith.addf %34, %35 : vector<2x128xf32>
      %cst = arith.constant 8.68055562E-4 : f32
      %37 = vector.broadcast %cst : f32 to vector<2x128xf32>
      %38 = arith.mulf %36, %37 : vector<2x128xf32>
      %39 = vector.extract_strided_slice %38 {offsets = [0, 0], sizes = [1, 128], strides = [1, 1]} : vector<2x128xf32> to vector<1x128xf32>
      %40 = vector.extract_strided_slice %38 {offsets = [1, 0], sizes = [1, 128], strides = [1, 1]} : vector<2x128xf32> to vector<1x128xf32>
      %41 = arith.mulf %39, %39 : vector<1x128xf32>
      %42 = arith.subf %40, %41 : vector<1x128xf32>
      %c0_13 = arith.constant 0 : index
      %c0_14 = arith.constant 0 : index
      %43 = vector.load %arg5[%c0_13, %c0_14] : memref<1x128xf32, #tpu.memory_space<vmem>>, vector<1x128xf32>
      %cst_15 = arith.constant 9.99999974E-6 : f32
      %44 = vector.broadcast %cst_15 : f32 to vector<1x128xf32>
      %45 = arith.addf %42, %44 : vector<1x128xf32>
      %46 = math.rsqrt %45 : vector<1x128xf32>
      %47 = arith.mulf %43, %46 : vector<1x128xf32>
      %c0_16 = arith.constant 0 : index
      %c0_17 = arith.constant 0 : index
      %48 = vector.load %arg6[%c0_16, %c0_17] : memref<1x128xf32, #tpu.memory_space<vmem>>, vector<1x128xf32>
      %49 = arith.mulf %39, %47 : vector<1x128xf32>
      %50 = arith.subf %48, %49 : vector<1x128xf32>
      %c0_18 = arith.constant 0 : index
      %c0_19 = arith.constant 0 : index
      %51 = vector.load %arg2[%c0_18, %c0_19] : memref<32x72xf32, #tpu.memory_space<vmem>>, vector<32x72xf32>
      %c0_20 = arith.constant 0 : index
      %c0_21 = arith.constant 0 : index
      %52 = vector.load %arg4[%c0_20, %c0_21] : memref<72x128xf32, #tpu.memory_space<vmem>>, vector<72x128xf32>
      %cst_22 = arith.constant dense<0.000000e+00> : vector<32x128xf32>
      %53 = tpu.matmul %51, %52, %cst_22 {dimension_numbers = #tpu.dot_dimension_numbers<[1], [0], [0], [1], [0, 0, 1, 1], [], []>} : vector<32x72xf32>, vector<72x128xf32>, vector<32x128xf32> -> vector<32x128xf32>
      %54 = vector.broadcast %47 : vector<1x128xf32> to vector<32x128xf32>
      %55 = arith.mulf %53, %54 : vector<32x128xf32>
      %56 = vector.broadcast %50 : vector<1x128xf32> to vector<32x128xf32>
      %57 = arith.addf %55, %56 : vector<32x128xf32>
      %cst_23 = arith.constant 0.000000e+00 : f32
      %58 = vector.broadcast %cst_23 : f32 to vector<32x128xf32>
      %59 = arith.maximumf %57, %58 : vector<32x128xf32>
      %c0_24 = arith.constant 0 : index
      %c0_25 = arith.constant 0 : index
      %60 = vector.load %arg3[%c0_24, %c0_25] : memref<32x128xf32, #tpu.memory_space<vmem>>, vector<32x128xf32>
      %c0_26 = arith.constant 0 : index
      %c0_27 = arith.constant 0 : index
      %61 = vector.load %arg7[%c0_26, %c0_27] : memref<128x128xf32, #tpu.memory_space<vmem>>, vector<128x128xf32>
      %cst_28 = arith.constant dense<0.000000e+00> : vector<32x128xf32>
      %62 = tpu.matmul %59, %61, %cst_28 {dimension_numbers = #tpu.dot_dimension_numbers<[1], [0], [0], [1], [0, 0, 1, 1], [], []>} : vector<32x128xf32>, vector<128x128xf32>, vector<32x128xf32> -> vector<32x128xf32>
      %c0_29 = arith.constant 0 : index
      %c0_30 = arith.constant 0 : index
      %63 = vector.load %arg8[%c0_29, %c0_30] : memref<128x128xf32, #tpu.memory_space<vmem>>, vector<128x128xf32>
      %cst_31 = arith.constant dense<0.000000e+00> : vector<32x128xf32>
      %64 = tpu.matmul %60, %63, %cst_31 {dimension_numbers = #tpu.dot_dimension_numbers<[1], [0], [0], [1], [0, 0, 1, 1], [], []>} : vector<32x128xf32>, vector<128x128xf32>, vector<32x128xf32> -> vector<32x128xf32>
      %65 = arith.addf %62, %64 : vector<32x128xf32>
      %c0_32 = arith.constant 0 : index
      %c0_33 = arith.constant 0 : index
      %66 = vector.load %arg11[%c0_32, %c0_33] : memref<1x128xf32, #tpu.memory_space<vmem>>, vector<1x128xf32>
      %67 = vector.broadcast %66 : vector<1x128xf32> to vector<32x128xf32>
      %68 = arith.addf %65, %67 : vector<32x128xf32>
      %c0_34 = arith.constant 0 : index
      %c0_35 = arith.constant 0 : index
      %69 = vector.load %arg9[%c0_34, %c0_35] : memref<128x128xf32, #tpu.memory_space<vmem>>, vector<128x128xf32>
      %cst_36 = arith.constant dense<0.000000e+00> : vector<32x128xf32>
      %70 = tpu.matmul %59, %69, %cst_36 {dimension_numbers = #tpu.dot_dimension_numbers<[1], [0], [0], [1], [0, 0, 1, 1], [], []>} : vector<32x128xf32>, vector<128x128xf32>, vector<32x128xf32> -> vector<32x128xf32>
      %c0_37 = arith.constant 0 : index
      %c0_38 = arith.constant 0 : index
      %71 = vector.load %arg10[%c0_37, %c0_38] : memref<128x128xf32, #tpu.memory_space<vmem>>, vector<128x128xf32>
      %cst_39 = arith.constant dense<0.000000e+00> : vector<32x128xf32>
      %72 = tpu.matmul %60, %71, %cst_39 {dimension_numbers = #tpu.dot_dimension_numbers<[1], [0], [0], [1], [0, 0, 1, 1], [], []>} : vector<32x128xf32>, vector<128x128xf32>, vector<32x128xf32> -> vector<32x128xf32>
      %73 = arith.addf %70, %72 : vector<32x128xf32>
      %c0_40 = arith.constant 0 : index
      %c0_41 = arith.constant 0 : index
      %74 = vector.load %arg12[%c0_40, %c0_41] : memref<1x128xf32, #tpu.memory_space<vmem>>, vector<1x128xf32>
      %75 = vector.broadcast %74 : vector<1x128xf32> to vector<32x128xf32>
      %76 = arith.addf %73, %75 : vector<32x128xf32>
      %c0_42 = arith.constant 0 : index
      %c0_43 = arith.constant 0 : index
      %77 = vector.load %arg22[%c0_42, %c0_43] : memref<2x128xf32, #tpu.memory_space<vmem>>, vector<2x128xf32>
      %c64_i32_44 = arith.constant 64 : i32
      %78 = tpu.dynamic_rotate %77 by %c64_i32_44 dim 1 : vector<2x128xf32>, i32 -> vector<2x128xf32>
      %79 = arith.addf %77, %78 : vector<2x128xf32>
      %c32_i32_45 = arith.constant 32 : i32
      %80 = tpu.dynamic_rotate %79 by %c32_i32_45 dim 1 : vector<2x128xf32>, i32 -> vector<2x128xf32>
      %81 = arith.addf %79, %80 : vector<2x128xf32>
      %c16_i32_46 = arith.constant 16 : i32
      %82 = tpu.dynamic_rotate %81 by %c16_i32_46 dim 1 : vector<2x128xf32>, i32 -> vector<2x128xf32>
      %83 = arith.addf %81, %82 : vector<2x128xf32>
      %c8_i32_47 = arith.constant 8 : i32
      %84 = tpu.dynamic_rotate %83 by %c8_i32_47 dim 1 : vector<2x128xf32>, i32 -> vector<2x128xf32>
      %85 = arith.addf %83, %84 : vector<2x128xf32>
      %cst_48 = arith.constant 8.68055562E-4 : f32
      %86 = vector.broadcast %cst_48 : f32 to vector<2x128xf32>
      %87 = arith.mulf %85, %86 : vector<2x128xf32>
      %88 = vector.extract_strided_slice %87 {offsets = [0, 0], sizes = [1, 128], strides = [1, 1]} : vector<2x128xf32> to vector<1x128xf32>
      %89 = vector.extract_strided_slice %87 {offsets = [1, 0], sizes = [1, 128], strides = [1, 1]} : vector<2x128xf32> to vector<1x128xf32>
      %90 = arith.mulf %88, %88 : vector<1x128xf32>
      %91 = arith.subf %89, %90 : vector<1x128xf32>
      %c0_49 = arith.constant 0 : index
      %c0_50 = arith.constant 0 : index
      %92 = vector.load %arg13[%c0_49, %c0_50] : memref<1x128xf32, #tpu.memory_space<vmem>>, vector<1x128xf32>
      %cst_51 = arith.constant 9.99999974E-6 : f32
      %93 = vector.broadcast %cst_51 : f32 to vector<1x128xf32>
      %94 = arith.addf %91, %93 : vector<1x128xf32>
      %95 = math.rsqrt %94 : vector<1x128xf32>
      %96 = arith.mulf %92, %95 : vector<1x128xf32>
      %c0_52 = arith.constant 0 : index
      %c0_53 = arith.constant 0 : index
      %97 = vector.load %arg15[%c0_52, %c0_53] : memref<1x128xf32, #tpu.memory_space<vmem>>, vector<1x128xf32>
      %98 = arith.mulf %88, %96 : vector<1x128xf32>
      %99 = arith.subf %97, %98 : vector<1x128xf32>
      %c0_54 = arith.constant 0 : index
      %c0_55 = arith.constant 0 : index
      %100 = vector.load %arg23[%c0_54, %c0_55] : memref<2x128xf32, #tpu.memory_space<vmem>>, vector<2x128xf32>
      %c64_i32_56 = arith.constant 64 : i32
      %101 = tpu.dynamic_rotate %100 by %c64_i32_56 dim 1 : vector<2x128xf32>, i32 -> vector<2x128xf32>
      %102 = arith.addf %100, %101 : vector<2x128xf32>
      %c32_i32_57 = arith.constant 32 : i32
      %103 = tpu.dynamic_rotate %102 by %c32_i32_57 dim 1 : vector<2x128xf32>, i32 -> vector<2x128xf32>
      %104 = arith.addf %102, %103 : vector<2x128xf32>
      %c16_i32_58 = arith.constant 16 : i32
      %105 = tpu.dynamic_rotate %104 by %c16_i32_58 dim 1 : vector<2x128xf32>, i32 -> vector<2x128xf32>
      %106 = arith.addf %104, %105 : vector<2x128xf32>
      %c8_i32_59 = arith.constant 8 : i32
      %107 = tpu.dynamic_rotate %106 by %c8_i32_59 dim 1 : vector<2x128xf32>, i32 -> vector<2x128xf32>
      %108 = arith.addf %106, %107 : vector<2x128xf32>
      %cst_60 = arith.constant 8.68055562E-4 : f32
      %109 = vector.broadcast %cst_60 : f32 to vector<2x128xf32>
      %110 = arith.mulf %108, %109 : vector<2x128xf32>
      %111 = vector.extract_strided_slice %110 {offsets = [0, 0], sizes = [1, 128], strides = [1, 1]} : vector<2x128xf32> to vector<1x128xf32>
      %112 = vector.extract_strided_slice %110 {offsets = [1, 0], sizes = [1, 128], strides = [1, 1]} : vector<2x128xf32> to vector<1x128xf32>
      %113 = arith.mulf %111, %111 : vector<1x128xf32>
      %114 = arith.subf %112, %113 : vector<1x128xf32>
      %c0_61 = arith.constant 0 : index
      %c0_62 = arith.constant 0 : index
      %115 = vector.load %arg14[%c0_61, %c0_62] : memref<1x128xf32, #tpu.memory_space<vmem>>, vector<1x128xf32>
      %cst_63 = arith.constant 9.99999974E-6 : f32
      %116 = vector.broadcast %cst_63 : f32 to vector<1x128xf32>
      %117 = arith.addf %114, %116 : vector<1x128xf32>
      %118 = math.rsqrt %117 : vector<1x128xf32>
      %119 = arith.mulf %115, %118 : vector<1x128xf32>
      %c0_64 = arith.constant 0 : index
      %c0_65 = arith.constant 0 : index
      %120 = vector.load %arg16[%c0_64, %c0_65] : memref<1x128xf32, #tpu.memory_space<vmem>>, vector<1x128xf32>
      %121 = arith.mulf %111, %119 : vector<1x128xf32>
      %122 = arith.subf %120, %121 : vector<1x128xf32>
      %123 = vector.broadcast %96 : vector<1x128xf32> to vector<32x128xf32>
      %124 = arith.mulf %68, %123 : vector<32x128xf32>
      %125 = vector.broadcast %99 : vector<1x128xf32> to vector<32x128xf32>
      %126 = arith.addf %124, %125 : vector<32x128xf32>
      %cst_66 = arith.constant 0.000000e+00 : f32
      %127 = vector.broadcast %cst_66 : f32 to vector<32x128xf32>
      %128 = arith.maximumf %126, %127 : vector<32x128xf32>
      %129 = vector.broadcast %119 : vector<1x128xf32> to vector<32x128xf32>
      %130 = arith.mulf %76, %129 : vector<32x128xf32>
      %131 = vector.broadcast %122 : vector<1x128xf32> to vector<32x128xf32>
      %132 = arith.addf %130, %131 : vector<32x128xf32>
      %cst_67 = arith.constant 0.000000e+00 : f32
      %133 = vector.broadcast %cst_67 : f32 to vector<32x128xf32>
      %134 = arith.maximumf %132, %133 : vector<32x128xf32>
      %c64_i32_68 = arith.constant 64 : i32
      %135 = tpu.dynamic_rotate %128 by %c64_i32_68 dim 1 : vector<32x128xf32>, i32 -> vector<32x128xf32>
      %136 = arith.maximumf %128, %135 : vector<32x128xf32>
      %c32_i32_69 = arith.constant 32 : i32
      %137 = tpu.dynamic_rotate %136 by %c32_i32_69 dim 1 : vector<32x128xf32>, i32 -> vector<32x128xf32>
      %138 = arith.maximumf %136, %137 : vector<32x128xf32>
      %c16_i32_70 = arith.constant 16 : i32
      %139 = tpu.dynamic_rotate %138 by %c16_i32_70 dim 1 : vector<32x128xf32>, i32 -> vector<32x128xf32>
      %140 = arith.maximumf %138, %139 : vector<32x128xf32>
      %c8_i32_71 = arith.constant 8 : i32
      %141 = tpu.dynamic_rotate %140 by %c8_i32_71 dim 1 : vector<32x128xf32>, i32 -> vector<32x128xf32>
      %142 = arith.maximumf %140, %141 : vector<32x128xf32>
      %143 = arith.subf %128, %142 : vector<32x128xf32>
      %144 = math.exp %143 : vector<32x128xf32>
      %c64_i32_72 = arith.constant 64 : i32
      %145 = tpu.dynamic_rotate %134 by %c64_i32_72 dim 1 : vector<32x128xf32>, i32 -> vector<32x128xf32>
      %146 = arith.maximumf %134, %145 : vector<32x128xf32>
      %c32_i32_73 = arith.constant 32 : i32
      %147 = tpu.dynamic_rotate %146 by %c32_i32_73 dim 1 : vector<32x128xf32>, i32 -> vector<32x128xf32>
      %148 = arith.maximumf %146, %147 : vector<32x128xf32>
      %c16_i32_74 = arith.constant 16 : i32
      %149 = tpu.dynamic_rotate %148 by %c16_i32_74 dim 1 : vector<32x128xf32>, i32 -> vector<32x128xf32>
      %150 = arith.maximumf %148, %149 : vector<32x128xf32>
      %c8_i32_75 = arith.constant 8 : i32
      %151 = tpu.dynamic_rotate %150 by %c8_i32_75 dim 1 : vector<32x128xf32>, i32 -> vector<32x128xf32>
      %152 = arith.maximumf %150, %151 : vector<32x128xf32>
      %153 = arith.subf %134, %152 : vector<32x128xf32>
      %154 = math.exp %153 : vector<32x128xf32>
      %c64_i32_76 = arith.constant 64 : i32
      %155 = tpu.dynamic_rotate %144 by %c64_i32_76 dim 1 : vector<32x128xf32>, i32 -> vector<32x128xf32>
      %156 = arith.addf %144, %155 : vector<32x128xf32>
      %c32_i32_77 = arith.constant 32 : i32
      %157 = tpu.dynamic_rotate %156 by %c32_i32_77 dim 1 : vector<32x128xf32>, i32 -> vector<32x128xf32>
      %158 = arith.addf %156, %157 : vector<32x128xf32>
      %c16_i32_78 = arith.constant 16 : i32
      %159 = tpu.dynamic_rotate %158 by %c16_i32_78 dim 1 : vector<32x128xf32>, i32 -> vector<32x128xf32>
      %160 = arith.addf %158, %159 : vector<32x128xf32>
      %c8_i32_79 = arith.constant 8 : i32
      %161 = tpu.dynamic_rotate %160 by %c8_i32_79 dim 1 : vector<32x128xf32>, i32 -> vector<32x128xf32>
      %162 = arith.addf %160, %161 : vector<32x128xf32>
      %163 = arith.divf %144, %162 : vector<32x128xf32>
      %c64_i32_80 = arith.constant 64 : i32
      %164 = tpu.dynamic_rotate %154 by %c64_i32_80 dim 1 : vector<32x128xf32>, i32 -> vector<32x128xf32>
      %165 = arith.addf %154, %164 : vector<32x128xf32>
      %c32_i32_81 = arith.constant 32 : i32
      %166 = tpu.dynamic_rotate %165 by %c32_i32_81 dim 1 : vector<32x128xf32>, i32 -> vector<32x128xf32>
      %167 = arith.addf %165, %166 : vector<32x128xf32>
      %c16_i32_82 = arith.constant 16 : i32
      %168 = tpu.dynamic_rotate %167 by %c16_i32_82 dim 1 : vector<32x128xf32>, i32 -> vector<32x128xf32>
      %169 = arith.addf %167, %168 : vector<32x128xf32>
      %c8_i32_83 = arith.constant 8 : i32
      %170 = tpu.dynamic_rotate %169 by %c8_i32_83 dim 1 : vector<32x128xf32>, i32 -> vector<32x128xf32>
      %171 = arith.addf %169, %170 : vector<32x128xf32>
      %172 = arith.divf %154, %171 : vector<32x128xf32>
      %173 = arith.mulf %59, %163 : vector<32x128xf32>
      %c0_84 = arith.constant 0 : index
      %c0_85 = arith.constant 0 : index
      %174 = vector.load %arg17[%c0_84, %c0_85] : memref<128x32xf32, #tpu.memory_space<vmem>>, vector<128x32xf32>
      %cst_86 = arith.constant dense<0.000000e+00> : vector<32x32xf32>
      %175 = tpu.matmul %173, %174, %cst_86 {dimension_numbers = #tpu.dot_dimension_numbers<[1], [0], [0], [1], [0, 0, 1, 1], [], []>} : vector<32x128xf32>, vector<128x32xf32>, vector<32x32xf32> -> vector<32x32xf32>
      %176 = arith.mulf %60, %172 : vector<32x128xf32>
      %c0_87 = arith.constant 0 : index
      %c0_88 = arith.constant 0 : index
      %177 = vector.load %arg18[%c0_87, %c0_88] : memref<128x32xf32, #tpu.memory_space<vmem>>, vector<128x32xf32>
      %cst_89 = arith.constant dense<0.000000e+00> : vector<32x32xf32>
      %178 = tpu.matmul %176, %177, %cst_89 {dimension_numbers = #tpu.dot_dimension_numbers<[1], [0], [0], [1], [0, 0, 1, 1], [], []>} : vector<32x128xf32>, vector<128x32xf32>, vector<32x32xf32> -> vector<32x32xf32>
      %179 = arith.addf %175, %178 : vector<32x32xf32>
      %c0_90 = arith.constant 0 : index
      %c0_91 = arith.constant 0 : index
      %180 = vector.load %arg19[%c0_90, %c0_91] : memref<1x32xf32, #tpu.memory_space<vmem>>, vector<1x32xf32>
      %181 = vector.broadcast %180 : vector<1x32xf32> to vector<32x32xf32>
      %182 = arith.addf %179, %181 : vector<32x32xf32>
      %c0_92 = arith.constant 0 : index
      %c0_93 = arith.constant 0 : index
      %183 = vector.load %arg20[%c0_92, %c0_93] : memref<32x32xf32, #tpu.memory_space<vmem>>, vector<32x32xf32>
      tpu.vector_store %arg20[%c0_92, %c0_93], %182 {strides = array<i32>} : memref<32x32xf32, #tpu.memory_space<vmem>>, vector<32x32xf32>,
    } else {
    }
    return
  }
  func.func @transform_0(%arg0: i32, %arg1: i32) -> (i32, i32) {
    %c0_i32 = arith.constant 0 : i32
    %c0_i32_0 = arith.constant 0 : i32
    return %arg1, %c0_i32 : i32, i32
  }
  func.func @transform_1(%arg0: i32, %arg1: i32) -> (i32, i32) {
    %c0_i32 = arith.constant 0 : i32
    %0 = arith.cmpi eq, %arg0, %c0_i32 : i32
    %c0_i32_0 = arith.constant 0 : i32
    %1 = arith.select %0, %c0_i32_0, %arg1 : i32
    %c0_i32_1 = arith.constant 0 : i32
    %c0_i32_2 = arith.constant 0 : i32
    return %1, %c0_i32_1 : i32, i32
  }
  func.func @transform_2(%arg0: i32, %arg1: i32) -> (i32, i32) {
    %c0_i32 = arith.constant 0 : i32
    %c0_i32_0 = arith.constant 0 : i32
    %c0_i32_1 = arith.constant 0 : i32
    return %c0_i32, %c0_i32_0 : i32, i32
  }
  func.func @transform_3(%arg0: i32, %arg1: i32) -> (i32, i32) {
    %c0_i32 = arith.constant 0 : i32
    %c0_i32_0 = arith.constant 0 : i32
    %c0_i32_1 = arith.constant 0 : i32
    return %c0_i32, %c0_i32_0 : i32, i32
  }
  func.func @transform_4(%arg0: i32, %arg1: i32) -> (i32, i32) {
    %c0_i32 = arith.constant 0 : i32
    %c0_i32_0 = arith.constant 0 : i32
    %c0_i32_1 = arith.constant 0 : i32
    return %c0_i32, %c0_i32_0 : i32, i32
  }
  func.func @transform_5(%arg0: i32, %arg1: i32) -> (i32, i32) {
    %c0_i32 = arith.constant 0 : i32
    %c0_i32_0 = arith.constant 0 : i32
    %c0_i32_1 = arith.constant 0 : i32
    return %c0_i32, %c0_i32_0 : i32, i32
  }
  func.func @transform_6(%arg0: i32, %arg1: i32) -> (i32, i32) {
    %c0_i32 = arith.constant 0 : i32
    %c0_i32_0 = arith.constant 0 : i32
    %c0_i32_1 = arith.constant 0 : i32
    return %c0_i32, %c0_i32_0 : i32, i32
  }
  func.func @transform_7(%arg0: i32, %arg1: i32) -> (i32, i32) {
    %c0_i32 = arith.constant 0 : i32
    %c0_i32_0 = arith.constant 0 : i32
    %c0_i32_1 = arith.constant 0 : i32
    return %c0_i32, %c0_i32_0 : i32, i32
  }
  func.func @transform_8(%arg0: i32, %arg1: i32) -> (i32, i32) {
    %c0_i32 = arith.constant 0 : i32
    %c0_i32_0 = arith.constant 0 : i32
    %c0_i32_1 = arith.constant 0 : i32
    return %c0_i32, %c0_i32_0 : i32, i32
  }
  func.func @transform_9(%arg0: i32, %arg1: i32) -> (i32, i32) {
    %c0_i32 = arith.constant 0 : i32
    %c0_i32_0 = arith.constant 0 : i32
    %c0_i32_1 = arith.constant 0 : i32
    return %c0_i32, %c0_i32_0 : i32, i32
  }
  func.func @transform_10(%arg0: i32, %arg1: i32) -> (i32, i32) {
    %c0_i32 = arith.constant 0 : i32
    %c0_i32_0 = arith.constant 0 : i32
    %c0_i32_1 = arith.constant 0 : i32
    return %c0_i32, %c0_i32_0 : i32, i32
  }
  func.func @transform_11(%arg0: i32, %arg1: i32) -> (i32, i32) {
    %c0_i32 = arith.constant 0 : i32
    %c0_i32_0 = arith.constant 0 : i32
    %c0_i32_1 = arith.constant 0 : i32
    return %c0_i32, %c0_i32_0 : i32, i32
  }
  func.func @transform_12(%arg0: i32, %arg1: i32) -> (i32, i32) {
    %c0_i32 = arith.constant 0 : i32
    %c0_i32_0 = arith.constant 0 : i32
    %c0_i32_1 = arith.constant 0 : i32
    return %c0_i32, %c0_i32_0 : i32, i32
  }
  func.func @transform_13(%arg0: i32, %arg1: i32) -> (i32, i32) {
    %c0_i32 = arith.constant 0 : i32
    %c0_i32_0 = arith.constant 0 : i32
    %c0_i32_1 = arith.constant 0 : i32
    return %c0_i32, %c0_i32_0 : i32, i32
  }
  func.func @transform_14(%arg0: i32, %arg1: i32) -> (i32, i32) {
    %c0_i32 = arith.constant 0 : i32
    %c0_i32_0 = arith.constant 0 : i32
    %c0_i32_1 = arith.constant 0 : i32
    return %c0_i32, %c0_i32_0 : i32, i32
  }
  func.func @transform_15(%arg0: i32, %arg1: i32) -> (i32, i32) {
    %c0_i32 = arith.constant 0 : i32
    %c0_i32_0 = arith.constant 0 : i32
    %c0_i32_1 = arith.constant 0 : i32
    return %c0_i32, %c0_i32_0 : i32, i32
  }
  func.func @transform_16(%arg0: i32, %arg1: i32) -> (i32, i32) {
    %c0_i32 = arith.constant 0 : i32
    %c0_i32_0 = arith.constant 0 : i32
    %c0_i32_1 = arith.constant 0 : i32
    return %c0_i32, %c0_i32_0 : i32, i32
  }
  func.func @transform_17(%arg0: i32, %arg1: i32) -> (i32, i32) {
    %c0_i32 = arith.constant 0 : i32
    %c0_i32_0 = arith.constant 0 : i32
    %c0_i32_1 = arith.constant 0 : i32
    return %c0_i32, %c0_i32_0 : i32, i32
  }
  func.func @transform_18(%arg0: i32, %arg1: i32) -> (i32, i32) {
    %c2_i32 = arith.constant 2 : i32
    %0 = arith.cmpi eq, %arg0, %c2_i32 : i32
    %c0_i32 = arith.constant 0 : i32
    %1 = arith.select %0, %arg1, %c0_i32 : i32
    %c0_i32_0 = arith.constant 0 : i32
    %c0_i32_1 = arith.constant 0 : i32
    return %1, %c0_i32_0 : i32, i32
  }
}

</mosaic_0001>

<bundles_post_ra>
// kernel: tpu_custom_call.1
= control target key start
LH: loop header
LB: loop body
LE: loop exit
PB: predicated region body
PF: predicated region fallthrough
CT: control target
= control target key end

     0   :  { %s5309_s0 = inlined_call_operand.vmem [shape: f32[96,72], index: 0, kind: input, shape index: {}]   ;;  %s5310_s1 = inlined_call_operand.vmem [shape: f32[96,128], index: 1, kind: input, shape index: {}]   ;;  %s5311_s2 = inlined_call_operand.hbm [shape: f32[72,128], index: 2, kind: input, shape index: {}]   ;;  %s5312_s3 = inlined_call_operand.vmem [shape: f32[1,128], index: 3, kind: input, shape index: {}]   ;;  %s5313_s4 = inlined_call_operand.hbm [shape: f32[1,128], index: 4, kind: input, shape index: {}]   ;;  %s5314_s5 = inlined_call_operand.vmem [shape: f32[128,128], index: 5, kind: input, shape index: {}]   ;;  %s5315_s6 = inlined_call_operand.vmem [shape: f32[128,128], index: 6, kind: input, shape index: {}]   ;;  %s5316_s7 = inlined_call_operand.vmem [shape: f32[128,128], index: 7, kind: input, shape index: {}]   ;;  %s5317_s8 = inlined_call_operand.hbm [shape: f32[128,128], index: 8, kind: input, shape index: {}]   ;;  %s5318_s9 = inlined_call_operand.hbm [shape: f32[1,128], index: 9, kind: input, shape index: {}]   ;;  %s5319_s10 = inlined_call_operand.hbm [shape: f32[1,128], index: 10, kind: input, shape index: {}]   ;;  %s5320_s11 = inlined_call_operand.hbm [shape: f32[1,128], index: 11, kind: input, shape index: {}]   ;;  %s5321_s12 = inlined_call_operand.hbm [shape: f32[1,128], index: 12, kind: input, shape index: {}]   ;;  %s5322_s13 = inlined_call_operand.hbm [shape: f32[1,128], index: 13, kind: input, shape index: {}]   ;;  %s5323_s14 = inlined_call_operand.hbm [shape: f32[1,128], index: 14, kind: input, shape index: {}]   ;;  %s5324_s15 = inlined_call_operand.vmem [shape: f32[128,32], index: 15, kind: input, shape index: {}]   ;;  %s5325_s16 = inlined_call_operand.vmem [shape: f32[128,32], index: 16, kind: input, shape index: {}]   ;;  %s5326_s17 = inlined_call_operand.vmem [shape: f32[1,32], index: 17, kind: input, shape index: {}]   ;;  %s5327_s18 = inlined_call_operand.vmem [shape: f32[96,32], index: 18, kind: output, shape index: {}]  }
   0x1   :  { %5333 = sst [smem:[#allocation25_spill]] %s5309_s0 }
   0x2   :  { %5334 = sst [smem:[#allocation26_spill]] %s5310_s1 }
   0x3   :  { %5335 = sst [smem:[#allocation27_spill]] %s5311_s2 }
   0x4   :  { %5336 = sst [smem:[#allocation28_spill]] %s5313_s4 }
   0x5   :  { %5337 = sst [smem:[#allocation29_spill]] %s5318_s9 }
   0x6   :  { %5338 = sst [smem:[#allocation30_spill]] %s5320_s11 }
   0x7   :  { %5339 = sst [smem:[#allocation31_spill]] %s5322_s13 }
   0x8   :  { %5340 = sst [smem:[#allocation32_spill]] %s5325_s16 }
   0x9   :  { %5341 = sst [smem:[#allocation33_spill]] %s5326_s17 }
   0xa   :  { %23 = vsyncpa [#allocation6], 0 }
   0xb   :  { %24 = vsyncpa [#allocation8], 0 }
   0xc   :  { %25 = vsyncpa [#allocation11], 0 }
   0xd   :  { %26 = vsyncpa [#allocation14], 0 }
   0xe   :  { %27 = vsyncpa [#allocation17], 0  ;;  %s4366_s27 = smov 0   ;;  %s4368_s28 = smov 0  }
   0xf   :  { %s4370_s29 = smov 0   ;;  %s4372_s30 = smov 0  }
  0x10   :  { %s4374_s0 = smov 0  }
  0x11 LB: > { %5342 = sst [smem:[#allocation24_spill]] %s4245_s0  ;;  %s4247_s19 = smov [#allocation7]   ;;  %s4245_s0 = sphi %s4374_s0, %s33_s0   ;;  %s4241_s30 = sphi %s4372_s30, %s5362_s30   ;;  %s4237_s29 = sphi %s4370_s29, %s5361_s29   ;;  %s4233_s28 = sphi %s4368_s28, %s5360_s28   ;;  %s4229_s27 = sphi %s4366_s27, %s5359_s27  }
  0x12   : > { %s501_s1 = sshll.u32 %s4247_s19, 4  ;;  %s2991_s20 = sadd.s32 4294967295, %s4245_s0   ;;  %s502_s1 = int_to_ptr.vmem [resolvable:$true] %s501_s1 }
  0x13   : > { %p2993_p0 = scmp.ge.s32.totalorder %s4245_s0, 1  ;;  %p472_p1 = scmp.lt.s32.totalorder %s4245_s0, 10 }
  0x14   : > { %p4394_p2 = scmp.eq.s32.totalorder %s2991_s20, 0  ;;  %s4248_s2 = smov [#allocation10]  }
  0x15   : > { %p4398_p3 = pnand %p2993_p0, %p472_p1  ;;  %s534_s23 = sshll.u32 %s4248_s2, 4  ;;  %s4404_s23 = int_to_ptr.vmem [resolvable:$true] %s534_s23 }
  0x16   : > { %s5343_s21 = scalar_select %p4394_p2, 1, 0 }
  0x17   : > { %s5344_s22 = scalar_select %p4398_p3, 1, 0 }
  0x18   : > { %p3799_p4 = pneg %p4398_p3  ;;  %s4249_s24 = smov [#allocation13]  }
  0x19   : > { %s556_s25 = sshll.u32 %s4249_s24, 4  ;;  %s4250_s19 = smov [#allocation16]   ;;  %s4412_s25 = int_to_ptr.vmem [resolvable:$true] %s556_s25 }
  0x1a   : > { %p4408_p5 = pnand %p4394_p2, %p3799_p4  ;;  %s578_s20 = sshll.u32 %s4250_s19, 4  ;;  %s4414_s20 = int_to_ptr.vmem [resolvable:$true] %s578_s20 }
  0x1b   : > { %s3964_s0 = scalar_lea.vmem %s502_s1, 16  ;;  %s3971_s24 = scalar_lea.vmem %s502_s1, 32 }
  0x1c   : > { %p4418_p6 = pneg %p4408_p5  ;;  %p3965_p7 = scmp.ne.s32.totalorder %s502_s1, %s3964_s0 }
  0x1d   : > { %p3972_p10 = scmp.lt.s32.totalorder %s502_s1, %s502_s1  ;;  %p3973_p11 = scmp.lt.s32.totalorder %s3971_s24, %s3964_s0 }
  0x1e   : > { %p3967_p8 = pnand %p3965_p7, %p4418_p6 }
  0x1f   : > { %p3974_p12 = por %p3973_p11, %p3972_p10 }
  0x20   : > { %p3968_p9 = pneg %p3967_p8 }
  0x22   : > { %p3975_p13 = pnand %p3974_p12, %p3968_p9 }
  0x24   : > { %3978 = shalt.err (!%p3975_p13)
}
  0x25   : > { %s5347_s4 = sld [smem:[#allocation28_spill]]  ;;  %s3990_s16 = scalar_lea.vmem %s4404_s23, 16 }
  0x26   : > { %p3991_p0 = scmp.ne.s32.totalorder %s4404_s23, %s3990_s16  ;;  %s3997_s0 = scalar_lea.vmem %s4404_s23, 32 }
  0x27   : > { %p3998_p7 = scmp.lt.s32.totalorder %s4404_s23, %s4404_s23  ;;  %p3999_p8 = scmp.lt.s32.totalorder %s3997_s0, %s3990_s16 }
  0x28   : > { %p3993_p1 = pnand %p3991_p0, %p4418_p6 }
  0x29   : > { %p4000_p9 = por %p3999_p8, %p3998_p7 }
  0x2a   : > { %p3994_p4 = pneg %p3993_p1 }
  0x2b   : > { %3805 = dma.hbm_to_vmem [thread:$0]  (!%p4408_p5), %s5347_s4, 16, %s502_s1, [#allocation8]  }
  0x2c   : > { %p4001_p10 = pnand %p4000_p9, %p3994_p4 }
  0x2e   : > { %4004 = shalt.err (!%p4001_p10)
}
  0x2f   : > { %s5348_s9 = sld [smem:[#allocation29_spill]]  ;;  %s4016_s1 = scalar_lea.vmem %s4412_s25, 16 }
  0x30   : > { %p4017_p11 = scmp.ne.s32.totalorder %s4412_s25, %s4016_s1  ;;  %s4023_s16 = scalar_lea.vmem %s4412_s25, 32 }
  0x31   : > { %p4024_p0 = scmp.lt.s32.totalorder %s4412_s25, %s4412_s25  ;;  %p4025_p1 = scmp.lt.s32.totalorder %s4023_s16, %s4016_s1 }
  0x32   : > { %p4019_p12 = pnand %p4017_p11, %p4418_p6 }
  0x33   : > { %p4026_p4 = por %p4025_p1, %p4024_p0 }
  0x34   : > { %p4020_p13 = pneg %p4019_p12 }
  0x35   : > { %3811 = dma.hbm_to_vmem [thread:$0]  (!%p4408_p5), %s5348_s9, 16, %s4404_s23, [#allocation11]  }
  0x36   : > { %p4027_p7 = pnand %p4026_p4, %p4020_p13 }
  0x38   : > { %4030 = shalt.err (!%p4027_p7)
}
  0x39   : > { %s5349_s11 = sld [smem:[#allocation30_spill]]  ;;  %s4042_s23 = scalar_lea.vmem %s4414_s20, 16 }
  0x3a   : > { %p4043_p8 = scmp.ne.s32.totalorder %s4414_s20, %s4042_s23  ;;  %s4049_s17 = scalar_lea.vmem %s4414_s20, 32 }
  0x3b   : > { %p4050_p11 = scmp.lt.s32.totalorder %s4414_s20, %s4414_s20  ;;  %p4051_p12 = scmp.lt.s32.totalorder %s4049_s17, %s4042_s23 }
  0x3c   : > { %p4045_p9 = pnand %p4043_p8, %p4418_p6 }
  0x3d   : > { %p4052_p13 = por %p4051_p12, %p4050_p11 }
  0x3e   : > { %p4046_p10 = pneg %p4045_p9 }
  0x3f   : > { %3817 = dma.hbm_to_vmem [thread:$0]  (!%p4408_p5), %s5349_s11, 16, %s4412_s25, [#allocation14]  }
  0x40   : > { %p4053_p0 = pnand %p4052_p13, %p4046_p10 }
  0x42   : > { %4056 = shalt.err (!%p4053_p0)
}
  0x43   : > { %s5350_s13 = sld [smem:[#allocation31_spill]]  ;;  %s42_s25 = sadd.s32 1, %s4237_s29 }
  0x44   : > { %p43_p1 = scmp.ge.s32.totalorder %s42_s25, 3  ;;  %s45_s16 = sadd.s32 1, %s4241_s30 }
  0x45   : > { %s4251_s19 = smov [#allocation5]  }
  0x46   : > { %s5364_s25 = smov (%p43_p1, %s42_s25), 0  ;;  %s5366_s16 = smov (!%p43_p1, %s45_s16), %s4241_s30 }
  0x47   : > { %s484_s0 = sshll.u32 %s4251_s19, 4  ;;  %p47_p4 = scmp.ge.s32.totalorder %s5366_s16, 3  ;;  %s485_s0 = int_to_ptr.vmem [resolvable:$true] %s484_s0 }
  0x48   : > { %s4068_s23 = scalar_lea.vmem %s485_s0, 1152  ;;  %p4076_p10 = scmp.lt.s32.totalorder %s485_s0, %s485_s0 }
  0x49   : > { %3823 = dma.hbm_to_vmem [thread:$0]  (!%p4408_p5), %s5350_s13, 16, %s4414_s20, [#allocation17]  }
  0x4a   : > { %p4069_p7 = scmp.ne.s32.totalorder %s485_s0, %s4068_s23  ;;  %p4077_p11 = scmp.lt.s32.totalorder %s4068_s23, %s4068_s23 }
  0x4c   : > { %p4071_p8 = pnand %p4069_p7, %p4418_p6  ;;  %p4078_p12 = por %p4077_p11, %p4076_p10 }
  0x4e   : > { %p4072_p9 = pneg %p4071_p8 }
  0x50   : > { %p4079_p13 = pnand %p4078_p12, %p4072_p9 }
  0x52   : > { %4082 = shalt.err (!%p4079_p13)
}
  0x53   : > { %s4252_s20 = smov 128   ;;  %s4253_s17 = smov 8  }
  0x54   : > { %s5351_s19 = sld [smem:[#allocation27_spill]]  ;;  %s5368_s16 = smov (%p47_p4, %s5366_s16), 0 }
  0x55   : > { %s4254_s4 = smov [#allocation9]   ;;  %s4255_s11 = smov [#allocation12]  }
  0x56   : > { %s520_s9 = sshll.u32 %s4254_s4, 4  ;;  %s545_s13 = sshll.u32 %s4255_s11, 4  ;;  %s521_s9 = int_to_ptr.vmem [resolvable:$true] %s520_s9  ;;  %s546_s13 = int_to_ptr.vmem [resolvable:$true] %s545_s13 }
  0x57   : > { %s4094_s23 = scalar_lea.vmem %s521_s9, 2048  ;;  %p4102_p8 = scmp.lt.s32.totalorder %s521_s9, %s521_s9 }
  0x58   : > { %p4095_p0 = scmp.ne.s32.totalorder %s521_s9, %s4094_s23  ;;  %p4103_p9 = scmp.lt.s32.totalorder %s4094_s23, %s4094_s23 }
  0x5a   : > { %3802 = dma.hbm_to_vmem [thread:$0]  (!%p4408_p5), %s5351_s19, 1152, %s485_s0, [#allocation6], %s4252_s20, %s4252_s20, %s4253_s17  }
  0x5b   : > { %p4097_p1 = pnand %p4095_p0, %p4418_p6  ;;  %p4104_p10 = por %p4103_p9, %p4102_p8 }
  0x5d   : > { %p4098_p7 = pneg %p4097_p1 }
  0x5f   : > { %p4105_p11 = pnand %p4104_p10, %p4098_p7 }
  0x61   : > { %4108 = shalt.err (!%p4105_p11)
}
  0x62   : > { %3808 = dma.hbm_to_vmem [thread:$0]  (!%p4408_p5), %s5317_s8, 2048, %s521_s9, [#allocation8], %s4252_s20, %s4252_s20, %s4253_s17  }
  0x63   : > { %s4120_s4 = scalar_lea.vmem %s546_s13, 16  ;;  %s4127_s11 = scalar_lea.vmem %s546_s13, 32 }
  0x64   : > { %p4121_p4 = scmp.ne.s32.totalorder %s546_s13, %s4120_s4  ;;  %p4128_p0 = scmp.lt.s32.totalorder %s546_s13, %s546_s13 }
  0x65   : > { %p4129_p1 = scmp.lt.s32.totalorder %s4127_s11, %s4120_s4 }
  0x66   : > { %p4123_p12 = pnand %p4121_p4, %p4418_p6 }
  0x67   : > { %p4130_p2 = por %p4129_p1, %p4128_p0 }
  0x68   : > { %p4124_p13 = pneg %p4123_p12 }
  0x6a   : > { %p4131_p3 = pnand %p4130_p2, %p4124_p13 }
  0x6c   : > { %4134 = shalt.err (!%p4131_p3)
}
  0x6d   : > { %3814 = dma.hbm_to_vmem [thread:$0]  (!%p4408_p5), %s5319_s10, 16, %s546_s13, [#allocation11]  }
  0x6e   : > { %s4256_s23 = smov [#allocation15]   ;;  %s4257_s20 = smov [#allocation18]  }
  0x6f   : > { %s567_s9 = sshll.u32 %s4256_s23, 4  ;;  %s589_s17 = sshll.u32 %s4257_s20, 4  ;;  %s568_s9 = int_to_ptr.vmem [resolvable:$true] %s567_s9  ;;  %s590_s17 = int_to_ptr.vmem [resolvable:$true] %s589_s17 }
  0x70   : > { %s4146_s0 = scalar_lea.vmem %s568_s9, 16  ;;  %s4153_s24 = scalar_lea.vmem %s568_s9, 32 }
  0x71   : > { %p4147_p7 = scmp.ne.s32.totalorder %s568_s9, %s4146_s0  ;;  %p4154_p2 = scmp.lt.s32.totalorder %s568_s9, %s568_s9 }
  0x72   : > { %p4155_p3 = scmp.lt.s32.totalorder %s4153_s24, %s4146_s0 }
  0x73   : > { %p4149_p8 = pnand %p4147_p7, %p4418_p6 }
  0x74   : > { %p4156_p10 = por %p4155_p3, %p4154_p2 }
  0x75   : > { %p4150_p9 = pneg %p4149_p8 }
  0x77   : > { %p4157_p11 = pnand %p4156_p10, %p4150_p9 }
  0x79   : > { %4160 = shalt.err (!%p4157_p11)
}
  0x7a   : > { %3820 = dma.hbm_to_vmem [thread:$0]  (!%p4408_p5), %s5321_s12, 16, %s568_s9, [#allocation14]  }
  0x7b   : > { %s4172_s11 = scalar_lea.vmem %s590_s17, 16  ;;  %s4179_s1 = scalar_lea.vmem %s590_s17, 32 }
  0x7c   : > { %p4173_p4 = scmp.ne.s32.totalorder %s590_s17, %s4172_s11  ;;  %p4180_p0 = scmp.lt.s32.totalorder %s590_s17, %s590_s17 }
  0x7d   : > { %p4181_p1 = scmp.lt.s32.totalorder %s4179_s1, %s4172_s11 }
  0x7e   : > { %p4175_p12 = pnand %p4173_p4, %p4418_p6 }
  0x7f   : > { %p4182_p7 = por %p4181_p1, %p4180_p0 }
  0x80   : > { %p4176_p13 = pneg %p4175_p12 }
  0x82   : > { %p4183_p8 = pnand %p4182_p7, %p4176_p13 }
  0x84   : > { %4186 = shalt.err (!%p4183_p8)
}
  0x85   : > { %3826 = dma.hbm_to_vmem [thread:$0]  (!%p4408_p5), %s5323_s14, 16, %s590_s17, [#allocation17]  }
  0x86   : > { %p5352_p9 = scmp.ne.s32.totalorder %s5344_s22, 0 }
  0x87   : > { %p5353_p2 = scmp.ne.s32.totalorder (!%p5352_p9), %s5343_s21, 0 }
  0x88   : > { %633 = sbr.rel (%p5352_p9) target bundleno = 3266 (0xcc2), region = 92 }
  0x8d   : > { %4208 = dma.done.wait (%p5353_p2), [#allocation6], 1152  }
  0x8e   : > { %4210 = vsyncadd (%p5353_p2), [#allocation6], 4294966144 }
  0x8f   : > { %4212 = dma.done.wait (%p5353_p2), [#allocation8], 2064  }
  0x90   : > { %4214 = vsyncadd (%p5353_p2), [#allocation8], 4294965232 }
  0x91   : > { %4216 = dma.done.wait (%p5353_p2), [#allocation11], 32  }
  0x92   : > { %4218 = vsyncadd (%p5353_p2), [#allocation11], 4294967264 }
  0x93   : > { %4220 = dma.done.wait (%p5353_p2), [#allocation14], 32  }
  0x94   : > { %4222 = vsyncadd (%p5353_p2), [#allocation14], 4294967264 }
  0x95   : > { %4224 = dma.done.wait (%p5353_p2), [#allocation17], 32  }
  0x96   : > { %4226 = vsyncadd (%p5353_p2), [#allocation17], 4294967264  ;;  %s3014_s22 = sshll.u32 %s4229_s27, 2  ;;  %p734_p5 = scmp.eq.s32.totalorder %s4233_s28, 0  ;;  %v760_v0 = vlaneseq  ;;  %v4258_v6 = vmov 0.0  }
  0x97   : > { %p729_p6 = scmp.lt.s32.totalorder %s3014_s22, 11  ;;  %p744_p3 = scmp.eq.s32.totalorder %s4233_s28, 2 }
  0x98   : > { %s735_s26 = scalar_select %p734_p5, 0, %s4229_s27  ;;  %v4546_v1 = vshrl.u32 %v760_v0, 7 }
  0x99   : > { %s5370_s22 = smov (!%p729_p6, %s3014_s22), 11  ;;  %s3020_s9 = sshll.u32 %s4229_s27, 5 }
  0x9a   : > { %s3016_s2 = sshll.u32 %s735_s26, 2  ;;  %s3015_s20 = sshll.u32 %s5370_s22, 3  ;;  %v762_v2 = vadd.s32 8, %v4546_v1  ;;  %v763_v3 = vadd.s32 16, %v4546_v1  ;;  %v764_v4 = vadd.s32 24, %v4546_v1 }
  0x9b   : > { %p737_p10 = scmp.lt.s32.totalorder %s3016_s2, 11  ;;  %s5354_s0 = sld [smem:[#allocation25_spill]] }
  0x9c   : > { %s755_s13 = ssub.s32 72, %s3020_s9  ;;  %s5355_s23 = sld [smem:[#allocation26_spill]] }
  0x9d   : > { %s5372_s2 = smov (!%p737_p10, %s3016_s2), 11  ;;  %p756_p11 = scmp.gt.s32.totalorder %s755_s13, 0 }
  0x9e   : > { %s745_s4 = scalar_select %p744_p3, %s4229_s27, 0 }
  0x9f   : > { %s3017_s11 = sshll.u32 %s5372_s2, 3  ;;  %p3021_p12 = scmp.lt.s32.totalorder %s755_s13, 32 }
  0xa0   : > { %s3018_s22 = sshll.u32 %s745_s4, 2  ;;  %s5374_s13 = smov (!%p756_p11, %s755_s13), 0 }
  0xa1   : > { %s4543_s24 = scalar_lea.vmem %s5354_s0, %s3015_s20  ;;  %p747_p4 = scmp.lt.s32.totalorder %s3018_s22, 11 }
  0xa2   : > { %s4551_s26 = scalar_lea.vmem %s5355_s23, %s3017_s11  ;;  %s5378_s13 = smov (!%p3021_p12, %s5374_s13), 32 }
  0xa3   : > { %s5376_s22 = smov (!%p747_p4, %s3018_s22), 11  ;;  %p779_p13 = scmp.eq.s32.totalorder %s4229_s27, 0  ;;  %v765_v5 = vstv %s5378_s13 }
  0xa4   : > { %s3019_s2 = sshll.u32 %s5376_s22, 3  ;;  %vm766_vm0 = vcmp.lt.s32.totalorder %v4546_v1, %v765_v5  ;;  %vm767_vm1 = vcmp.lt.s32.totalorder %v762_v2, %v765_v5  ;;  %vm768_vm2 = vcmp.lt.s32.totalorder %v763_v3, %v765_v5  ;;  %vm769_vm3 = vcmp.lt.s32.totalorder %v764_v4, %v765_v5 }
  0xa5   : > { %s4560_s21 = scalar_lea.vmem %s5327_s18, %s3019_s2  ;;  %p780_p0 = pnand %p779_p13, %p734_p5  ;;  %v4567_v7 = vsel %vm766_vm0, 1.0, %v4258_v6  ;;  %v4569_v8 = vsel %vm767_vm1, 1.0, %v4258_v6  ;;  %v4571_v9 = vsel %vm768_vm2, 1.0, %v4258_v6  ;;  %v4573_v10 = vsel %vm769_vm3, 1.0, %v4258_v6 }
  0xa7   : > { %783 = sbr.rel (%p780_p0) target bundleno = 174 (0xae), region = 132 }
  0xac   : > { %v4259_v11 = vmov 0.0  }
  0xad   : > { %784 = vst [vmem:[#allocation2] sm:$0x3] %v4259_v11 }
  0xae PF: > { %p3030_p1 = scmp.ne.s32.totalorder %s4233_s28, 0 }
  0xb0   : > { %787 = sbr.rel (%p3030_p1) target bundleno = 421 (0x1a5), region = 136 }
  0xb5   : > { %v800_v12 = vld [vmem:[#allocation5 + $0x40] sm:$0xff]  ;;  %v799_v13 = vld [vmem:[#allocation5 + $0x38] sm:$0xff]  ;;  %v798_v14 = vld [vmem:[#allocation5 + $0x30] sm:$0xff]  ;;  %vm801_vm4 = vcmask 588800  }
  0xb6   : > { %3293 = vmatprep.subr.mxu0 %v800_v12  ;;  %3745 = vmatprep.subr.mxu1 %v800_v12  ;;  %v797_v15 = vld [vmem:[#allocation5 + $0x28] sm:$0xff]  ;;  %v796_v16 = vld [vmem:[#allocation5 + $0x20] sm:$0xff]  ;;  %v795_v17 = vld [vmem:[#allocation5 + $0x18] sm:$0xff] }
  0xb7   : > { %3294 = vmatpush3.msra.mxu0 %v800_v12  ;;  %3754 = vmatpush3.msra.mxu1 %v800_v12  ;;  %v794_v18 = vld [vmem:[#allocation5 + $0x10] sm:$0xff]  ;;  %v793_v19 = vld [vmem:[#allocation5 + $0x8] sm:$0xff]  ;;  %v792_v20 = vld [vmem:[#allocation5] sm:$0xff] }
  0xb8   : > { %3295 = vmatprep.subr.mxu0 %v799_v13  ;;  %3746 = vmatprep.subr.mxu1 %v799_v13  ;;  %v788_v21 = vld [vmem:[%s4543_s24] sm:$0xff]  ;;  %v790_v22 = vld [vmem:[%s4543_s24 + $0x10] sm:$0xff]  ;;  %v789_v23 = vld [vmem:[%s4543_s24 + $0x8] sm:$0xff] }
  0xb9   : > { %3296 = vmatpush3.msra.mxu0 %v799_v13  ;;  %3755 = vmatpush3.msra.mxu1 %v799_v13  ;;  %v791_v24 = vld [vmem:[%s4543_s24 + $0x18] sm:$0xff]  ;;  %v903_v52 = vld [vmem:[#allocation2] sm:$0x1]  ;;  %v915_v55 = vld [vmem:[#allocation2 + $0x1] sm:$0x1] }
  0xba   : > { %3297 = vmatprep.subr.mxu0 %v798_v14  ;;  %3747 = vmatprep.subr.mxu1 %v798_v14 }
  0xbb   : > { %3298 = vmatpush3.msra.mxu0 %v798_v14  ;;  %3756 = vmatpush3.msra.mxu1 %v798_v14 }
  0xbc   : > { %3299 = vmatprep.subr.mxu0 %v797_v15  ;;  %3748 = vmatprep.subr.mxu1 %v797_v15 }
  0xbd   : > { %3300 = vmatpush3.msra.mxu0 %v797_v15  ;;  %3757 = vmatpush3.msra.mxu1 %v797_v15 }
  0xbe   : > { %3301 = vmatprep.subr.mxu0 %v796_v16  ;;  %3749 = vmatprep.subr.mxu1 %v796_v16 }
  0xbf   : > { %3302 = vmatpush3.msra.mxu0 %v796_v16  ;;  %3758 = vmatpush3.msra.mxu1 %v796_v16 }
  0xc0   : > { %3303 = vmatprep.subr.mxu0 %v795_v17  ;;  %3750 = vmatprep.subr.mxu1 %v795_v17 }
  0xc1   : > { %3304 = vmatpush3.msra.mxu0 %v795_v17  ;;  %3759 = vmatpush3.msra.mxu1 %v795_v17 }
  0xc2   : > { %3305 = vmatprep.subr.mxu0 %v794_v18  ;;  %3751 = vmatprep.subr.mxu1 %v794_v18 }
  0xc3   : > { %3306 = vmatpush3.msra.mxu0 %v794_v18  ;;  %3760 = vmatpush3.msra.mxu1 %v794_v18 }
  0xc4   : > { %3307 = vmatprep.subr.mxu0 %v793_v19  ;;  %3752 = vmatprep.subr.mxu1 %v793_v19 }
  0xc5   : > { %3308 = vmatpush3.msra.mxu0 %v793_v19  ;;  %3761 = vmatpush3.msra.mxu1 %v793_v19 }
  0xc6   : > { %3309 = vmatprep.subr.mxu0 %v792_v20  ;;  %3753 = vmatprep.subr.mxu1 %v792_v20 }
  0xc7   : > { %3310 = vmatpush3.msra.mxu0 %v792_v20  ;;  %3762 = vmatpush3.msra.mxu1 %v792_v20 }
  0xc8   : > { %3311 = vmatprep.mubr.msk.f32.mxu0 %vm801_vm4, %v788_v21  ;;  %3314 = vmatprep.mubr.msk.f32.mxu1 %vm801_vm4, %v790_v22 }
  0xc9   : > { %3312 = vmatmul.mubr.msk.f32.vlgmr.msra.gmra.mxu0 %vm801_vm4, %v789_v23  ;;  %3315 = vmatmul.mubr.msk.f32.vlgmr.msra.gmra.mxu1 %vm801_vm4, %v791_v24 }
 0x189   : > { %v3313_v25 = vpop.f32.mrf.mxu0  ;;  %v3316_v26 = vpop.f32.mrf.mxu1 }
 0x18a   : > { %v900_v27 = vmul.f32 %v3313_v25, %v4569_v8  ;;  %v902_v33 = vmul.f32 %v3316_v26, %v4573_v10 }
 0x18b   : > { %v880_v28 = vpop.f32.mrf.mxu0  ;;  %v890_v29 = vpop.f32.mrf.mxu1 }
 0x18c   : > { %v899_v30 = vmul.f32 %v4567_v7, %v880_v28  ;;  %v901_v31 = vmul.f32 %v4571_v9, %v890_v29  ;;  %v917_v32 = vmul.f32 %v900_v27, %v900_v27  ;;  %v919_v39 = vmul.f32 %v902_v33, %v902_v33 }
 0x18e   : > { %v904_v34 = vadd.f32 %v900_v27, %v899_v30  ;;  %v916_v35 = vmul.f32 %v899_v30, %v899_v30  ;;  %v918_v38 = vmul.f32 %v901_v31, %v901_v31 }
 0x190   : > { %v920_v36 = vadd.f32 %v917_v32, %v916_v35  ;;  %v905_v37 = vadd.f32 %v904_v34, %v901_v31 }
 0x192   : > { %v906_v40 = vadd.f32 %v905_v37, %v902_v33  ;;  %v921_v41 = vadd.f32 %v920_v36, %v918_v38 }
 0x194   : > { %v907_v42 = vrot.slane %v906_v40, 4  ;;  %v922_v43 = vadd.f32 %v921_v41, %v919_v39 }
 0x196   : > { %v908_v44 = vadd.f32 %v907_v42, %v906_v40  ;;  %v923_v45 = vrot.slane %v922_v43, 4 }
 0x198   : > { %v909_v46 = vrot.slane %v908_v44, 2  ;;  %v924_v47 = vadd.f32 %v923_v45, %v922_v43 }
 0x19a   : > { %v910_v48 = vadd.f32 %v909_v46, %v908_v44  ;;  %v925_v49 = vrot.slane %v924_v47, 2 }
 0x19c   : > { %v911_v50 = vrot.slane %v910_v48, 1  ;;  %v926_v51 = vadd.f32 %v925_v49, %v924_v47 }
 0x19e   : > { %v912_v53 = vadd.f32 %v911_v50, %v910_v48  ;;  %v927_v54 = vrot.slane %v926_v51, 1 }
 0x1a0   : > { %v913_v56 = vadd.f32 %v912_v53, %v903_v52  ;;  %v928_v57 = vadd.f32 %v927_v54, %v926_v51 }
 0x1a2   : > { %914 = vst [vmem:[#allocation2] sm:$0x1] %v913_v56  ;;  %v929_v58 = vadd.f32 %v928_v57, %v915_v55 }
 0x1a4   : > { %930 = vst [vmem:[#allocation2 + $0x1] sm:$0x1] %v929_v58 }
 0x1a5 PF: > { %p931_p7 = scmp.eq.s32.totalorder %s4233_s28, 1 }
 0x1a7   : > { %p932_p8 = pnand %p931_p7, %p779_p13 }
 0x1a9   : > { %935 = sbr.rel (%p932_p8) target bundleno = 432 (0x1b0), region = 140 }
 0x1ae   : > { %v4260_v59 = vmov 0.0  }
 0x1af   : > { %936 = vst [vmem:[#allocation3] sm:$0x3] %v4260_v59  ;;  %937 = vst [vmem:[#allocation4] sm:$0x3] %v4260_v59 }
 0x1b0 PF: > { %p3035_p9 = scmp.ne.s32.totalorder %s4233_s28, 1 }
 0x1b1   : > { %s4261_s17 = smov (!%p3035_p9), 64   ;;  %s4262_s27 = smov (!%p3035_p9), 32  }
 0x1b2   : > { %940 = sbr.rel (%p3035_p9) target bundleno = 1209 (0x4b9), region = 144  ;;  %s4263_s0 = smov (!%p3035_p9), 16  }
 0x1b3   : > { %s4264_s22 = smov (!%p3035_p9), 8  }
 0x1b7   : > { %v941_v60 = vld [vmem:[#allocation2] sm:$0x3]  ;;  %v996_v61 = vld [vmem:[#allocation5 + $0x40] sm:$0xff]  ;;  %vm997_vm5 = vcmask 588800   ;;  %v994_v63 = vld [vmem:[#allocation5 + $0x30] sm:$0xff] }
 0x1b8   : > { %942 = vrot.lane.b32.xlu0 %v941_v60, %s4261_s17  ;;  %v995_v62 = vld [vmem:[#allocation5 + $0x38] sm:$0xff]  ;;  %3317 = vmatprep.subr.mxu0 %v996_v61  ;;  %v993_v2 = vld [vmem:[#allocation5 + $0x28] sm:$0xff]  ;;  %v992_v3 = vld [vmem:[#allocation5 + $0x20] sm:$0xff] }
 0x1b9   : > { %3318 = vmatpush3.msra.mxu0 %v996_v61  ;;  %v984_v0 = vld [vmem:[%s4543_s24] sm:$0xff]  ;;  %v990_v11 = vld [vmem:[#allocation5 + $0x10] sm:$0xff]  ;;  %v989_v12 = vld [vmem:[#allocation5 + $0x8] sm:$0xff] }
 0x1ba   : > { %3319 = vmatprep.subr.mxu0 %v995_v62  ;;  %3335 = vmatprep.mubr.msk.f32.mxu0 %vm997_vm5, %v984_v0  ;;  %v991_v5 = vld [vmem:[#allocation5 + $0x18] sm:$0xff]  ;;  %v988_v13 = vld [vmem:[#allocation5] sm:$0xff]  ;;  %v986_v15 = vld [vmem:[%s4543_s24 + $0x10] sm:$0xff] }
 0x1bb   : > { %3320 = vmatpush3.msra.mxu0 %v995_v62  ;;  %v985_v14 = vld [vmem:[%s4543_s24 + $0x8] sm:$0xff]  ;;  %v987_v16 = vld [vmem:[%s4543_s24 + $0x18] sm:$0xff]  ;;  %v1153_v22 = vld [vmem:[%s5315_s6 + $0x70] sm:$0xff] }
 0x1bc   : > { %3321 = vmatprep.subr.mxu0 %v994_v63  ;;  %v1154_v19 = vld [vmem:[%s5315_s6 + $0x78] sm:$0xff]  ;;  %v1152_v24 = vld [vmem:[%s5315_s6 + $0x68] sm:$0xff]  ;;  %v1137_v25 = vld [vmem:[%s5314_s5 + $0x70] sm:$0xff] }
 0x1bd   : > { %3322 = vmatpush3.msra.mxu0 %v994_v63  ;;  %3341 = vmatprep.subr.mxu1 %v1154_v19  ;;  %v1138_v23 = vld [vmem:[%s5314_s5 + $0x78] sm:$0xff]  ;;  %v1151_v26 = vld [vmem:[%s5315_s6 + $0x60] sm:$0xff]  ;;  %v1136_v27 = vld [vmem:[%s5314_s5 + $0x68] sm:$0xff] }
 0x1be   : > { %3323 = vmatprep.subr.mxu0 %v993_v2  ;;  %3342 = vmatpush3.msra.mxu1 %v1154_v19  ;;  %v1150_v28 = vld [vmem:[%s5315_s6 + $0x58] sm:$0xff]  ;;  %v1135_v29 = vld [vmem:[%s5314_s5 + $0x60] sm:$0xff]  ;;  %v1149_v30 = vld [vmem:[%s5315_s6 + $0x50] sm:$0xff] }
 0x1bf   : > { %3324 = vmatpush3.msra.mxu0 %v993_v2  ;;  %3343 = vmatprep.subr.mxu1 %v1153_v22  ;;  %v1134_v31 = vld [vmem:[%s5314_s5 + $0x58] sm:$0xff]  ;;  %v1148_v32 = vld [vmem:[%s5315_s6 + $0x48] sm:$0xff]  ;;  %v1133_v33 = vld [vmem:[%s5314_s5 + $0x50] sm:$0xff] }
 0x1c0   : > { %3325 = vmatprep.subr.mxu0 %v992_v3  ;;  %3344 = vmatpush3.msra.mxu1 %v1153_v22  ;;  %v1147_v34 = vld [vmem:[%s5315_s6 + $0x40] sm:$0xff]  ;;  %v1132_v35 = vld [vmem:[%s5314_s5 + $0x48] sm:$0xff]  ;;  %v1146_v36 = vld [vmem:[%s5315_s6 + $0x38] sm:$0xff] }
 0x1c1   : > { %3326 = vmatpush3.msra.mxu0 %v992_v3  ;;  %3345 = vmatprep.subr.mxu1 %v1152_v24  ;;  %v1131_v37 = vld [vmem:[%s5314_s5 + $0x40] sm:$0xff]  ;;  %v1145_v38 = vld [vmem:[%s5315_s6 + $0x30] sm:$0xff]  ;;  %v1130_v39 = vld [vmem:[%s5314_s5 + $0x38] sm:$0xff] }
 0x1c2   : > { %3327 = vmatprep.subr.mxu0 %v991_v5  ;;  %3346 = vmatpush3.msra.mxu1 %v1152_v24  ;;  %v1144_v40 = vld [vmem:[%s5315_s6 + $0x28] sm:$0xff]  ;;  %v1129_v41 = vld [vmem:[%s5314_s5 + $0x30] sm:$0xff]  ;;  %v1143_v42 = vld [vmem:[%s5315_s6 + $0x20] sm:$0xff] }
 0x1c3   : > { %3328 = vmatpush3.msra.mxu0 %v991_v5  ;;  %3347 = vmatprep.subr.mxu1 %v1151_v26  ;;  %v1128_v43 = vld [vmem:[%s5314_s5 + $0x28] sm:$0xff]  ;;  %v1142_v44 = vld [vmem:[%s5315_s6 + $0x18] sm:$0xff]  ;;  %v1127_v45 = vld [vmem:[%s5314_s5 + $0x20] sm:$0xff] }
 0x1c4   : > { %3329 = vmatprep.subr.mxu0 %v990_v11  ;;  %3348 = vmatpush3.msra.mxu1 %v1151_v26  ;;  %v1141_v46 = vld [vmem:[%s5315_s6 + $0x10] sm:$0xff]  ;;  %v1126_v47 = vld [vmem:[%s5314_s5 + $0x18] sm:$0xff]  ;;  %v1140_v48 = vld [vmem:[%s5315_s6 + $0x8] sm:$0xff] }
 0x1c5   : > { %3330 = vmatpush3.msra.mxu0 %v990_v11  ;;  %3349 = vmatprep.subr.mxu1 %v1150_v28  ;;  %v1125_v49 = vld [vmem:[%s5314_s5 + $0x10] sm:$0xff]  ;;  %v1139_v50 = vld [vmem:[%s5315_s6] sm:$0xff]  ;;  %v1124_v51 = vld [vmem:[%s5314_s5 + $0x8] sm:$0xff] }
 0x1c6   : > { %3331 = vmatprep.subr.mxu0 %v989_v12  ;;  %3350 = vmatpush3.msra.mxu1 %v1150_v28  ;;  %v1119_v52 = vld [vmem:[%s4551_s26] sm:$0xff]  ;;  %v1367_v54 = vld [vmem:[#allocation9 + $0x78] sm:$0xff]  ;;  %v4700_v57 = vld [vmem:[%s5316_s7 + $0x78] sm:$0xff] }
 0x1c7   : > { %3332 = vmatpush3.msra.mxu0 %v989_v12  ;;  %3351 = vmatprep.subr.mxu1 %v1149_v30  ;;  %v1123_v53 = vld [vmem:[%s5314_s5] sm:$0xff]  ;;  %v1120_v55 = vld [vmem:[%s4551_s26 + $0x8] sm:$0xff]  ;;  %v1365_v58 = vld [vmem:[#allocation9 + $0x68] sm:$0xff] }
 0x1c8   : > { %3333 = vmatprep.subr.mxu0 %v988_v13  ;;  %3352 = vmatpush3.msra.mxu1 %v1149_v30  ;;  %v1366_v56 = vld [vmem:[#allocation9 + $0x70] sm:$0xff]  ;;  %v1121_v59 = vld [vmem:[%s4551_s26 + $0x10] sm:$0xff]  ;;  %v1122_v61 = vld [vmem:[%s4551_s26 + $0x18] sm:$0xff] }
 0x1c9   : > { %3334 = vmatpush3.msra.mxu0 %v988_v13  ;;  %3353 = vmatprep.subr.mxu1 %v1148_v32  ;;  %v1363_v62 = vld [vmem:[#allocation9 + $0x58] sm:$0xff]  ;;  %v1362_v63 = vld [vmem:[#allocation9 + $0x50] sm:$0xff]  ;;  %v1361_v0 = vld [vmem:[#allocation9 + $0x48] sm:$0xff] }
 0x1ca   : > { %3336 = vmatmul.mubr.msk.f32.vlgmr.msra.gmra.mxu0 %vm997_vm5, %v985_v14  ;;  %3379 = vmatprep.subr.mxu0 %v1138_v23  ;;  %v1360_v2 = vld [vmem:[#allocation9 + $0x40] sm:$0xff]  ;;  %v1359_v3 = vld [vmem:[#allocation9 + $0x38] sm:$0xff]  ;;  %v1357_v5 = vld [vmem:[#allocation9 + $0x28] sm:$0xff] }
 0x1cb   : > { %3338 = vmatprep.mubr.msk.f32.mxu0 %vm997_vm5, %v986_v15  ;;  %3380 = vmatpush3.msra.mxu0 %v1138_v23  ;;  %v1355_v11 = vld [vmem:[#allocation9 + $0x18] sm:$0xff]  ;;  %v1354_v12 = vld [vmem:[#allocation9 + $0x10] sm:$0xff]  ;;  %v1353_v13 = vld [vmem:[#allocation9 + $0x8] sm:$0xff]  ;;  %v4265_v23 = vmov 1966171168  }
 0x1cc   : > { %3381 = vmatprep.subr.mxu0 %v1137_v25  ;;  %3354 = vmatpush3.msra.mxu1 %v1148_v32  ;;  %v1352_v14 = vld [vmem:[#allocation9] sm:$0xff]  ;;  %v965_v24 = vunpack.c.l.s4 %v4265_v23  ;;  %v1098_v32 = vsub.s32 0, %v4546_v1 }
 0x1cd   : > { %3382 = vmatpush3.msra.mxu0 %v1137_v25  ;;  %3355 = vmatprep.subr.mxu1 %v1147_v34 }
 0x1ce   : > { %3339 = vmatmul.mubr.msk.f32.gmra.mxu0 %vm997_vm5, %v987_v16  ;;  %3383 = vmatprep.subr.mxu0 %v1136_v27  ;;  %v966_v25 = vunpack.c.0.s8 %v965_v24 }
 0x1cf   : > { %3384 = vmatpush3.msra.mxu0 %v1136_v27  ;;  %3356 = vmatpush3.msra.mxu1 %v1147_v34 }
 0x1d0   : > { %3385 = vmatprep.subr.mxu0 %v1135_v29  ;;  %3357 = vmatprep.subr.mxu1 %v1146_v36  ;;  %v969_v26 = vsub.s32 %v966_v25, %v4546_v1 }
 0x1d1   : > { %3386 = vmatpush3.msra.mxu0 %v1135_v29  ;;  %3358 = vmatpush3.msra.mxu1 %v1146_v36  ;;  %v981_v36 = vld [vmem:[#allocation7] sm:$0x1] }
 0x1d2   : > { %3387 = vmatprep.subr.mxu0 %v1134_v31  ;;  %3359 = vmatprep.subr.mxu1 %v1145_v38 }
 0x1d3   : > { %3388 = vmatpush3.msra.mxu0 %v1134_v31  ;;  %3360 = vmatpush3.msra.mxu1 %v1145_v38 }
 0x1d4   : > { %3389 = vmatprep.subr.mxu0 %v1133_v33  ;;  %3361 = vmatprep.subr.mxu1 %v1144_v40 }
 0x1d5   : > { %3390 = vmatpush3.msra.mxu0 %v1133_v33  ;;  %3362 = vmatpush3.msra.mxu1 %v1144_v40 }
 0x1d6   : > { %3391 = vmatprep.subr.mxu0 %v1132_v35  ;;  %3363 = vmatprep.subr.mxu1 %v1143_v42 }
 0x1d7   : > { %3392 = vmatpush3.msra.mxu0 %v1132_v35  ;;  %3364 = vmatpush3.msra.mxu1 %v1143_v42 }
 0x1d8   : > { %3393 = vmatprep.subr.mxu0 %v1131_v37  ;;  %3365 = vmatprep.subr.mxu1 %v1142_v44 }
 0x1d9   : > { %3394 = vmatpush3.msra.mxu0 %v1131_v37  ;;  %3366 = vmatpush3.msra.mxu1 %v1142_v44 }
 0x1da   : > { %3395 = vmatprep.subr.mxu0 %v1130_v39  ;;  %3367 = vmatprep.subr.mxu1 %v1141_v46 }
 0x1db   : > { %3396 = vmatpush3.msra.mxu0 %v1130_v39  ;;  %3368 = vmatpush3.msra.mxu1 %v1141_v46 }
 0x1dc   : > { %3397 = vmatprep.subr.mxu0 %v1129_v41  ;;  %3369 = vmatprep.subr.mxu1 %v1140_v48 }
 0x1dd   : > { %3398 = vmatpush3.msra.mxu0 %v1129_v41  ;;  %3370 = vmatpush3.msra.mxu1 %v1140_v48 }
 0x1de   : > { %3399 = vmatprep.subr.mxu0 %v1128_v43  ;;  %3371 = vmatprep.subr.mxu1 %v1139_v50 }
 0x1df   : > { %3400 = vmatpush3.msra.mxu0 %v1128_v43  ;;  %3372 = vmatpush3.msra.mxu1 %v1139_v50 }
 0x1e0   : > { %3401 = vmatprep.subr.mxu0 %v1127_v45  ;;  %3373 = vmatprep.mubr.f32.mxu1 %v1119_v52 }
 0x1e1   : > { %3402 = vmatpush3.msra.mxu0 %v1127_v45  ;;  %3417 = vmatprep.subr.mxu1 %v1367_v54 }
 0x1e2   : > { %3403 = vmatprep.subr.mxu0 %v1126_v47  ;;  %3374 = vmatmul.mubr.f32.vlgmr.msra.gmra.mxu1 %v1120_v55 }
 0x1e3   : > { %3404 = vmatpush3.msra.mxu0 %v1126_v47  ;;  %3418 = vmatpush3.msra.mxu1 %v1367_v54  ;;  %v1349_v54 = vld [vmem:[%s5316_s7 + $0x68] sm:$0xff] }
 0x1e4   : > { %3405 = vmatprep.subr.mxu0 %v1125_v49  ;;  %3419 = vmatprep.subr.mxu1 %v1366_v56 }
 0x1e5   : > { %3406 = vmatpush3.msra.mxu0 %v1125_v49  ;;  %3420 = vmatpush3.msra.mxu1 %v1366_v56  ;;  %v1348_v56 = vld [vmem:[%s5316_s7 + $0x60] sm:$0xff] }
 0x1e6   : > { %3407 = vmatprep.subr.mxu0 %v1124_v51  ;;  %3421 = vmatprep.subr.mxu1 %v1365_v58 }
 0x1e7   : > { %3408 = vmatpush3.msra.mxu0 %v1124_v51  ;;  %3422 = vmatpush3.msra.mxu1 %v1365_v58  ;;  %v1346_v58 = vld [vmem:[%s5316_s7 + $0x50] sm:$0xff] }
 0x1e8   : > { %3409 = vmatprep.subr.mxu0 %v1123_v53  ;;  %3376 = vmatprep.mubr.f32.mxu1 %v1121_v59 }
 0x1e9   : > { %3410 = vmatpush3.msra.mxu0 %v1123_v53  ;;  %3377 = vmatmul.mubr.f32.gmra.mxu1 %v1122_v61  ;;  %v1350_v53 = vld [vmem:[%s5316_s7 + $0x70] sm:$0xff] }
 0x1ea   : > { %3455 = vmatprep.subr.mxu0 %v4700_v57  ;;  %3449 = vmatprep.mubr.f32.mxu1 %v1119_v52 }
 0x22a   : > { %v943_v4 = vpop.permute.xlu0 %942 }
 0x22b   : > { %v944_v6 = vadd.f32 %v943_v4, %v941_v60  ;;  %v1364_v60 = vld [vmem:[#allocation9 + $0x60] sm:$0xff]  ;;  %v1358_v4 = vld [vmem:[#allocation9 + $0x30] sm:$0xff] }
 0x22c   : > { %3423 = vmatprep.subr.mxu1 %v1364_v60 }
 0x22d   : > { %945 = vrot.lane.b32.xlu0 %v944_v6, %s4262_s27  ;;  %3424 = vmatpush3.msra.mxu1 %v1364_v60  ;;  %v1344_v60 = vld [vmem:[%s5316_s7 + $0x40] sm:$0xff] }
 0x22e   : > { %3425 = vmatprep.subr.mxu1 %v1363_v62 }
 0x22f   : > { %3426 = vmatpush3.msra.mxu1 %v1363_v62  ;;  %v1342_v62 = vld [vmem:[%s5316_s7 + $0x30] sm:$0xff] }
 0x230   : > { %3427 = vmatprep.subr.mxu1 %v1362_v63 }
 0x231   : > { %3428 = vmatpush3.msra.mxu1 %v1362_v63  ;;  %v1341_v63 = vld [vmem:[%s5316_s7 + $0x28] sm:$0xff] }
 0x232   : > { %3429 = vmatprep.subr.mxu1 %v1361_v0 }
 0x233   : > { %3430 = vmatpush3.msra.mxu1 %v1361_v0  ;;  %v1340_v0 = vld [vmem:[%s5316_s7 + $0x20] sm:$0xff] }
 0x234   : > { %3431 = vmatprep.subr.mxu1 %v1360_v2 }
 0x235   : > { %3432 = vmatpush3.msra.mxu1 %v1360_v2  ;;  %v1339_v2 = vld [vmem:[%s5316_s7 + $0x18] sm:$0xff] }
 0x236   : > { %3433 = vmatprep.subr.mxu1 %v1359_v3 }
 0x237   : > { %3434 = vmatpush3.msra.mxu1 %v1359_v3  ;;  %v1338_v3 = vld [vmem:[%s5316_s7 + $0x10] sm:$0xff] }
 0x238   : > { %3435 = vmatprep.subr.mxu1 %v1358_v4 }
 0x239   : > { %3436 = vmatpush3.msra.mxu1 %v1358_v4  ;;  %v1337_v4 = vld [vmem:[%s5316_s7 + $0x8] sm:$0xff] }
 0x23a   : > { %3437 = vmatprep.subr.mxu1 %v1357_v5 }
 0x23b   : > { %3438 = vmatpush3.msra.mxu1 %v1357_v5  ;;  %v1336_v5 = vld [vmem:[%s5316_s7] sm:$0xff] }
 0x28a   : > { %v3337_v27 = vpop.f32.mrf.mxu0 }
 0x28c   : > { %v1076_v30 = vpop.f32.mrf.mxu0 }
 0x28e   : > { %v3340_v34 = vpop.f32.mrf.mxu0 }
 0x290   : > { %v1086_v39 = vpop.f32.mrf.mxu0 }
 0x29f   : > { %v946_v17 = vpop.permute.xlu0 %945 }
 0x2a0   : > { %v947_v18 = vadd.f32 %v946_v17, %v944_v6  ;;  %v1356_v6 = vld [vmem:[#allocation9 + $0x20] sm:$0xff] }
 0x2a1   : > { %3439 = vmatprep.subr.mxu1 %v1356_v6 }
 0x2a2   : > { %948 = vrot.lane.b32.xlu1 %v947_v18, %s4263_s0  ;;  %3440 = vmatpush3.msra.mxu1 %v1356_v6  ;;  %v3375_v6 = vpop.f32.mrf.mxu1 }
 0x2a3   : > { %3441 = vmatprep.subr.mxu1 %v1355_v11 }
 0x2a4   : > { %3442 = vmatpush3.msra.mxu1 %v1355_v11  ;;  %v1221_v11 = vpop.f32.mrf.mxu1 }
 0x2a5   : > { %3443 = vmatprep.subr.mxu1 %v1354_v12 }
 0x2a6   : > { %3444 = vmatpush3.msra.mxu1 %v1354_v12 }
 0x2a7   : > { %3445 = vmatprep.subr.mxu1 %v1353_v13 }
 0x2a8   : > { %3446 = vmatpush3.msra.mxu1 %v1353_v13  ;;  %v3040_v13 = vld [vmem:[#allocation10] ss:$0 sm:$0xff] }
 0x2a9   : > { %3447 = vmatprep.subr.mxu1 %v1352_v14 }
 0x2aa   : > { %3448 = vmatpush3.msra.mxu1 %v1352_v14  ;;  %v3378_v14 = vpop.f32.mrf.mxu1 }
 0x2ab   : > { %3450 = vmatmul.mubr.f32.vlgmr.msra.gmra.mxu1 %v1120_v55 }
 0x2ac   : > { %3452 = vmatprep.mubr.f32.mxu1 %v1121_v59  ;;  %v1345_v59 = vld [vmem:[%s5316_s7 + $0x48] sm:$0xff] }
 0x2af   : > { %3453 = vmatmul.mubr.f32.gmra.mxu1 %v1122_v61  ;;  %v1343_v61 = vld [vmem:[%s5316_s7 + $0x38] sm:$0xff] }
 0x314   : > { %v949_v20 = vpop.permute.xlu1 %948 }
 0x315   : > { %v4599_v21 = vadd.f32 %v949_v20, %v947_v18 }
 0x317   : > { %951 = vrot.lane.b32.xlu1 %v4599_v21, %s4264_s22 }
 0x389   : > { %v952_v15 = vpop.permute.xlu1 %951 }
 0x38a   : > { %v953_v16 = vadd.f32 %v952_v15, %v4599_v21  ;;  %v960_v21 = vld [vmem:[%s5312_s3] sm:$0x1] }
 0x38c   : > { %v954_v17 = vmul.f32 0.00086805556, %v953_v16 }
 0x38e   : > { %v955_v18 = vmul.f32 %v954_v17, %v954_v17 }
 0x390   : > { %v957_v19 = vrot.slane %v955_v18, 7 }
 0x392   : > { %v959_v20 = vsub.f32 %v954_v17, %v957_v19 }
 0x394   : > { %v961_v22 = vadd.f32 1e-05, %v959_v20  ;;  %v1231_v20 = vpop.f32.mrf.mxu1 }
 0x396   : > { %3909 = vrsqrt.f32 %v961_v22 }
 0x3a3   : > { %v3910_v28 = vpop.eup %3909 }
 0x3a4   : > { %v970_v29 = vrot.slane %v3910_v28, %v969_v26 }
 0x3a6   : > { %v971_v31 = vcombine.high %v970_v29, %v970_v29 }
 0x3a8   : > { %v978_v33 = vrot.slane %v971_v31, %v969_v26 }
 0x3aa   : > { %v980_v35 = vmul.f32 %v978_v33, %v960_v21 }
 0x3ac   : > { %v982_v37 = vmul.f32 %v980_v35, %v954_v17  ;;  %v1099_v38 = vrot.slane %v980_v35, %v1098_v32 }
 0x3ae   : > { %v983_v40 = vsub.f32 %v981_v36, %v982_v37  ;;  %v1102_v42 = vmul.f32 %v3337_v27, %v1099_v38  ;;  %v1101_v43 = vmul.f32 %v1099_v38, %v1076_v30  ;;  %v1103_v44 = vmul.f32 %v1099_v38, %v1086_v39 }
 0x3af   : > { %v1104_v48 = vmul.f32 %v3340_v34, %v1099_v38 }
 0x3b0   : > { %v1109_v41 = vrot.slane %v983_v40, %v1098_v32 }
 0x3b2   : > { %v1112_v45 = vadd.f32 %v1109_v41, %v1102_v42  ;;  %v1111_v46 = vadd.f32 %v1109_v41, %v1101_v43  ;;  %v1113_v47 = vadd.f32 %v1109_v41, %v1103_v44  ;;  %v1114_v51 = vadd.f32 %v1109_v41, %v1104_v48 }
 0x3b4   : > { %v1116_v49 = vmax.f32 %v1112_v45, 0.0  ;;  %v1115_v50 = vmax.f32 %v1111_v46, 0.0  ;;  %v1117_v52 = vmax.f32 %v1113_v47, 0.0  ;;  %v1118_v55 = vmax.f32 %v1114_v51, 0.0  ;;  %v3451_v51 = vpop.f32.mrf.mxu1 }
 0x3b6   : > { %3411 = vmatprep.mubr.f32.mxu0 %v1115_v50 }
 0x3b7   : > { %3412 = vmatmul.mubr.f32.vlgmr.msra.gmra.mxu0 %v1116_v49 }
 0x3b8   : > { %3456 = vmatpush3.msra.mxu0 %v4700_v57  ;;  %3414 = vmatprep.mubr.f32.mxu0 %v1117_v52  ;;  %v1347_v57 = vld [vmem:[%s5316_s7 + $0x58] sm:$0xff] }
 0x3b9   : > { %3457 = vmatprep.subr.mxu0 %v1350_v53 }
 0x3ba   : > { %3458 = vmatpush3.msra.mxu0 %v1350_v53 }
 0x3bb   : > { %3459 = vmatprep.subr.mxu0 %v1349_v54  ;;  %3415 = vmatmul.mubr.f32.gmra.mxu0 %v1118_v55 }
 0x3bc   : > { %3460 = vmatpush3.msra.mxu0 %v1349_v54  ;;  %3487 = vmatprep.mubr.f32.mxu0 %v1115_v50  ;;  %v1557_v50 = vld [vmem:[#allocation3] sm:$0x1]  ;;  %v1569_v54 = vld [vmem:[#allocation3 + $0x1] sm:$0x1] }
 0x3bd   : > { %3461 = vmatprep.subr.mxu0 %v1348_v56 }
 0x3be   : > { %3462 = vmatpush3.msra.mxu0 %v1348_v56 }
 0x3bf   : > { %3463 = vmatprep.subr.mxu0 %v1347_v57 }
 0x3c0   : > { %3464 = vmatpush3.msra.mxu0 %v1347_v57  ;;  %v1434_v57 = vpop.f32.mrf.mxu1 }
 0x3c1   : > { %3465 = vmatprep.subr.mxu0 %v1346_v58 }
 0x3c2   : > { %3466 = vmatpush3.msra.mxu0 %v1346_v58 }
 0x3c3   : > { %3467 = vmatprep.subr.mxu0 %v1345_v59 }
 0x3c4   : > { %3468 = vmatpush3.msra.mxu0 %v1345_v59 }
 0x3c5   : > { %3469 = vmatprep.subr.mxu0 %v1344_v60 }
 0x3c6   : > { %3470 = vmatpush3.msra.mxu0 %v1344_v60  ;;  %v3041_v60 = vld [vmem:[#allocation12] ss:$0 sm:$0xff] }
 0x3c7   : > { %3471 = vmatprep.subr.mxu0 %v1343_v61 }
 0x3c8   : > { %3472 = vmatpush3.msra.mxu0 %v1343_v61 }
 0x3c9   : > { %3473 = vmatprep.subr.mxu0 %v1342_v62 }
 0x3ca   : > { %3474 = vmatpush3.msra.mxu0 %v1342_v62  ;;  %v3454_v62 = vpop.f32.mrf.mxu1 }
 0x3cb   : > { %3475 = vmatprep.subr.mxu0 %v1341_v63 }
 0x3cc   : > { %3476 = vmatpush3.msra.mxu0 %v1341_v63 }
 0x3cd   : > { %3477 = vmatprep.subr.mxu0 %v1340_v0 }
 0x3ce   : > { %3478 = vmatpush3.msra.mxu0 %v1340_v0 }
 0x3cf   : > { %3479 = vmatprep.subr.mxu0 %v1339_v2 }
 0x3d0   : > { %3480 = vmatpush3.msra.mxu0 %v1339_v2 }
 0x3d1   : > { %3481 = vmatprep.subr.mxu0 %v1338_v3 }
 0x3d2   : > { %3482 = vmatpush3.msra.mxu0 %v1338_v3 }
 0x3d3   : > { %3483 = vmatprep.subr.mxu0 %v1337_v4 }
 0x3d4   : > { %3484 = vmatpush3.msra.mxu0 %v1337_v4 }
 0x3d5   : > { %3485 = vmatprep.subr.mxu0 %v1336_v5 }
 0x3d6   : > { %3486 = vmatpush3.msra.mxu0 %v1336_v5 }
 0x3d7   : > { %3488 = vmatmul.mubr.f32.vlgmr.msra.gmra.mxu0 %v1116_v49 }
 0x3d8   : > { %3490 = vmatprep.mubr.f32.mxu0 %v1117_v52 }
 0x3db   : > { %3491 = vmatmul.mubr.f32.gmra.mxu0 %v1118_v55 }
 0x477   : > { %v3413_v12 = vpop.f32.mrf.mxu0 }
 0x478   : > { %v1312_v15 = vadd.f32 %v3413_v12, %v3375_v6  ;;  %v1444_v6 = vpop.f32.mrf.mxu1 }
 0x479   : > { %v1306_v16 = vpop.f32.mrf.mxu0 }
 0x47a   : > { %v1333_v17 = vadd.f32 %v3040_v13, %v1312_v15  ;;  %v1307_v18 = vadd.f32 %v1306_v16, %v1221_v11 }
 0x47b   : > { %v3416_v19 = vpop.f32.mrf.mxu0 }
 0x47c   : > { %v1332_v22 = vadd.f32 %v3040_v13, %v1307_v18  ;;  %v1322_v23 = vadd.f32 %v3416_v19, %v3378_v14  ;;  %v1550_v25 = vmul.f32 %v4569_v8, %v1333_v17 }
 0x47d   : > { %v1316_v24 = vpop.f32.mrf.mxu0 }
 0x47e   : > { %v1549_v26 = vmul.f32 %v4567_v7, %v1332_v22  ;;  %v1335_v27 = vadd.f32 %v3040_v13, %v1322_v23  ;;  %v1317_v28 = vadd.f32 %v1316_v24, %v1231_v20  ;;  %v1571_v31 = vmul.f32 %v1550_v25, %v1550_v25 }
 0x480   : > { %v1570_v29 = vmul.f32 %v1549_v26, %v1549_v26  ;;  %v1334_v30 = vadd.f32 %v3040_v13, %v1317_v28  ;;  %v1558_v21 = vadd.f32 %v1550_v25, %v1549_v26  ;;  %v1552_v32 = vmul.f32 %v4573_v10, %v1335_v27 }
 0x482   : > { %v1551_v33 = vmul.f32 %v4571_v9, %v1334_v30  ;;  %v1574_v34 = vadd.f32 %v1571_v31, %v1570_v29  ;;  %v1573_v37 = vmul.f32 %v1552_v32, %v1552_v32 }
 0x484   : > { %v1559_v35 = vadd.f32 %v1558_v21, %v1551_v33  ;;  %v1572_v36 = vmul.f32 %v1551_v33, %v1551_v33 }
 0x486   : > { %v1560_v38 = vadd.f32 %v1559_v35, %v1552_v32  ;;  %v1575_v39 = vadd.f32 %v1574_v34, %v1572_v36  ;;  %v1585_v36 = vld [vmem:[#allocation4] sm:$0x1] }
 0x488   : > { %v1561_v40 = vrot.slane %v1560_v38, 4  ;;  %v1576_v41 = vadd.f32 %v1575_v39, %v1573_v37 }
 0x48a   : > { %v1562_v42 = vadd.f32 %v1561_v40, %v1560_v38  ;;  %v1577_v43 = vrot.slane %v1576_v41, 4 }
 0x48c   : > { %v1563_v44 = vrot.slane %v1562_v42, 2  ;;  %v1578_v45 = vadd.f32 %v1577_v43, %v1576_v41 }
 0x48e   : > { %v1564_v46 = vadd.f32 %v1563_v44, %v1562_v42  ;;  %v1579_v47 = vrot.slane %v1578_v45, 2 }
 0x490   : > { %v1565_v48 = vrot.slane %v1564_v46, 1  ;;  %v1580_v49 = vadd.f32 %v1579_v47, %v1578_v45 }
 0x492   : > { %v1566_v52 = vadd.f32 %v1565_v48, %v1564_v46  ;;  %v1581_v53 = vrot.slane %v1580_v49, 1 }
 0x494   : > { %v1567_v55 = vadd.f32 %v1566_v52, %v1557_v50  ;;  %v1582_v56 = vadd.f32 %v1581_v53, %v1580_v49 }
 0x496   : > { %1568 = vst [vmem:[#allocation3] sm:$0x1] %v1567_v55  ;;  %v1583_v58 = vadd.f32 %v1582_v56, %v1569_v54 }
 0x497   : > { %v3489_v59 = vpop.f32.mrf.mxu0 }
 0x498   : > { %1584 = vst [vmem:[#allocation3 + $0x1] sm:$0x1] %v1583_v58  ;;  %v1525_v61 = vadd.f32 %v3489_v59, %v3451_v51 }
 0x499   : > { %v1519_v63 = vpop.f32.mrf.mxu0 }
 0x49a   : > { %v1546_v0 = vadd.f32 %v3041_v60, %v1525_v61  ;;  %v1520_v2 = vadd.f32 %v1519_v63, %v1434_v57 }
 0x49b   : > { %v3492_v3 = vpop.f32.mrf.mxu0 }
 0x49c   : > { %v1545_v4 = vadd.f32 %v3041_v60, %v1520_v2  ;;  %v1535_v5 = vadd.f32 %v3492_v3, %v3454_v62  ;;  %v1554_v12 = vmul.f32 %v4569_v8, %v1546_v0 }
 0x49d   : > { %v1529_v11 = vpop.f32.mrf.mxu0 }
 0x49e   : > { %v1553_v13 = vmul.f32 %v4567_v7, %v1545_v4  ;;  %v1548_v14 = vadd.f32 %v3041_v60, %v1535_v5  ;;  %v1530_v15 = vadd.f32 %v1529_v11, %v1444_v6  ;;  %v1599_v18 = vmul.f32 %v1554_v12, %v1554_v12 }
 0x4a0   : > { %v1598_v16 = vmul.f32 %v1553_v13, %v1553_v13  ;;  %v1547_v17 = vadd.f32 %v3041_v60, %v1530_v15  ;;  %v1586_v19 = vadd.f32 %v1554_v12, %v1553_v13  ;;  %v1556_v20 = vmul.f32 %v4573_v10, %v1548_v14 }
 0x4a2   : > { %v1555_v22 = vmul.f32 %v4571_v9, %v1547_v17  ;;  %v1602_v23 = vadd.f32 %v1599_v18, %v1598_v16  ;;  %v1601_v26 = vmul.f32 %v1556_v20, %v1556_v20  ;;  %v1597_v9 = vld [vmem:[#allocation4 + $0x1] sm:$0x1] }
 0x4a4   : > { %v1587_v24 = vadd.f32 %v1586_v19, %v1555_v22  ;;  %v1600_v25 = vmul.f32 %v1555_v22, %v1555_v22 }
 0x4a6   : > { %v1588_v27 = vadd.f32 %v1587_v24, %v1556_v20  ;;  %v1603_v28 = vadd.f32 %v1602_v23, %v1600_v25 }
 0x4a8   : > { %v1589_v29 = vrot.slane %v1588_v27, 4  ;;  %v1604_v8 = vadd.f32 %v1603_v28, %v1601_v26 }
 0x4aa   : > { %v1590_v30 = vadd.f32 %v1589_v29, %v1588_v27  ;;  %v1605_v7 = vrot.slane %v1604_v8, 4 }
 0x4ac   : > { %v1591_v31 = vrot.slane %v1590_v30, 2  ;;  %v1606_v21 = vadd.f32 %v1605_v7, %v1604_v8 }
 0x4ae   : > { %v1592_v32 = vadd.f32 %v1591_v31, %v1590_v30  ;;  %v1607_v33 = vrot.slane %v1606_v21, 2 }
 0x4b0   : > { %v1593_v34 = vrot.slane %v1592_v32, 1  ;;  %v1608_v35 = vadd.f32 %v1607_v33, %v1606_v21 }
 0x4b2   : > { %v1594_v10 = vadd.f32 %v1593_v34, %v1592_v32  ;;  %v1609_v37 = vrot.slane %v1608_v35, 1 }
 0x4b4   : > { %v1595_v38 = vadd.f32 %v1594_v10, %v1585_v36  ;;  %v1610_v39 = vadd.f32 %v1609_v37, %v1608_v35 }
 0x4b6   : > { %1596 = vst [vmem:[#allocation4] sm:$0x1] %v1595_v38  ;;  %v1611_v40 = vadd.f32 %v1610_v39, %v1597_v9 }
 0x4b8   : > { %1612 = vst [vmem:[#allocation4 + $0x1] sm:$0x1] %v1611_v40 }
 0x4b9 PF: > { %p3042_p2 = scmp.ne.s32.totalorder %s4233_s28, 2 }
 0x4ba   : > { %s4266_s9 = smov (!%p3042_p2), 64   ;;  %s4267_s28 = smov (!%p3042_p2), 32  }
 0x4bb   : > { %1616 = sbr.rel (%p3042_p2) target bundleno = 3266 (0xcc2), region = 148  ;;  %s4268_s20 = smov (!%p3042_p2), 16  }
 0x4bc   : > { %s4269_s13 = smov (!%p3042_p2), 8   ;;  %s5356_s1 = sld [smem:[#allocation32_spill]] (!%p3042_p2) }
 0x4bd   : > { %s5357_s17 = sld [smem:[#allocation33_spill]] (!%p3042_p2) }
 0x4c0   : > { %v1617_v41 = vld [vmem:[#allocation2] sm:$0x3]  ;;  %v1672_v42 = vld [vmem:[#allocation5 + $0x40] sm:$0xff]  ;;  %vm1673_vm6 = vcmask 588800   ;;  %v1670_v44 = vld [vmem:[#allocation5 + $0x30] sm:$0xff]  ;;  %vm2812_vm7 = vcmask 261120  }
 0x4c1   : > { %1618 = vrot.lane.b32.xlu0 %v1617_v41, %s4266_s9  ;;  %v1671_v43 = vld [vmem:[#allocation5 + $0x38] sm:$0xff]  ;;  %3493 = vmatprep.subr.mxu0 %v1672_v42  ;;  %v1669_v47 = vld [vmem:[#allocation5 + $0x28] sm:$0xff]  ;;  %v1668_v49 = vld [vmem:[#allocation5 + $0x20] sm:$0xff] }
 0x4c2   : > { %3494 = vmatpush3.msra.mxu0 %v1672_v42  ;;  %v1660_v45 = vld [vmem:[%s4543_s24] sm:$0xff]  ;;  %v1666_v52 = vld [vmem:[#allocation5 + $0x10] sm:$0xff]  ;;  %v1665_v53 = vld [vmem:[#allocation5 + $0x8] sm:$0xff] }
 0x4c3   : > { %3495 = vmatprep.subr.mxu0 %v1671_v43  ;;  %3511 = vmatprep.mubr.msk.f32.mxu0 %vm1673_vm6, %v1660_v45  ;;  %v2225_v50 = vld [vmem:[#allocation3] sm:$0x3]  ;;  %v1664_v54 = vld [vmem:[#allocation5] sm:$0xff]  ;;  %v1662_v56 = vld [vmem:[%s4543_s24 + $0x10] sm:$0xff] }
 0x4c4   : > { %3496 = vmatpush3.msra.mxu0 %v1671_v43  ;;  %v1667_v51 = vld [vmem:[#allocation5 + $0x18] sm:$0xff]  ;;  %v1661_v55 = vld [vmem:[%s4543_s24 + $0x8] sm:$0xff]  ;;  %v1829_v3 = vld [vmem:[%s5315_s6 + $0x70] sm:$0xff] }
 0x4c5   : > { %3497 = vmatprep.subr.mxu0 %v1670_v44  ;;  %v1663_v57 = vld [vmem:[%s4543_s24 + $0x18] sm:$0xff]  ;;  %v1813_v4 = vld [vmem:[%s5314_s5 + $0x70] sm:$0xff]  ;;  %v4795_v6 = vld [vmem:[#allocation4] sm:$0x3] }
 0x4c6   : > { %3498 = vmatpush3.msra.mxu0 %v1670_v44  ;;  %v1830_v0 = vld [vmem:[%s5315_s6 + $0x78] sm:$0xff]  ;;  %v1828_v12 = vld [vmem:[%s5315_s6 + $0x68] sm:$0xff]  ;;  %v1827_v14 = vld [vmem:[%s5315_s6 + $0x60] sm:$0xff] }
 0x4c7   : > { %3499 = vmatprep.subr.mxu0 %v1669_v47  ;;  %v1814_v2 = vld [vmem:[%s5314_s5 + $0x78] sm:$0xff]  ;;  %3517 = vmatprep.subr.mxu1 %v1830_v0  ;;  %v1812_v13 = vld [vmem:[%s5314_s5 + $0x68] sm:$0xff]  ;;  %v1811_v15 = vld [vmem:[%s5314_s5 + $0x60] sm:$0xff] }
 0x4c8   : > { %3500 = vmatpush3.msra.mxu0 %v1669_v47  ;;  %3518 = vmatpush3.msra.mxu1 %v1830_v0  ;;  %v1826_v16 = vld [vmem:[%s5315_s6 + $0x58] sm:$0xff]  ;;  %v1825_v18 = vld [vmem:[%s5315_s6 + $0x50] sm:$0xff]  ;;  %v1824_v20 = vld [vmem:[%s5315_s6 + $0x48] sm:$0xff] }
 0x4c9   : > { %3501 = vmatprep.subr.mxu0 %v1668_v49  ;;  %3519 = vmatprep.subr.mxu1 %v1829_v3  ;;  %v1810_v17 = vld [vmem:[%s5314_s5 + $0x58] sm:$0xff]  ;;  %v1809_v19 = vld [vmem:[%s5314_s5 + $0x50] sm:$0xff]  ;;  %v1808_v22 = vld [vmem:[%s5314_s5 + $0x48] sm:$0xff] }
 0x4ca   : > { %3502 = vmatpush3.msra.mxu0 %v1668_v49  ;;  %3520 = vmatpush3.msra.mxu1 %v1829_v3  ;;  %v1823_v23 = vld [vmem:[%s5315_s6 + $0x40] sm:$0xff]  ;;  %v1822_v25 = vld [vmem:[%s5315_s6 + $0x38] sm:$0xff]  ;;  %v1821_v27 = vld [vmem:[%s5315_s6 + $0x30] sm:$0xff] }
 0x4cb   : > { %3503 = vmatprep.subr.mxu0 %v1667_v51  ;;  %3521 = vmatprep.subr.mxu1 %v1828_v12  ;;  %v1807_v24 = vld [vmem:[%s5314_s5 + $0x40] sm:$0xff]  ;;  %v1806_v26 = vld [vmem:[%s5314_s5 + $0x38] sm:$0xff]  ;;  %v1805_v28 = vld [vmem:[%s5314_s5 + $0x30] sm:$0xff] }
 0x4cc   : > { %3504 = vmatpush3.msra.mxu0 %v1667_v51  ;;  %3522 = vmatpush3.msra.mxu1 %v1828_v12  ;;  %v1820_v29 = vld [vmem:[%s5315_s6 + $0x28] sm:$0xff]  ;;  %v1819_v30 = vld [vmem:[%s5315_s6 + $0x20] sm:$0xff]  ;;  %v1818_v31 = vld [vmem:[%s5315_s6 + $0x18] sm:$0xff] }
 0x4cd   : > { %3505 = vmatprep.subr.mxu0 %v1666_v52  ;;  %3523 = vmatprep.subr.mxu1 %v1827_v14  ;;  %v1804_v8 = vld [vmem:[%s5314_s5 + $0x28] sm:$0xff]  ;;  %v1803_v7 = vld [vmem:[%s5314_s5 + $0x20] sm:$0xff]  ;;  %v1802_v21 = vld [vmem:[%s5314_s5 + $0x18] sm:$0xff] }
 0x4ce   : > { %3506 = vmatpush3.msra.mxu0 %v1666_v52  ;;  %3524 = vmatpush3.msra.mxu1 %v1827_v14  ;;  %v1817_v32 = vld [vmem:[%s5315_s6 + $0x10] sm:$0xff]  ;;  %v1816_v34 = vld [vmem:[%s5315_s6 + $0x8] sm:$0xff]  ;;  %v1815_v36 = vld [vmem:[%s5315_s6] sm:$0xff] }
 0x4cf   : > { %3507 = vmatprep.subr.mxu0 %v1665_v53  ;;  %3525 = vmatprep.subr.mxu1 %v1826_v16  ;;  %v1801_v33 = vld [vmem:[%s5314_s5 + $0x10] sm:$0xff]  ;;  %v1800_v35 = vld [vmem:[%s5314_s5 + $0x8] sm:$0xff]  ;;  %v1799_v10 = vld [vmem:[%s5314_s5] sm:$0xff] }
 0x4d0   : > { %3508 = vmatpush3.msra.mxu0 %v1665_v53  ;;  %3526 = vmatpush3.msra.mxu1 %v1826_v16  ;;  %v1795_v37 = vld [vmem:[%s4551_s26] sm:$0xff]  ;;  %v2043_v9 = vld [vmem:[#allocation9 + $0x78] sm:$0xff]  ;;  %v4891_v38 = vld [vmem:[%s5316_s7 + $0x78] sm:$0xff] }
 0x4d1   : > { %3509 = vmatprep.subr.mxu0 %v1664_v54  ;;  %3527 = vmatprep.subr.mxu1 %v1825_v18  ;;  %v1796_v39 = vld [vmem:[%s4551_s26 + $0x8] sm:$0xff]  ;;  %v2042_v40 = vld [vmem:[#allocation9 + $0x70] sm:$0xff]  ;;  %v2041_v42 = vld [vmem:[#allocation9 + $0x68] sm:$0xff] }
 0x4d2   : > { %3510 = vmatpush3.msra.mxu0 %v1664_v54  ;;  %3528 = vmatpush3.msra.mxu1 %v1825_v18  ;;  %v1798_v43 = vld [vmem:[%s4551_s26 + $0x18] sm:$0xff]  ;;  %v2040_v44 = vld [vmem:[#allocation9 + $0x60] sm:$0xff]  ;;  %v2039_v45 = vld [vmem:[#allocation9 + $0x58] sm:$0xff] }
 0x4d3   : > { %3512 = vmatmul.mubr.msk.f32.vlgmr.msra.gmra.mxu0 %vm1673_vm6, %v1661_v55  ;;  %3555 = vmatprep.subr.mxu0 %v1814_v2  ;;  %v2037_v47 = vld [vmem:[#allocation9 + $0x48] sm:$0xff]  ;;  %v2035_v49 = vld [vmem:[#allocation9 + $0x38] sm:$0xff]  ;;  %v2032_v52 = vld [vmem:[#allocation9 + $0x20] sm:$0xff] }
 0x4d4   : > { %3514 = vmatprep.mubr.msk.f32.mxu0 %vm1673_vm6, %v1662_v56  ;;  %3556 = vmatpush3.msra.mxu0 %v1814_v2  ;;  %v2033_v51 = vld [vmem:[#allocation9 + $0x28] sm:$0xff]  ;;  %v2031_v53 = vld [vmem:[#allocation9 + $0x18] sm:$0xff]  ;;  %v2030_v54 = vld [vmem:[#allocation9 + $0x10] sm:$0xff] }
 0x4d5   : > { %3557 = vmatprep.subr.mxu0 %v1813_v4  ;;  %3529 = vmatprep.subr.mxu1 %v1824_v20  ;;  %v2029_v55 = vld [vmem:[#allocation9 + $0x8] sm:$0xff]  ;;  %v2028_v56 = vld [vmem:[#allocation9] sm:$0xff]  ;;  %v1636_v18 = vld [vmem:[%s5312_s3] sm:$0x1] }
 0x4d6   : > { %3558 = vmatpush3.msra.mxu0 %v1813_v4  ;;  %3530 = vmatpush3.msra.mxu1 %v1824_v20 }
 0x4d7   : > { %3515 = vmatmul.mubr.msk.f32.gmra.mxu0 %vm1673_vm6, %v1663_v57  ;;  %3559 = vmatprep.subr.mxu0 %v1812_v13 }
 0x4d8   : > { %3560 = vmatpush3.msra.mxu0 %v1812_v13  ;;  %3531 = vmatprep.subr.mxu1 %v1823_v23 }
 0x4d9   : > { %3561 = vmatprep.subr.mxu0 %v1811_v15  ;;  %3532 = vmatpush3.msra.mxu1 %v1823_v23 }
 0x4da   : > { %3562 = vmatpush3.msra.mxu0 %v1811_v15  ;;  %3533 = vmatprep.subr.mxu1 %v1822_v25 }
 0x4db   : > { %3563 = vmatprep.subr.mxu0 %v1810_v17  ;;  %3534 = vmatpush3.msra.mxu1 %v1822_v25 }
 0x4dc   : > { %3564 = vmatpush3.msra.mxu0 %v1810_v17  ;;  %3535 = vmatprep.subr.mxu1 %v1821_v27 }
 0x4dd   : > { %3565 = vmatprep.subr.mxu0 %v1809_v19  ;;  %3536 = vmatpush3.msra.mxu1 %v1821_v27 }
 0x4de   : > { %3566 = vmatpush3.msra.mxu0 %v1809_v19  ;;  %3537 = vmatprep.subr.mxu1 %v1820_v29  ;;  %v4916_v19 = vsub.s32 0, %v4546_v1 }
 0x4df   : > { %3567 = vmatprep.subr.mxu0 %v1808_v22  ;;  %3538 = vmatpush3.msra.mxu1 %v1820_v29 }
 0x4e0   : > { %3568 = vmatpush3.msra.mxu0 %v1808_v22  ;;  %3539 = vmatprep.subr.mxu1 %v1819_v30 }
 0x4e1   : > { %3569 = vmatprep.subr.mxu0 %v1807_v24  ;;  %3540 = vmatpush3.msra.mxu1 %v1819_v30 }
 0x4e2   : > { %3570 = vmatpush3.msra.mxu0 %v1807_v24  ;;  %3541 = vmatprep.subr.mxu1 %v1818_v31  ;;  %v1657_v24 = vld [vmem:[#allocation7] sm:$0x1] }
 0x4e3   : > { %3571 = vmatprep.subr.mxu0 %v1806_v26  ;;  %3542 = vmatpush3.msra.mxu1 %v1818_v31 }
 0x4e4   : > { %3572 = vmatpush3.msra.mxu0 %v1806_v26  ;;  %3543 = vmatprep.subr.mxu1 %v1817_v32 }
 0x4e5   : > { %3573 = vmatprep.subr.mxu0 %v1805_v28  ;;  %3544 = vmatpush3.msra.mxu1 %v1817_v32 }
 0x4e6   : > { %3574 = vmatpush3.msra.mxu0 %v1805_v28  ;;  %3545 = vmatprep.subr.mxu1 %v1816_v34 }
 0x4e7   : > { %3575 = vmatprep.subr.mxu0 %v1804_v8  ;;  %3546 = vmatpush3.msra.mxu1 %v1816_v34 }
 0x4e8   : > { %3576 = vmatpush3.msra.mxu0 %v1804_v8  ;;  %3547 = vmatprep.subr.mxu1 %v1815_v36 }
 0x4e9   : > { %3577 = vmatprep.subr.mxu0 %v1803_v7  ;;  %3548 = vmatpush3.msra.mxu1 %v1815_v36 }
 0x4ea   : > { %3578 = vmatpush3.msra.mxu0 %v1803_v7  ;;  %3549 = vmatprep.mubr.f32.mxu1 %v1795_v37 }
 0x4eb   : > { %3579 = vmatprep.subr.mxu0 %v1802_v21  ;;  %3593 = vmatprep.subr.mxu1 %v2043_v9 }
 0x4ec   : > { %3580 = vmatpush3.msra.mxu0 %v1802_v21  ;;  %3550 = vmatmul.mubr.f32.vlgmr.msra.gmra.mxu1 %v1796_v39 }
 0x4ed   : > { %3581 = vmatprep.subr.mxu0 %v1801_v33  ;;  %3594 = vmatpush3.msra.mxu1 %v2043_v9 }
 0x4ee   : > { %3582 = vmatpush3.msra.mxu0 %v1801_v33  ;;  %3595 = vmatprep.subr.mxu1 %v2042_v40 }
 0x4ef   : > { %3583 = vmatprep.subr.mxu0 %v1800_v35  ;;  %3596 = vmatpush3.msra.mxu1 %v2042_v40  ;;  %v2022_v40 = vld [vmem:[%s5316_s7 + $0x50] sm:$0xff] }
 0x4f0   : > { %3584 = vmatpush3.msra.mxu0 %v1800_v35  ;;  %3597 = vmatprep.subr.mxu1 %v2041_v42 }
 0x4f1   : > { %3585 = vmatprep.subr.mxu0 %v1799_v10  ;;  %3598 = vmatpush3.msra.mxu1 %v2041_v42  ;;  %v2020_v42 = vld [vmem:[%s5316_s7 + $0x40] sm:$0xff] }
 0x4f2   : > { %3586 = vmatpush3.msra.mxu0 %v1799_v10  ;;  %3599 = vmatprep.subr.mxu1 %v2040_v44  ;;  %v2026_v10 = vld [vmem:[%s5316_s7 + $0x70] sm:$0xff] }
 0x4f3   : > { %3631 = vmatprep.subr.mxu0 %v4891_v38  ;;  %3600 = vmatpush3.msra.mxu1 %v2040_v44  ;;  %v2018_v44 = vld [vmem:[%s5316_s7 + $0x30] sm:$0xff] }
 0x4f4   : > { %3601 = vmatprep.subr.mxu1 %v2039_v45 }
 0x4f5   : > { %3602 = vmatpush3.msra.mxu1 %v2039_v45  ;;  %v2017_v45 = vld [vmem:[%s5316_s7 + $0x28] sm:$0xff] }
 0x533   : > { %v1619_v46 = vpop.permute.xlu0 %1618 }
 0x534   : > { %v1620_v48 = vadd.f32 %v1619_v46, %v1617_v41  ;;  %v1797_v41 = vld [vmem:[%s4551_s26 + $0x10] sm:$0xff]  ;;  %v2038_v46 = vld [vmem:[#allocation9 + $0x50] sm:$0xff] }
 0x535   : > { %3552 = vmatprep.mubr.f32.mxu1 %v1797_v41  ;;  %3603 = vmatprep.subr.mxu1 %v2038_v46 }
 0x536   : > { %1621 = vrot.lane.b32.xlu0 %v1620_v48, %s4267_s28  ;;  %3553 = vmatmul.mubr.f32.gmra.mxu1 %v1798_v43 }
 0x537   : > { %3625 = vmatprep.mubr.f32.mxu1 %v1795_v37  ;;  %3604 = vmatpush3.msra.mxu1 %v2038_v46  ;;  %v2025_v37 = vld [vmem:[%s5316_s7 + $0x68] sm:$0xff]  ;;  %v2016_v46 = vld [vmem:[%s5316_s7 + $0x20] sm:$0xff] }
 0x538   : > { %3605 = vmatprep.subr.mxu1 %v2037_v47 }
 0x539   : > { %3606 = vmatpush3.msra.mxu1 %v2037_v47  ;;  %v2015_v47 = vld [vmem:[%s5316_s7 + $0x18] sm:$0xff] }
 0x53a   : > { %2226 = vrot.lane.b32.xlu0 %v2225_v50, %s4266_s9 }
 0x5a8   : > { %v1622_v58 = vpop.permute.xlu0 %1621 }
 0x5a9   : > { %v1623_v59 = vadd.f32 %v1622_v58, %v1620_v48  ;;  %v2036_v48 = vld [vmem:[#allocation9 + $0x40] sm:$0xff] }
 0x5aa   : > { %3607 = vmatprep.subr.mxu1 %v2036_v48 }
 0x5ab   : > { %1624 = vrot.lane.b32.xlu1 %v1623_v59, %s4268_s20  ;;  %3608 = vmatpush3.msra.mxu1 %v2036_v48  ;;  %v2014_v48 = vld [vmem:[%s5316_s7 + $0x10] sm:$0xff] }
 0x5ac   : > { %v2227_v60 = vpop.permute.xlu0 %2226  ;;  %3609 = vmatprep.subr.mxu1 %v2035_v49 }
 0x5ad   : > { %v2228_v61 = vadd.f32 %v2227_v60, %v2225_v50  ;;  %v2034_v50 = vld [vmem:[#allocation9 + $0x30] sm:$0xff]  ;;  %3610 = vmatpush3.msra.mxu1 %v2035_v49  ;;  %v2013_v49 = vld [vmem:[%s5316_s7 + $0x8] sm:$0xff] }
 0x5ae   : > { %3611 = vmatprep.subr.mxu1 %v2034_v50 }
 0x5af   : > { %2229 = vrot.lane.b32.xlu0 %v2228_v61, %s4267_s28  ;;  %3612 = vmatpush3.msra.mxu1 %v2034_v50  ;;  %v2012_v50 = vld [vmem:[%s5316_s7] sm:$0xff] }
 0x5b0   : > { %3613 = vmatprep.subr.mxu1 %v2033_v51 }
 0x5b1   : > { %3614 = vmatpush3.msra.mxu1 %v2033_v51 }
 0x5b2   : > { %3615 = vmatprep.subr.mxu1 %v2032_v52 }
 0x5b3   : > { %3616 = vmatpush3.msra.mxu1 %v2032_v52 }
 0x5b4   : > { %3617 = vmatprep.subr.mxu1 %v2031_v53 }
 0x5b5   : > { %3618 = vmatpush3.msra.mxu1 %v2031_v53 }
 0x5b6   : > { %3619 = vmatprep.subr.mxu1 %v2030_v54 }
 0x5b7   : > { %3620 = vmatpush3.msra.mxu1 %v2030_v54 }
 0x5b8   : > { %3621 = vmatprep.subr.mxu1 %v2029_v55 }
 0x5b9   : > { %3622 = vmatpush3.msra.mxu1 %v2029_v55 }
 0x5ba   : > { %3623 = vmatprep.subr.mxu1 %v2028_v56 }
 0x5bb   : > { %3624 = vmatpush3.msra.mxu1 %v2028_v56 }
 0x5bc   : > { %3626 = vmatmul.mubr.f32.vlgmr.msra.gmra.mxu1 %v1796_v39  ;;  %v2024_v39 = vld [vmem:[%s5316_s7 + $0x60] sm:$0xff] }
 0x5bd   : > { %3628 = vmatprep.mubr.f32.mxu1 %v1797_v41  ;;  %v2021_v41 = vld [vmem:[%s5316_s7 + $0x48] sm:$0xff] }
 0x5c0   : > { %3629 = vmatmul.mubr.f32.gmra.mxu1 %v1798_v43  ;;  %v2019_v43 = vld [vmem:[%s5316_s7 + $0x38] sm:$0xff] }
 0x61d   : > { %v1625_v62 = vpop.permute.xlu1 %1624 }
 0x61e   : > { %v4779_v63 = vadd.f32 %v1625_v62, %v1623_v59 }
 0x620   : > { %1627 = vrot.lane.b32.xlu1 %v4779_v63, %s4269_s13 }
 0x621   : > { %v2230_v5 = vpop.permute.xlu0 %2229 }
 0x622   : > { %v4797_v11 = vadd.f32 %v2230_v5, %v2228_v61 }
 0x624   : > { %2269 = vrot.lane.b32.xlu1 %v4795_v6, %s4266_s9  ;;  %2232 = vrot.lane.b32.xlu0 %v4797_v11, %s4268_s20 }
 0x692   : > { %v1628_v57 = vpop.permute.xlu1 %1627 }
 0x693   : > { %v1629_v58 = vadd.f32 %v1628_v57, %v4779_v63  ;;  %v4270_v63 = vmov 1966171168  }
 0x694   : > { %v1641_v12 = vunpack.c.l.s4 %v4270_v63 }
 0x695   : > { %v1630_v59 = vmul.f32 0.00086805556, %v1629_v58 }
 0x696   : > { %v2270_v60 = vpop.permute.xlu1 %2269  ;;  %v2233_v61 = vpop.permute.xlu0 %2232  ;;  %v1642_v13 = vunpack.c.0.s8 %v1641_v12 }
 0x697   : > { %v1631_v62 = vmul.f32 %v1630_v59, %v1630_v59  ;;  %v4899_v0 = vadd.f32 %v2270_v60, %v4795_v6  ;;  %v4902_v2 = vadd.f32 %v2233_v61, %v4797_v11  ;;  %v3513_v6 = vpop.f32.mrf.mxu0 }
 0x698   : > { %v4909_v14 = vsub.s32 %v1642_v13, %v4546_v1  ;;  %v2265_v13 = vld [vmem:[#allocation16] sm:$0x1] }
 0x699   : > { %v1633_v3 = vrot.slane %v1631_v62, 7  ;;  %2272 = vrot.lane.b32.xlu1 %v4899_v0, %s4267_s28  ;;  %2235 = vrot.lane.b32.xlu0 %v4902_v2, %s4269_s13  ;;  %v1752_v16 = vpop.f32.mrf.mxu0 }
 0x69b   : > { %v1635_v4 = vsub.f32 %v1630_v59, %v1633_v3  ;;  %v3516_v22 = vpop.f32.mrf.mxu0 }
 0x69d   : > { %v1637_v5 = vadd.f32 1e-05, %v1635_v4  ;;  %v1762_v27 = vpop.f32.mrf.mxu0  ;;  %v2244_v4 = vld [vmem:[#allocation13] sm:$0x1] }
 0x69f   : > { %3911 = vrsqrt.f32 %v1637_v5  ;;  %v3551_v5 = vpop.f32.mrf.mxu1 }
 0x6a1   : > { %v1897_v63 = vpop.f32.mrf.mxu1 }
 0x6ac   : > { %v3912_v15 = vpop.eup %3911 }
 0x6ad   : > { %v1646_v11 = vrot.slane %v3912_v15, %v4909_v14  ;;  %v3047_v15 = vld [vmem:[#allocation10] ss:$0 sm:$0xff] }
 0x6af   : > { %v1647_v17 = vcombine.high %v1646_v11, %v1646_v11 }
 0x6b1   : > { %v1654_v20 = vrot.slane %v1647_v17, %v4909_v14 }
 0x6b3   : > { %v1656_v23 = vmul.f32 %v1654_v20, %v1636_v18 }
 0x6b5   : > { %v1658_v25 = vmul.f32 %v1656_v23, %v1630_v59  ;;  %v1775_v26 = vrot.slane %v1656_v23, %v4916_v19 }
 0x6b7   : > { %v1659_v28 = vsub.f32 %v1657_v24, %v1658_v25  ;;  %v1778_v8 = vmul.f32 %v3513_v6, %v1775_v26  ;;  %v1777_v30 = vmul.f32 %v1775_v26, %v1752_v16  ;;  %v1779_v7 = vmul.f32 %v1775_v26, %v1762_v27  ;;  %v3554_v6 = vpop.f32.mrf.mxu1 }
 0x6b8   : > { %v1780_v1 = vmul.f32 %v3516_v22, %v1775_v26 }
 0x6b9   : > { %v1785_v29 = vrot.slane %v1659_v28, %v4916_v19  ;;  %v1907_v26 = vpop.f32.mrf.mxu1 }
 0x6bb   : > { %v1788_v31 = vadd.f32 %v1785_v29, %v1778_v8  ;;  %v1787_v21 = vadd.f32 %v1785_v29, %v1777_v30  ;;  %v1789_v32 = vadd.f32 %v1785_v29, %v1779_v7  ;;  %v1790_v35 = vadd.f32 %v1785_v29, %v1780_v1 }
 0x6bd   : > { %v4921_v33 = vmax.f32 %v1788_v31, 0.0  ;;  %v4923_v34 = vmax.f32 %v1787_v21, 0.0  ;;  %v4925_v36 = vmax.f32 %v1789_v32, 0.0  ;;  %v4937_v9 = vmax.f32 %v1790_v35, 0.0 }
 0x6bf   : > { %3587 = vmatprep.mubr.f32.mxu0 %v4923_v34 }
 0x6c0   : > { %3588 = vmatmul.mubr.f32.vlgmr.msra.gmra.mxu0 %v4921_v33 }
 0x6c1   : > { %3632 = vmatpush3.msra.mxu0 %v4891_v38  ;;  %3590 = vmatprep.mubr.f32.mxu0 %v4925_v36  ;;  %v2023_v38 = vld [vmem:[%s5316_s7 + $0x58] sm:$0xff] }
 0x6c2   : > { %3633 = vmatprep.subr.mxu0 %v2026_v10 }
 0x6c3   : > { %3634 = vmatpush3.msra.mxu0 %v2026_v10 }
 0x6c4   : > { %3635 = vmatprep.subr.mxu0 %v2025_v37  ;;  %3591 = vmatmul.mubr.f32.gmra.mxu0 %v4937_v9 }
 0x6c5   : > { %3636 = vmatpush3.msra.mxu0 %v2025_v37  ;;  %3663 = vmatprep.mubr.f32.mxu0 %v4923_v34 }
 0x6c6   : > { %3637 = vmatprep.subr.mxu0 %v2024_v39 }
 0x6c7   : > { %3638 = vmatpush3.msra.mxu0 %v2024_v39 }
 0x6c8   : > { %3639 = vmatprep.subr.mxu0 %v2023_v38 }
 0x6c9   : > { %3640 = vmatpush3.msra.mxu0 %v2023_v38 }
 0x6ca   : > { %3641 = vmatprep.subr.mxu0 %v2022_v40 }
 0x6cb   : > { %3642 = vmatpush3.msra.mxu0 %v2022_v40 }
 0x6cc   : > { %3643 = vmatprep.subr.mxu0 %v2021_v41 }
 0x6cd   : > { %3644 = vmatpush3.msra.mxu0 %v2021_v41 }
 0x6ce   : > { %3645 = vmatprep.subr.mxu0 %v2020_v42 }
 0x6cf   : > { %3646 = vmatpush3.msra.mxu0 %v2020_v42 }
 0x6d0   : > { %3647 = vmatprep.subr.mxu0 %v2019_v43 }
 0x6d1   : > { %3648 = vmatpush3.msra.mxu0 %v2019_v43 }
 0x6d2   : > { %3649 = vmatprep.subr.mxu0 %v2018_v44 }
 0x6d3   : > { %3650 = vmatpush3.msra.mxu0 %v2018_v44 }
 0x6d4   : > { %3651 = vmatprep.subr.mxu0 %v2017_v45 }
 0x6d5   : > { %3652 = vmatpush3.msra.mxu0 %v2017_v45 }
 0x6d6   : > { %3653 = vmatprep.subr.mxu0 %v2016_v46 }
 0x6d7   : > { %3654 = vmatpush3.msra.mxu0 %v2016_v46 }
 0x6d8   : > { %3655 = vmatprep.subr.mxu0 %v2015_v47 }
 0x6d9   : > { %3656 = vmatpush3.msra.mxu0 %v2015_v47 }
 0x6da   : > { %3657 = vmatprep.subr.mxu0 %v2014_v48 }
 0x6db   : > { %3658 = vmatpush3.msra.mxu0 %v2014_v48 }
 0x6dc   : > { %3659 = vmatprep.subr.mxu0 %v2013_v49 }
 0x6dd   : > { %3660 = vmatpush3.msra.mxu0 %v2013_v49 }
 0x6de   : > { %3661 = vmatprep.subr.mxu0 %v2012_v50 }
 0x6df   : > { %3662 = vmatpush3.msra.mxu0 %v2012_v50 }
 0x6e0   : > { %3664 = vmatmul.mubr.f32.vlgmr.msra.gmra.mxu0 %v4921_v33 }
 0x6e1   : > { %3666 = vmatprep.mubr.f32.mxu0 %v4925_v36 }
 0x6e4   : > { %3667 = vmatmul.mubr.f32.gmra.mxu0 %v4937_v9 }
 0x70b   : > { %v2273_v51 = vpop.permute.xlu1 %2272  ;;  %v2236_v53 = vpop.permute.xlu0 %2235 }
 0x70c   : > { %v2274_v52 = vadd.f32 %v2273_v51, %v4899_v0  ;;  %v2237_v54 = vadd.f32 %v2236_v53, %v4902_v2 }
 0x70e   : > { %2275 = vrot.lane.b32.xlu1 %v2274_v52, %s4268_s20  ;;  %v2238_v55 = vmul.f32 0.00086805556, %v2237_v54 }
 0x710   : > { %v2239_v56 = vmul.f32 %v2238_v55, %v2238_v55 }
 0x712   : > { %v2241_v57 = vrot.slane %v2239_v56, 7 }
 0x714   : > { %v2243_v58 = vsub.f32 %v2238_v55, %v2241_v57 }
 0x716   : > { %v2245_v59 = vadd.f32 1e-05, %v2243_v58 }
 0x718   : > { %3913 = vrsqrt.f32 %v2245_v59  ;;  %v3627_v59 = vpop.f32.mrf.mxu1 }
 0x725   : > { %v3914_v60 = vpop.eup %3913 }
 0x726   : > { %v2254_v61 = vrot.slane %v3914_v60, %v4909_v14 }
 0x728   : > { %v2255_v62 = vcombine.high %v2254_v61, %v2254_v61 }
 0x72a   : > { %v2262_v3 = vrot.slane %v2255_v62, %v4909_v14 }
 0x72c   : > { %v2264_v0 = vmul.f32 %v2262_v3, %v2244_v4  ;;  %v2110_v3 = vpop.f32.mrf.mxu1 }
 0x72e   : > { %v2266_v12 = vmul.f32 %v2264_v0, %v2238_v55  ;;  %v2315_v22 = vrot.slane %v2264_v0, %v4916_v19  ;;  %v2287_v0 = vld [vmem:[#allocation15] sm:$0x1] }
 0x730   : > { %v2267_v16 = vsub.f32 %v2265_v13, %v2266_v12  ;;  %v3630_v12 = vpop.f32.mrf.mxu1 }
 0x732   : > { %v2325_v27 = vrot.slane %v2267_v16, %v4916_v19 }
 0x780   : > { %v3589_v2 = vpop.f32.mrf.mxu0  ;;  %v2276_v11 = vpop.permute.xlu1 %2275 }
 0x781   : > { %v1988_v17 = vadd.f32 %v3589_v2, %v3551_v5  ;;  %v2277_v18 = vadd.f32 %v2276_v11, %v2274_v52  ;;  %v2308_v11 = vld [vmem:[#allocation18] sm:$0x1] }
 0x782   : > { %v1982_v20 = vpop.f32.mrf.mxu0 }
 0x783   : > { %v2009_v23 = vadd.f32 %v3047_v15, %v1988_v17  ;;  %v1983_v24 = vadd.f32 %v1982_v20, %v1897_v63  ;;  %2278 = vrot.lane.b32.xlu1 %v2277_v18, %s4269_s13  ;;  %v2120_v20 = vpop.f32.mrf.mxu1 }
 0x784   : > { %v3592_v25 = vpop.f32.mrf.mxu0 }
 0x785   : > { %v2318_v28 = vmul.f32 %v2315_v22, %v2009_v23  ;;  %v2008_v29 = vadd.f32 %v3047_v15, %v1983_v24  ;;  %v1998_v8 = vadd.f32 %v3592_v25, %v3554_v6 }
 0x786   : > { %v1992_v30 = vpop.f32.mrf.mxu0 }
 0x787   : > { %v2317_v7 = vmul.f32 %v2315_v22, %v2008_v29  ;;  %v1993_v31 = vadd.f32 %v1992_v30, %v1907_v26  ;;  %v2328_v21 = vadd.f32 %v2325_v27, %v2318_v28  ;;  %v2011_v32 = vadd.f32 %v3047_v15, %v1998_v8 }
 0x789   : > { %v2010_v1 = vadd.f32 %v3047_v15, %v1993_v31  ;;  %v4991_v35 = vmax.f32 %v2328_v21, 0.0  ;;  %v2327_v10 = vadd.f32 %v2325_v27, %v2317_v7  ;;  %v2320_v39 = vmul.f32 %v2315_v22, %v2011_v32  ;;  %v3048_v15 = vld [vmem:[#allocation12] ss:$0 sm:$0xff] }
 0x78b   : > { %v2319_v37 = vmul.f32 %v2315_v22, %v2010_v1  ;;  %2361 = vrot.lane.b32.xlu0 %v4991_v35, %s4266_s9  ;;  %v4995_v38 = vmax.f32 %v2327_v10, 0.0  ;;  %v2330_v42 = vadd.f32 %v2325_v27, %v2320_v39 }
 0x78d   : > { %v2329_v40 = vadd.f32 %v2325_v27, %v2319_v37  ;;  %v5003_v43 = vmax.f32 %v2330_v42, 0.0 }
 0x78f   : > { %2359 = vrot.lane.b32.xlu0 %v4995_v38, %s4266_s9  ;;  %v4999_v41 = vmax.f32 %v2329_v40, 0.0 }
 0x793   : > { %2363 = vrot.lane.b32.xlu0 %v4999_v41, %s4266_s9 }
 0x797   : > { %2365 = vrot.lane.b32.xlu0 %v5003_v43, %s4266_s9 }
 0x7a0   : > { %v3665_v60 = vpop.f32.mrf.mxu0 }
 0x7a1   : > { %v2201_v6 = vadd.f32 %v3665_v60, %v3627_v59 }
 0x7a2   : > { %v2195_v4 = vpop.f32.mrf.mxu0 }
 0x7a3   : > { %v2196_v16 = vadd.f32 %v2195_v4, %v2110_v3  ;;  %v2222_v23 = vadd.f32 %v3048_v15, %v2201_v6 }
 0x7a4   : > { %v3668_v13 = vpop.f32.mrf.mxu0 }
 0x7a5   : > { %v2221_v25 = vadd.f32 %v3048_v15, %v2196_v16  ;;  %v2211_v8 = vadd.f32 %v3668_v13, %v3630_v12 }
 0x7a6   : > { %v2205_v22 = vpop.f32.mrf.mxu0 }
 0x7a7   : > { %v2206_v26 = vadd.f32 %v2205_v22, %v2120_v20  ;;  %v2224_v32 = vadd.f32 %v3048_v15, %v2211_v8 }
 0x7a9   : > { %v2223_v30 = vadd.f32 %v3048_v15, %v2206_v26 }
 0x7f5   : > { %v2279_v44 = vpop.permute.xlu1 %2278 }
 0x7f6   : > { %v2280_v45 = vadd.f32 %v2279_v44, %v2277_v18 }
 0x7f8   : > { %v2281_v46 = vmul.f32 0.00086805556, %v2280_v45 }
 0x7fa   : > { %v2282_v47 = vmul.f32 %v2281_v46, %v2281_v46 }
 0x7fc   : > { %v2284_v48 = vrot.slane %v2282_v47, 7 }
 0x7fd   : > { %v2362_v49 = vpop.permute.xlu0 %2361 }
 0x7fe   : > { %v2286_v50 = vsub.f32 %v2281_v46, %v2284_v48  ;;  %v2368_v51 = vmax.f32 %v4991_v35, %v2362_v49 }
 0x800   : > { %v2288_v52 = vadd.f32 1e-05, %v2286_v50  ;;  %2373 = vrot.lane.b32.xlu0 %v2368_v51, %s4267_s28 }
 0x801   : > { %v2360_v53 = vpop.permute.xlu0 %2359 }
 0x802   : > { %3915 = vrsqrt.f32 %v2288_v52  ;;  %v2367_v54 = vmax.f32 %v4995_v38, %v2360_v53 }
 0x804   : > { %2371 = vrot.lane.b32.xlu0 %v2367_v54, %s4267_s28 }
 0x805   : > { %v2364_v55 = vpop.permute.xlu0 %2363 }
 0x806   : > { %v2369_v56 = vmax.f32 %v4999_v41, %v2364_v55 }
 0x808   : > { %2375 = vrot.lane.b32.xlu0 %v2369_v56, %s4267_s28 }
 0x809   : > { %v2366_v57 = vpop.permute.xlu0 %2365 }
 0x80a   : > { %v2370_v58 = vmax.f32 %v5003_v43, %v2366_v57 }
 0x80c   : > { %2377 = vrot.lane.b32.xlu0 %v2370_v58, %s4267_s28 }
 0x80f   : > { %v3916_v61 = vpop.eup %3915 }
 0x810   : > { %v2297_v62 = vrot.slane %v3916_v61, %v4909_v14 }
 0x812   : > { %v2298_v5 = vcombine.high %v2297_v62, %v2297_v62 }
 0x814   : > { %v2305_v63 = vrot.slane %v2298_v5, %v4909_v14 }
 0x816   : > { %v2307_v2 = vmul.f32 %v2305_v63, %v2287_v0 }
 0x818   : > { %v2309_v17 = vmul.f32 %v2307_v2, %v2281_v46  ;;  %v2339_v18 = vrot.slane %v2307_v2, %v4916_v19 }
 0x81a   : > { %v2310_v24 = vsub.f32 %v2308_v11, %v2309_v17  ;;  %v2342_v28 = vmul.f32 %v2339_v18, %v2222_v23  ;;  %v2341_v29 = vmul.f32 %v2339_v18, %v2221_v25  ;;  %v2343_v21 = vmul.f32 %v2339_v18, %v2223_v30 }
 0x81c   : > { %v2349_v27 = vrot.slane %v2310_v24, %v4916_v19  ;;  %v2344_v19 = vmul.f32 %v2339_v18, %v2224_v32 }
 0x81e   : > { %v2352_v14 = vadd.f32 %v2349_v27, %v2342_v28  ;;  %v2351_v31 = vadd.f32 %v2349_v27, %v2341_v29  ;;  %v2353_v10 = vadd.f32 %v2349_v27, %v2343_v21  ;;  %v2354_v39 = vadd.f32 %v2349_v27, %v2344_v19 }
 0x820   : > { %v5019_v7 = vmax.f32 %v2352_v14, 0.0  ;;  %v5023_v1 = vmax.f32 %v2351_v31, 0.0  ;;  %v5027_v37 = vmax.f32 %v2353_v10, 0.0  ;;  %v5031_v40 = vmax.f32 %v2354_v39, 0.0 }
 0x822   : > { %2421 = vrot.lane.b32.xlu1 %v5019_v7, %s4266_s9 }
 0x826   : > { %2419 = vrot.lane.b32.xlu1 %v5023_v1, %s4266_s9 }
 0x82a   : > { %2423 = vrot.lane.b32.xlu1 %v5027_v37, %s4266_s9 }
 0x82e   : > { %2425 = vrot.lane.b32.xlu1 %v5031_v40, %s4266_s9 }
 0x872   : > { %v2374_v42 = vpop.permute.xlu0 %2373 }
 0x873   : > { %v2380_v44 = vmax.f32 %v2368_v51, %v2374_v42 }
 0x875   : > { %2385 = vrot.lane.b32.xlu0 %v2380_v44, %s4268_s20 }
 0x876   : > { %v2372_v45 = vpop.permute.xlu0 %2371 }
 0x877   : > { %v2379_v46 = vmax.f32 %v2367_v54, %v2372_v45 }
 0x879   : > { %2383 = vrot.lane.b32.xlu0 %v2379_v46, %s4268_s20 }
 0x87a   : > { %v2376_v47 = vpop.permute.xlu0 %2375 }
 0x87b   : > { %v2381_v48 = vmax.f32 %v2369_v56, %v2376_v47 }
 0x87d   : > { %2387 = vrot.lane.b32.xlu0 %v2381_v48, %s4268_s20 }
 0x87e   : > { %v2378_v49 = vpop.permute.xlu0 %2377 }
 0x87f   : > { %v2382_v50 = vmax.f32 %v2370_v58, %v2378_v49 }
 0x881   : > { %2389 = vrot.lane.b32.xlu0 %v2382_v50, %s4268_s20 }
 0x894   : > { %v2422_v52 = vpop.permute.xlu1 %2421 }
 0x895   : > { %v2428_v53 = vmax.f32 %v5019_v7, %v2422_v52 }
 0x897   : > { %2433 = vrot.lane.b32.xlu1 %v2428_v53, %s4267_s28 }
 0x898   : > { %v2420_v51 = vpop.permute.xlu1 %2419 }
 0x899   : > { %v2427_v55 = vmax.f32 %v5023_v1, %v2420_v51 }
 0x89b   : > { %2431 = vrot.lane.b32.xlu1 %v2427_v55, %s4267_s28 }
 0x89c   : > { %v2424_v54 = vpop.permute.xlu1 %2423 }
 0x89d   : > { %v2429_v57 = vmax.f32 %v5027_v37, %v2424_v54 }
 0x89f   : > { %2435 = vrot.lane.b32.xlu1 %v2429_v57, %s4267_s28 }
 0x8a0   : > { %v2426_v56 = vpop.permute.xlu1 %2425 }
 0x8a1   : > { %v2430_v58 = vmax.f32 %v5031_v40, %v2426_v56 }
 0x8a3   : > { %2437 = vrot.lane.b32.xlu1 %v2430_v58, %s4267_s28 }
 0x8e7   : > { %v2386_v59 = vpop.permute.xlu0 %2385 }
 0x8e8   : > { %v2392_v60 = vmax.f32 %v2380_v44, %v2386_v59 }
 0x8ea   : > { %2397 = vrot.lane.b32.xlu0 %v2392_v60, %s4269_s13 }
 0x8eb   : > { %v2384_v61 = vpop.permute.xlu0 %2383 }
 0x8ec   : > { %v2391_v62 = vmax.f32 %v2379_v46, %v2384_v61 }
 0x8ee   : > { %2395 = vrot.lane.b32.xlu0 %v2391_v62, %s4269_s13 }
 0x8ef   : > { %v2388_v3 = vpop.permute.xlu0 %2387 }
 0x8f0   : > { %v2393_v4 = vmax.f32 %v2381_v48, %v2388_v3 }
 0x8f2   : > { %2399 = vrot.lane.b32.xlu0 %v2393_v4, %s4269_s13 }
 0x8f3   : > { %v2390_v5 = vpop.permute.xlu0 %2389 }
 0x8f4   : > { %v2394_v0 = vmax.f32 %v2382_v50, %v2390_v5 }
 0x8f6   : > { %2401 = vrot.lane.b32.xlu0 %v2394_v0, %s4269_s13 }
 0x909   : > { %v2434_v63 = vpop.permute.xlu1 %2433 }
 0x90a   : > { %v2440_v12 = vmax.f32 %v2428_v53, %v2434_v63 }
 0x90c   : > { %2445 = vrot.lane.b32.xlu1 %v2440_v12, %s4268_s20 }
 0x90d   : > { %v2432_v13 = vpop.permute.xlu1 %2431 }
 0x90e   : > { %v2439_v6 = vmax.f32 %v2427_v55, %v2432_v13 }
 0x910   : > { %2443 = vrot.lane.b32.xlu1 %v2439_v6, %s4268_s20 }
 0x911   : > { %v2436_v2 = vpop.permute.xlu1 %2435 }
 0x912   : > { %v2441_v15 = vmax.f32 %v2429_v57, %v2436_v2 }
 0x914   : > { %2447 = vrot.lane.b32.xlu1 %v2441_v15, %s4268_s20 }
 0x915   : > { %v2438_v11 = vpop.permute.xlu1 %2437 }
 0x916   : > { %v2442_v16 = vmax.f32 %v2430_v58, %v2438_v11 }
 0x918   : > { %2449 = vrot.lane.b32.xlu1 %v2442_v16, %s4268_s20 }
 0x95c   : > { %v2398_v17 = vpop.permute.xlu0 %2397 }
 0x95d   : > { %v2404_v18 = vmax.f32 %v2392_v60, %v2398_v17 }
 0x95f   : > { %v2408_v20 = vsub.f32 %v4991_v35, %v2404_v18 }
 0x960   : > { %v2396_v22 = vpop.permute.xlu0 %2395 }
 0x961   : > { %v2413_v23 = vmul.f32 1.442695, %v2408_v20  ;;  %v2403_v24 = vmax.f32 %v2391_v62, %v2396_v22 }
 0x963   : > { %3917 = vpow2.f32 %v2413_v23  ;;  %v2407_v25 = vsub.f32 %v4995_v38, %v2403_v24 }
 0x964   : > { %v2400_v26 = vpop.permute.xlu0 %2399 }
 0x965   : > { %v2411_v27 = vmul.f32 1.442695, %v2407_v25  ;;  %v2405_v28 = vmax.f32 %v2393_v4, %v2400_v26  ;;  %v2610_v26 = vld [vmem:[%s5324_s15 + $0x78] sm:$0xff] }
 0x966   : > { %3707 = vmatprep.subr.mxu0 %v2610_v26 }
 0x967   : > { %3919 = vpow2.f32 %v2411_v27  ;;  %v2409_v14 = vsub.f32 %v4999_v41, %v2405_v28  ;;  %v2609_v27 = vld [vmem:[%s5324_s15 + $0x70] sm:$0xff]  ;;  %3708 = vmatpush3.msra.mxu0 %v2610_v26 }
 0x968   : > { %v2402_v29 = vpop.permute.xlu0 %2401  ;;  %3709 = vmatprep.subr.mxu0 %v2609_v27 }
 0x969   : > { %v2415_v8 = vmul.f32 1.442695, %v2409_v14  ;;  %v2406_v30 = vmax.f32 %v2394_v0, %v2402_v29  ;;  %v2608_v14 = vld [vmem:[%s5324_s15 + $0x68] sm:$0xff]  ;;  %3710 = vmatpush3.msra.mxu0 %v2609_v27 }
 0x96a   : > { %3711 = vmatprep.subr.mxu0 %v2608_v14 }
 0x96b   : > { %3921 = vpow2.f32 %v2415_v8  ;;  %v2410_v31 = vsub.f32 %v5003_v43, %v2406_v30  ;;  %v2607_v8 = vld [vmem:[%s5324_s15 + $0x60] sm:$0xff]  ;;  %3712 = vmatpush3.msra.mxu0 %v2608_v14 }
 0x96c   : > { %3713 = vmatprep.subr.mxu0 %v2607_v8 }
 0x96d   : > { %v2417_v21 = vmul.f32 1.442695, %v2410_v31  ;;  %3714 = vmatpush3.msra.mxu0 %v2607_v8  ;;  %v2626_v8 = vld [vmem:[%s5356_s1 + $0x58] sm:$0xff] }
 0x96f   : > { %3923 = vpow2.f32 %v2417_v21 }
 0x970   : > { %v5059_v35 = vpop.eup %3917 }
 0x971   : > { %2481 = vrot.lane.b32.xlu0 %v5059_v35, %s4266_s9 }
 0x974   : > { %v5063_v38 = vpop.eup %3919 }
 0x975   : > { %2479 = vrot.lane.b32.xlu0 %v5063_v38, %s4266_s9 }
 0x978   : > { %v5067_v32 = vpop.eup %3921 }
 0x979   : > { %2483 = vrot.lane.b32.xlu0 %v5067_v32, %s4266_s9 }
 0x97c   : > { %v5071_v41 = vpop.eup %3923 }
 0x97d   : > { %2485 = vrot.lane.b32.xlu0 %v5071_v41, %s4266_s9 }
 0x97e   : > { %v2446_v43 = vpop.permute.xlu1 %2445 }
 0x97f   : > { %v2452_v10 = vmax.f32 %v2440_v12, %v2446_v43  ;;  %v2606_v43 = vld [vmem:[%s5324_s15 + $0x58] sm:$0xff] }
 0x980   : > { %3715 = vmatprep.subr.mxu0 %v2606_v43 }
 0x981   : > { %2457 = vrot.lane.b32.xlu1 %v2452_v10, %s4269_s13  ;;  %3716 = vmatpush3.msra.mxu0 %v2606_v43 }
 0x982   : > { %v2444_v19 = vpop.permute.xlu1 %2443 }
 0x983   : > { %v2451_v39 = vmax.f32 %v2439_v6, %v2444_v19  ;;  %v2604_v19 = vld [vmem:[%s5324_s15 + $0x48] sm:$0xff] }
 0x985   : > { %2455 = vrot.lane.b32.xlu1 %v2451_v39, %s4269_s13 }
 0x986   : > { %v2448_v42 = vpop.permute.xlu1 %2447 }
 0x987   : > { %v2453_v44 = vmax.f32 %v2441_v15, %v2448_v42  ;;  %v2602_v42 = vld [vmem:[%s5324_s15 + $0x38] sm:$0xff] }
 0x989   : > { %2459 = vrot.lane.b32.xlu1 %v2453_v44, %s4269_s13 }
 0x98a   : > { %v2450_v45 = vpop.permute.xlu1 %2449 }
 0x98b   : > { %v2454_v46 = vmax.f32 %v2442_v16, %v2450_v45  ;;  %v2601_v45 = vld [vmem:[%s5324_s15 + $0x30] sm:$0xff] }
 0x98d   : > { %2461 = vrot.lane.b32.xlu1 %v2454_v46, %s4269_s13 }
 0x9e3   : > { %v2482_v47 = vpop.permute.xlu0 %2481 }
 0x9e4   : > { %v2488_v48 = vadd.f32 %v5059_v35, %v2482_v47  ;;  %v2600_v47 = vld [vmem:[%s5324_s15 + $0x28] sm:$0xff] }
 0x9e6   : > { %2493 = vrot.lane.b32.xlu0 %v2488_v48, %s4267_s28 }
 0x9e7   : > { %v2480_v49 = vpop.permute.xlu0 %2479 }
 0x9e8   : > { %v2487_v50 = vadd.f32 %v5063_v38, %v2480_v49  ;;  %v2599_v49 = vld [vmem:[%s5324_s15 + $0x20] sm:$0xff] }
 0x9ea   : > { %2491 = vrot.lane.b32.xlu0 %v2487_v50, %s4267_s28 }
 0x9eb   : > { %v2484_v52 = vpop.permute.xlu0 %2483 }
 0x9ec   : > { %v2489_v53 = vadd.f32 %v5067_v32, %v2484_v52  ;;  %v2598_v52 = vld [vmem:[%s5324_s15 + $0x18] sm:$0xff] }
 0x9ee   : > { %2495 = vrot.lane.b32.xlu0 %v2489_v53, %s4267_s28 }
 0x9ef   : > { %v2486_v51 = vpop.permute.xlu0 %2485 }
 0x9f0   : > { %v2490_v55 = vadd.f32 %v5071_v41, %v2486_v51 }
 0x9f2   : > { %2497 = vrot.lane.b32.xlu0 %v2490_v55, %s4267_s28 }
 0x9f3   : > { %v2458_v54 = vpop.permute.xlu1 %2457 }
 0x9f4   : > { %v2464_v57 = vmax.f32 %v2452_v10, %v2458_v54  ;;  %v2605_v10 = vld [vmem:[%s5324_s15 + $0x50] sm:$0xff]  ;;  %v2596_v54 = vld [vmem:[%s5324_s15 + $0x8] sm:$0xff] }
 0x9f5   : > { %3717 = vmatprep.subr.mxu0 %v2605_v10 }
 0x9f6   : > { %v2468_v56 = vsub.f32 %v5019_v7, %v2464_v57  ;;  %3718 = vmatpush3.msra.mxu0 %v2605_v10  ;;  %v2595_v57 = vld [vmem:[%s5324_s15] sm:$0xff] }
 0x9f7   : > { %v2456_v58 = vpop.permute.xlu1 %2455  ;;  %3719 = vmatprep.subr.mxu0 %v2604_v19 }
 0x9f8   : > { %v2473_v59 = vmul.f32 1.442695, %v2468_v56  ;;  %v2463_v60 = vmax.f32 %v2451_v39, %v2456_v58  ;;  %v2603_v39 = vld [vmem:[%s5324_s15 + $0x40] sm:$0xff]  ;;  %3720 = vmatpush3.msra.mxu0 %v2604_v19 }
 0x9f9   : > { %3721 = vmatprep.subr.mxu0 %v2603_v39  ;;  %v2619_v19 = vld [vmem:[%s5356_s1 + $0x20] sm:$0xff] }
 0x9fa   : > { %3925 = vpow2.f32 %v2473_v59  ;;  %v2467_v61 = vsub.f32 %v5023_v1, %v2463_v60  ;;  %3722 = vmatpush3.msra.mxu0 %v2603_v39 }
 0x9fb   : > { %v2460_v62 = vpop.permute.xlu1 %2459  ;;  %3723 = vmatprep.subr.mxu0 %v2602_v42 }
 0x9fc   : > { %v2471_v3 = vmul.f32 1.442695, %v2467_v61  ;;  %v2465_v4 = vmax.f32 %v2453_v44, %v2460_v62  ;;  %3724 = vmatpush3.msra.mxu0 %v2602_v42  ;;  %v2630_v62 = vld [vmem:[%s5356_s1 + $0x78] sm:$0xff] }
 0x9fd   : > { %3725 = vmatprep.subr.mxu0 %v2601_v45  ;;  %3669 = vmatprep.subr.mxu1 %v2630_v62  ;;  %v2618_v42 = vld [vmem:[%s5356_s1 + $0x18] sm:$0xff] }
 0x9fe   : > { %3927 = vpow2.f32 %v2471_v3  ;;  %v2469_v5 = vsub.f32 %v5027_v37, %v2465_v4  ;;  %3726 = vmatpush3.msra.mxu0 %v2601_v45  ;;  %v2629_v3 = vld [vmem:[%s5356_s1 + $0x70] sm:$0xff]  ;;  %3670 = vmatpush3.msra.mxu1 %v2630_v62 }
 0x9ff   : > { %v2462_v0 = vpop.permute.xlu1 %2461  ;;  %3727 = vmatprep.subr.mxu0 %v2600_v47  ;;  %3671 = vmatprep.subr.mxu1 %v2629_v3 }
 0xa00   : > { %v2475_v63 = vmul.f32 1.442695, %v2469_v5  ;;  %v2466_v12 = vmax.f32 %v2454_v46, %v2462_v0  ;;  %3728 = vmatpush3.msra.mxu0 %v2600_v47  ;;  %v2628_v5 = vld [vmem:[%s5356_s1 + $0x68] sm:$0xff]  ;;  %3672 = vmatpush3.msra.mxu1 %v2629_v3  ;;  %v3949_v3 = vld [vmem:[%s4551_s26] sm:$0xff] }
 0xa01   : > { %3729 = vmatprep.subr.mxu0 %v2599_v49  ;;  %3673 = vmatprep.subr.mxu1 %v2628_v5  ;;  %v2616_v47 = vld [vmem:[%s5356_s1 + $0x8] sm:$0xff] }
 0xa02   : > { %3929 = vpow2.f32 %v2475_v63  ;;  %v2470_v13 = vsub.f32 %v5031_v40, %v2466_v12  ;;  %3730 = vmatpush3.msra.mxu0 %v2599_v49  ;;  %v2627_v63 = vld [vmem:[%s5356_s1 + $0x60] sm:$0xff]  ;;  %3674 = vmatpush3.msra.mxu1 %v2628_v5 }
 0xa03   : > { %3731 = vmatprep.subr.mxu0 %v2598_v52  ;;  %3675 = vmatprep.subr.mxu1 %v2627_v63 }
 0xa04   : > { %v2477_v6 = vmul.f32 1.442695, %v2470_v13  ;;  %3732 = vmatpush3.msra.mxu0 %v2598_v52  ;;  %3676 = vmatpush3.msra.mxu1 %v2627_v63 }
 0xa05   : > { %3677 = vmatprep.subr.mxu1 %v2626_v8 }
 0xa06   : > { %3931 = vpow2.f32 %v2477_v6  ;;  %3678 = vmatpush3.msra.mxu1 %v2626_v8 }
 0xa07   : > { %v5091_v7 = vpop.eup %3925 }
 0xa08   : > { %2537 = vrot.lane.b32.xlu1 %v5091_v7, %s4266_s9 }
 0xa0b   : > { %v5095_v1 = vpop.eup %3927 }
 0xa0c   : > { %2535 = vrot.lane.b32.xlu1 %v5095_v1, %s4266_s9 }
 0xa0f   : > { %v5099_v2 = vpop.eup %3929 }
 0xa10   : > { %2539 = vrot.lane.b32.xlu1 %v5099_v2, %s4266_s9 }
 0xa13   : > { %v5103_v37 = vpop.eup %3931 }
 0xa14   : > { %2541 = vrot.lane.b32.xlu1 %v5103_v37, %s4266_s9 }
 0xa58   : > { %v2494_v40 = vpop.permute.xlu0 %2493 }
 0xa59   : > { %v2500_v15 = vadd.f32 %v2494_v40, %v2488_v48 }
 0xa5b   : > { %2505 = vrot.lane.b32.xlu0 %v2500_v15, %s4268_s20 }
 0xa5c   : > { %v2492_v11 = vpop.permute.xlu0 %2491 }
 0xa5d   : > { %v2499_v16 = vadd.f32 %v2492_v11, %v2487_v50 }
 0xa5f   : > { %2503 = vrot.lane.b32.xlu0 %v2499_v16, %s4268_s20 }
 0xa60   : > { %v2496_v17 = vpop.permute.xlu0 %2495 }
 0xa61   : > { %v5109_v18 = vadd.f32 %v2496_v17, %v2489_v53  ;;  %v2597_v53 = vld [vmem:[%s5324_s15 + $0x10] sm:$0xff] }
 0xa62   : > { %3733 = vmatprep.subr.mxu0 %v2597_v53 }
 0xa63   : > { %2507 = vrot.lane.b32.xlu0 %v5109_v18, %s4268_s20  ;;  %3734 = vmatpush3.msra.mxu0 %v2597_v53 }
 0xa64   : > { %v2498_v20 = vpop.permute.xlu0 %2497  ;;  %3735 = vmatprep.subr.mxu0 %v2596_v54 }
 0xa65   : > { %v5113_v22 = vadd.f32 %v2498_v20, %v2490_v55  ;;  %3736 = vmatpush3.msra.mxu0 %v2596_v54 }
 0xa66   : > { %3737 = vmatprep.subr.mxu0 %v2595_v57 }
 0xa67   : > { %2509 = vrot.lane.b32.xlu0 %v5113_v22, %s4268_s20  ;;  %3738 = vmatpush3.msra.mxu0 %v2595_v57 }
 0xa7a   : > { %v2538_v23 = vpop.permute.xlu1 %2537 }
 0xa7b   : > { %v5118_v24 = vadd.f32 %v5091_v7, %v2538_v23 }
 0xa7d   : > { %2549 = vrot.lane.b32.xlu1 %v5118_v24, %s4267_s28 }
 0xa7e   : > { %v2536_v25 = vpop.permute.xlu1 %2535 }
 0xa7f   : > { %v5129_v28 = vadd.f32 %v5095_v1, %v2536_v25 }
 0xa81   : > { %2547 = vrot.lane.b32.xlu1 %v5129_v28, %s4267_s28 }
 0xa82   : > { %v2540_v29 = vpop.permute.xlu1 %2539 }
 0xa83   : > { %v5140_v30 = vadd.f32 %v5099_v2, %v2540_v29 }
 0xa85   : > { %2551 = vrot.lane.b32.xlu1 %v5140_v30, %s4267_s28 }
 0xa86   : > { %v2542_v31 = vpop.permute.xlu1 %2541 }
 0xa87   : > { %v5145_v21 = vadd.f32 %v5103_v37, %v2542_v31 }
 0xa89   : > { %2553 = vrot.lane.b32.xlu1 %v5145_v21, %s4267_s28 }
 0xacd   : > { %v2506_v44 = vpop.permute.xlu0 %2505 }
 0xace   : > { %v2512_v46 = vadd.f32 %v2506_v44, %v2500_v15  ;;  %v2617_v44 = vld [vmem:[%s5356_s1 + $0x10] sm:$0xff] }
 0xad0   : > { %2517 = vrot.lane.b32.xlu0 %v2512_v46, %s4269_s13 }
 0xad1   : > { %v2504_v48 = vpop.permute.xlu0 %2503 }
 0xad2   : > { %v2511_v50 = vadd.f32 %v2504_v48, %v2499_v16  ;;  %v2615_v48 = vld [vmem:[%s5356_s1] sm:$0xff] }
 0xad4   : > { %2515 = vrot.lane.b32.xlu0 %v2511_v50, %s4269_s13 }
 0xad5   : > { %v2508_v51 = vpop.permute.xlu0 %2507 }
 0xad6   : > { %v2513_v55 = vadd.f32 %v2508_v51, %v5109_v18 }
 0xad8   : > { %2519 = vrot.lane.b32.xlu0 %v2513_v55, %s4269_s13 }
 0xad9   : > { %v2510_v56 = vpop.permute.xlu0 %2509 }
 0xada   : > { %v2514_v58 = vadd.f32 %v2510_v56, %v5113_v22 }
 0xadc   : > { %2521 = vrot.lane.b32.xlu0 %v2514_v58, %s4269_s13 }
 0xaef   : > { %v2550_v59 = vpop.permute.xlu1 %2549 }
 0xaf0   : > { %v5192_v60 = vadd.f32 %v2550_v59, %v5118_v24 }
 0xaf2   : > { %2561 = vrot.lane.b32.xlu1 %v5192_v60, %s4268_s20 }
 0xaf3   : > { %v2548_v61 = vpop.permute.xlu1 %2547 }
 0xaf4   : > { %v5203_v4 = vadd.f32 %v2548_v61, %v5129_v28 }
 0xaf6   : > { %2559 = vrot.lane.b32.xlu1 %v5203_v4, %s4268_s20 }
 0xaf7   : > { %v2552_v0 = vpop.permute.xlu1 %2551 }
 0xaf8   : > { %v5214_v12 = vadd.f32 %v2552_v0, %v5140_v30  ;;  %v2623_v30 = vld [vmem:[%s5356_s1 + $0x40] sm:$0xff]  ;;  %v3950_v0 = vld [vmem:[%s4551_s26 + $0x8] sm:$0xff] }
 0xafa   : > { %2563 = vrot.lane.b32.xlu1 %v5214_v12, %s4268_s20 }
 0xafb   : > { %v2554_v13 = vpop.permute.xlu1 %2553 }
 0xafc   : > { %v5219_v6 = vadd.f32 %v2554_v13, %v5145_v21  ;;  %v2621_v21 = vld [vmem:[%s5356_s1 + $0x30] sm:$0xff] }
 0xafd   : > { %v3951_v13 = vld [vmem:[%s4551_s26 + $0x10] sm:$0xff] }
 0xafe   : > { %2565 = vrot.lane.b32.xlu1 %v5219_v6, %s4268_s20 }
 0xb42   : > { %v2518_v40 = vpop.permute.xlu0 %2517 }
 0xb43   : > { %v2524_v15 = vadd.f32 %v2518_v40, %v2512_v46 }
 0xb45   : > { %3933 = vrcp.f32 %v2524_v15 }
 0xb46   : > { %v2516_v11 = vpop.permute.xlu0 %2515 }
 0xb47   : > { %v2523_v16 = vadd.f32 %v2516_v11, %v2511_v50 }
 0xb49   : > { %3935 = vrcp.f32 %v2523_v16 }
 0xb4a   : > { %v2520_v17 = vpop.permute.xlu0 %2519 }
 0xb4b   : > { %v2525_v18 = vadd.f32 %v2520_v17, %v2513_v55  ;;  %v3049_v17 = vld [vmem:[%s5357_s17] ss:$0 sm:$0xff] }
 0xb4d   : > { %3937 = vrcp.f32 %v2525_v18 }
 0xb4e   : > { %v2522_v20 = vpop.permute.xlu0 %2521 }
 0xb4f   : > { %v2526_v22 = vadd.f32 %v2522_v20, %v2514_v58 }
 0xb51   : > { %3939 = vrcp.f32 %v2526_v22 }
 0xb52   : > { %v3934_v23 = vpop.eup %3933 }
 0xb53   : > { %v2530_v25 = vmul.f32 %v3934_v23, %v5059_v35  ;;  %v2625_v35 = vld [vmem:[%s5356_s1 + $0x50] sm:$0xff] }
 0xb54   : > { %3679 = vmatprep.subr.mxu1 %v2625_v35 }
 0xb55   : > { %v2592_v14 = vmul.f32 %v2530_v25, %v4921_v33  ;;  %3680 = vmatpush3.msra.mxu1 %v2625_v35 }
 0xb56   : > { %v3936_v24 = vpop.eup %3935 }
 0xb57   : > { %v2528_v26 = vmul.f32 %v3936_v24, %v5063_v38 }
 0xb59   : > { %v2591_v27 = vmul.f32 %v2528_v26, %v4923_v34 }
 0xb5a   : > { %v3938_v28 = vpop.eup %3937 }
 0xb5b   : > { %3739 = vmatprep.mubr.f32.mxu0 %v2591_v27  ;;  %v2532_v29 = vmul.f32 %v3938_v28, %v5067_v32  ;;  %v2624_v32 = vld [vmem:[%s5356_s1 + $0x48] sm:$0xff] }
 0xb5c   : > { %3740 = vmatmul.mubr.f32.vlgmr.msra.gmra.mxu0 %v2592_v14  ;;  %3681 = vmatprep.subr.mxu1 %v2624_v32 }
 0xb5d   : > { %v2593_v38 = vmul.f32 %v2532_v29, %v4925_v36  ;;  %3682 = vmatpush3.msra.mxu1 %v2624_v32  ;;  %v2622_v36 = vld [vmem:[%s5356_s1 + $0x38] sm:$0xff] }
 0xb5e   : > { %v3940_v34 = vpop.eup %3939  ;;  %3683 = vmatprep.subr.mxu1 %v2623_v30 }
 0xb5f   : > { %3742 = vmatprep.mubr.f32.mxu0 %v2593_v38  ;;  %v2534_v33 = vmul.f32 %v3940_v34, %v5071_v41  ;;  %3684 = vmatpush3.msra.mxu1 %v2623_v30 }
 0xb60   : > { %3685 = vmatprep.subr.mxu1 %v2622_v36 }
 0xb61   : > { %v2594_v31 = vmul.f32 %v2534_v33, %v4937_v9  ;;  %3686 = vmatpush3.msra.mxu1 %v2622_v36  ;;  %v2620_v9 = vld [vmem:[%s5356_s1 + $0x28] sm:$0xff] }
 0xb62   : > { %3687 = vmatprep.subr.mxu1 %v2621_v21 }
 0xb63   : > { %3743 = vmatmul.mubr.f32.gmra.mxu0 %v2594_v31  ;;  %3688 = vmatpush3.msra.mxu1 %v2621_v21 }
 0xb64   : > { %v2562_v41 = vpop.permute.xlu1 %2561  ;;  %3689 = vmatprep.subr.mxu1 %v2620_v9 }
 0xb65   : > { %v2568_v43 = vadd.f32 %v2562_v41, %v5192_v60  ;;  %3690 = vmatpush3.msra.mxu1 %v2620_v9 }
 0xb66   : > { %3691 = vmatprep.subr.mxu1 %v2619_v19 }
 0xb67   : > { %2573 = vrot.lane.b32.xlu1 %v2568_v43, %s4269_s13  ;;  %3692 = vmatpush3.msra.mxu1 %v2619_v19 }
 0xb68   : > { %v2560_v10 = vpop.permute.xlu1 %2559  ;;  %3693 = vmatprep.subr.mxu1 %v2618_v42 }
 0xb69   : > { %v2567_v39 = vadd.f32 %v2560_v10, %v5203_v4  ;;  %3694 = vmatpush3.msra.mxu1 %v2618_v42 }
 0xb6a   : > { %3695 = vmatprep.subr.mxu1 %v2617_v44 }
 0xb6b   : > { %2571 = vrot.lane.b32.xlu1 %v2567_v39, %s4269_s13  ;;  %3696 = vmatpush3.msra.mxu1 %v2617_v44 }
 0xb6c   : > { %v2564_v45 = vpop.permute.xlu1 %2563  ;;  %3697 = vmatprep.subr.mxu1 %v2616_v47 }
 0xb6d   : > { %v2569_v46 = vadd.f32 %v2564_v45, %v5214_v12  ;;  %3698 = vmatpush3.msra.mxu1 %v2616_v47 }
 0xb6e   : > { %3699 = vmatprep.subr.mxu1 %v2615_v48 }
 0xb6f   : > { %2575 = vrot.lane.b32.xlu1 %v2569_v46, %s4269_s13  ;;  %3700 = vmatpush3.msra.mxu1 %v2615_v48 }
 0xb70   : > { %v2566_v49 = vpop.permute.xlu1 %2565 }
 0xb71   : > { %v2570_v50 = vadd.f32 %v2566_v49, %v5219_v6 }
 0xb73   : > { %2577 = vrot.lane.b32.xlu1 %v2570_v50, %s4269_s13 }
 0xbd9   : > { %v2574_v52 = vpop.permute.xlu1 %2573 }
 0xbda   : > { %v2580_v53 = vadd.f32 %v2574_v52, %v2568_v43 }
 0xbdc   : > { %3941 = vrcp.f32 %v2580_v53 }
 0xbdd   : > { %v2572_v51 = vpop.permute.xlu1 %2571 }
 0xbde   : > { %v2579_v55 = vadd.f32 %v2572_v51, %v2567_v39 }
 0xbe0   : > { %3943 = vrcp.f32 %v2579_v55 }
 0xbe1   : > { %v2576_v54 = vpop.permute.xlu1 %2575 }
 0xbe2   : > { %v2581_v57 = vadd.f32 %v2576_v54, %v2569_v46 }
 0xbe4   : > { %3945 = vrcp.f32 %v2581_v57 }
 0xbe5   : > { %v2578_v56 = vpop.permute.xlu1 %2577 }
 0xbe6   : > { %v2582_v58 = vadd.f32 %v2578_v56, %v2570_v50 }
 0xbe8   : > { %3947 = vrcp.f32 %v2582_v58 }
 0xbe9   : > { %v3942_v59 = vpop.eup %3941 }
 0xbea   : > { %v2586_v61 = vmul.f32 %v3942_v59, %v5091_v7  ;;  %v3952_v7 = vld [vmem:[%s4551_s26 + $0x18] sm:$0xff] }
 0xbec   : > { %v2612_v63 = vmul.f32 %v3950_v0, %v2586_v61 }
 0xbed   : > { %v3944_v60 = vpop.eup %3943 }
 0xbee   : > { %v2584_v62 = vmul.f32 %v3944_v60, %v5095_v1 }
 0xbf0   : > { %v2611_v4 = vmul.f32 %v3949_v3, %v2584_v62 }
 0xbf1   : > { %v3946_v5 = vpop.eup %3945 }
 0xbf2   : > { %3701 = vmatprep.mubr.f32.mxu1 %v2611_v4  ;;  %v2588_v12 = vmul.f32 %v3946_v5, %v5099_v2 }
 0xbf3   : > { %3702 = vmatmul.mubr.f32.vlgmr.msra.gmra.mxu1 %v2612_v63 }
 0xbf4   : > { %v2613_v6 = vmul.f32 %v3951_v13, %v2588_v12 }
 0xbf5   : > { %v3948_v40 = vpop.eup %3947 }
 0xbf6   : > { %3704 = vmatprep.mubr.f32.mxu1 %v2613_v6  ;;  %v2590_v15 = vmul.f32 %v3948_v40, %v5103_v37 }
 0xbf8   : > { %v2614_v11 = vmul.f32 %v3952_v7, %v2590_v15 }
 0xbfa   : > { %3705 = vmatmul.mubr.f32.gmra.mxu1 %v2614_v11 }
 0xc1c   : > { %v3741_v1 = vpop.f32.mrf.mxu0 }
 0xc1e   : > { %v2782_v2 = vpop.f32.mrf.mxu0 }
 0xc23   : > { %v3744_v24 = vpop.f32.mrf.mxu0 }
 0xc25   : > { %v2792_v27 = vpop.f32.mrf.mxu0 }
 0xcb3   : > { %v3703_v16 = vpop.f32.mrf.mxu1 }
 0xcb4   : > { %v2788_v18 = vadd.f32 %v3741_v1, %v3703_v16 }
 0xcb5   : > { %v2697_v20 = vpop.f32.mrf.mxu1 }
 0xcb6   : > { %v2809_v22 = vadd.f32 %v3049_v17, %v2788_v18  ;;  %v2783_v23 = vadd.f32 %v2782_v2, %v2697_v20 }
 0xcb8   : > { %2814 = vst.msk [vmem:[%s4560_s21 + $0x8] sm:$0xff] %vm2812_vm7, %v2809_v22  ;;  %v2808_v37 = vadd.f32 %v3049_v17, %v2783_v23 }
 0xcba   : > { %2813 = vst.msk [vmem:[%s4560_s21] sm:$0xff] %vm2812_vm7, %v2808_v37  ;;  %v3706_v25 = vpop.f32.mrf.mxu1 }
 0xcbb   : > { %v2798_v26 = vadd.f32 %v3744_v24, %v3706_v25 }
 0xcbc   : > { %v2707_v28 = vpop.f32.mrf.mxu1 }
 0xcbd   : > { %v2811_v14 = vadd.f32 %v3049_v17, %v2798_v26  ;;  %v2793_v29 = vadd.f32 %v2792_v27, %v2707_v28 }
 0xcbf   : > { %2816 = vst.msk [vmem:[%s4560_s21 + $0x18] sm:$0xff] %vm2812_vm7, %v2811_v14  ;;  %v2810_v8 = vadd.f32 %v3049_v17, %v2793_v29 }
 0xcc1   : > { %2815 = vst.msk [vmem:[%s4560_s21 + $0x10] sm:$0xff] %vm2812_vm7, %v2810_v8 }
 0xcc2 PF: > { %s5358_s26 = sld [smem:[#allocation24_spill]]  ;;  %s5359_s27 = smov %s4237_s29 }
 0xcc3   : > { %s5360_s28 = smov %s4241_s30  ;;  %s5361_s29 = smov %s5364_s25 }
 0xcc4   : > { %s5362_s30 = smov %s5368_s16 }
 0xcc8   : > { %s33_s0 = sadd.s32 1, %s5358_s26  }
 0xcc9   : > { %p30_p5 = scmp.ge.s32.totalorder %s33_s0, 11  }
 0xccb   :  { %32 = sbr.rel (!%p30_p5) target bundleno = 17 (0x11), region = 182 }
 0xcd0   :  { %2845 = vsyncpa [#allocation6], 1 }
 0xcd1   :  { %2847 = vsyncpa [#allocation6 + $0x1], 1 }
 0xcd2   :  { %2848 = vsyncpa [#allocation8], 1 }
 0xcd3   :  { %2849 = vsyncpa [#allocation11], 1 }
 0xcd4   :  { %2850 = vsyncpa [#allocation14], 1 }
 0xcd5   :  { %2851 = vsyncpa [#allocation17], 1 }

</bundles_post_ra>
